<compile_context>
chip_gen: v5e
topology: v5e:2x2
jax: 0.10.0
libtpu: 0.0.40
codegen_flags: <defaults>
</compile_context>

<pallas_src>
import functools

import numpy as np
import jax
import jax.numpy as jnp
from jax.experimental import pallas as pl
from jax.experimental.pallas import tpu as pltpu

_LP = 8  # left zero-pad columns in the conv scratch -> interior store is sublane-aligned


# --------------------------- wrapper-side constant builders -------------------

def _pool_select_matrices(Hc, Wc):
    """(4, Hc/2*Wc/2, Hc*Wc) 0/1 matrices; row p=(i,j) of matrix t=(dy,dx) picks (2i+dy, 2j+dx)."""
    Hp, Wp = Hc // 2, Wc // 2
    sel = np.zeros((4, Hp * Wp, Hc * Wc), np.float32)
    for t in range(4):
        dy, dx = t // 2, t % 2
        for i in range(Hp):
            for j in range(Wp):
                sel[t, i * Wp + j, (2 * i + dy) * Wc + (2 * j + dx)] = 1.0
    return sel


def _avg_pool_matrix(Hc, Wc, f0, f1):
    """(f0*f1, Hc*Wc) matrix implementing AdaptiveAvgPool2d((f0,f1)) for divisible dims."""
    bh, bw = Hc // f0, Wc // f1
    m = np.zeros((f0 * f1, Hc * Wc), np.float32)
    for i in range(f0):
        for j in range(f1):
            for h in range(i * bh, (i + 1) * bh):
                for w in range(j * bw, (j + 1) * bw):
                    m[i * f1 + j, h * Wc + w] = 1.0 / (bh * bw)
    return m


# --------------------------- fused Pallas kernel ------------------------------

def _make_kernel(plan):
    """plan: list of ('conv', H, W, Cin, Cout) | ('pool', H, W, C).  One image per grid step."""

    def kernel(*refs):
        f32 = jnp.float32
        k = 0
        x_ref = refs[k]; k += 1
        layer_refs = []
        for p in plan:
            if p[0] == 'conv':
                layer_refs.append((refs[k], refs[k + 1])); k += 2
            else:
                layer_refs.append((refs[k],)); k += 1
        pavg_ref = refs[k]; wfc_ref = refs[k + 1]; fcb_ref = refs[k + 2]; k += 3
        out_ref = refs[k]; k += 1
        pad_refs = refs[k:]

        _, H0, W0, C0 = x_ref.shape
        act = x_ref[0].reshape(H0 * W0, C0).astype(f32)      # activations held as (H*W, C)

        ci = 0
        for p, lrefs in zip(plan, layer_refs):
            if p[0] == 'conv':
                _, Hc, Wc, Cin, Cout = p
                w_ref, b_ref = lrefs
                pad_ref = pad_refs[ci]; ci += 1
                # zero-pad into VMEM scratch; interior starts at column _LP (sublane-aligned).
                pad_ref[...] = jnp.zeros(pad_ref.shape, f32)
                pad_ref[1:Hc + 1, _LP:_LP + Wc, :] = act.reshape(Hc, Wc, Cin)
                xp = pad_ref[...]
                acc = jnp.zeros((Hc * Wc, Cout), f32)
                # direct 3x3 convolution: 9 accumulating MXU matmuls (one per tap).
                for dy in range(3):
                    for dx in range(3):
                        tap = xp[dy:dy + Hc, _LP - 1 + dx:_LP - 1 + dx + Wc, :]
                        acc = acc + jnp.dot(tap.reshape(Hc * Wc, Cin), w_ref[dy, dx],
                                            preferred_element_type=f32)
                act = jnp.maximum(acc + b_ref[0], 0.0)
            else:
                # 2x2 max-pool (stride 2) as 4 gather-matmuls + elementwise max.
                (sel_ref,) = lrefs
                m = None
                for t in range(4):
                    g = jnp.dot(sel_ref[t], act, preferred_element_type=f32)
                    m = g if m is None else jnp.maximum(m, g)
                act = m

        # adaptive avg-pool as one matmul: (f0*f1, H*W) @ (H*W, C) -> (f0*f1, C)
        pooled = jnp.dot(pavg_ref[...], act, preferred_element_type=f32)
        # classifier; channel-major flatten already folded into wfc at pack time.
        out = fcb_ref[...]                                   # (1, K)
        for s in range(pooled.shape[0]):
            out = out + jnp.dot(pooled[s:s + 1, :], wfc_ref[s], preferred_element_type=f32)
        out_ref[0] = out.astype(out_ref.dtype)

    return kernel


# --------------------------- params / packing ---------------------------------

def init_params(key, cfg, output_neurons, features, num_classes, in_channels=3):
    """Conv weights in (3,3,Cin,Cout) (== torch weight.transpose(2,3,1,0)); fc in torch (K,F)."""
    params = {"convs": []}
    c = in_channels
    for v in cfg:
        if v == 'M':
            continue
        cout = int(v)
        key, kw, kb = jax.random.split(key, 3)
        w = jax.random.normal(kw, (3, 3, c, cout), jnp.float32) / np.sqrt(9.0 * c)
        b = 0.01 * jax.random.normal(kb, (cout,), jnp.float32)
        params["convs"].append((w, b))
        c = cout
    f_in = output_neurons * features[0] * features[1]
    key, kw, kb = jax.random.split(key, 3)
    params["fc_w"] = jax.random.normal(kw, (num_classes, f_in), jnp.float32) / np.sqrt(float(f_in))
    params["fc_b"] = 0.01 * jax.random.normal(kb, (num_classes,), jnp.float32)
    return params


def pack_params(params, cfg, features, input_hw, in_channels=3):
    """One-time packing: layer plan, pooling/selection constants, permuted FC weights."""
    H, W = input_hw
    plan, arrays = [], []
    Hc, Wc, C = H, W, in_channels
    conv_i = 0
    for v in cfg:
        if v == 'M':
            assert Hc % 2 == 0 and Wc % 2 == 0, "maxpool2x2 kernel assumes even spatial dims"
            plan.append(('pool', Hc, Wc, C))
            arrays.append(jnp.asarray(_pool_select_matrices(Hc, Wc)))
            Hc, Wc = Hc // 2, Wc // 2
        else:
            cout = int(v)
            plan.append(('conv', Hc, Wc, C, cout))
            w, b = params["convs"][conv_i]; conv_i += 1
            arrays.append(w)
            arrays.append(b.reshape(1, cout))
            C = cout
    f0, f1 = features
    assert Hc % f0 == 0 and Wc % f1 == 0, "adaptive pool assumes evenly divisible spatial dims"
    pavg = jnp.asarray(_avg_pool_matrix(Hc, Wc, f0, f1))
    K = params["fc_w"].shape[0]
    assert params["fc_w"].shape[1] == C * f0 * f1
    # wfc[s, c, k] = fc_w[k, c*f0*f1 + s]  (folds torch.flatten's channel-major order + linear)
    wfc = jnp.transpose(params["fc_w"].reshape(K, C, f0 * f1), (2, 1, 0))
    fcb = params["fc_b"].reshape(1, K)
    return dict(plan=plan, layer_arrays=arrays, pavg=pavg, wfc=wfc, fcb=fcb,
                num_classes=K, input_hw=(H, W), in_channels=in_channels)


def _const_spec(a):
    zeros = (0,) * a.ndim
    return pl.BlockSpec(a.shape, lambda n, _z=zeros: _z)


def small2dnet_forward(packed, x_nchw):
    """x_nchw: (N, Cin, H, W) float32 (PyTorch layout). Returns (N, num_classes)."""
    plan = packed["plan"]
    K = packed["num_classes"]
    N, Cin, H, W = x_nchw.shape
    assert (H, W) == packed["input_hw"] and Cin == packed["in_channels"]
    x = jnp.transpose(x_nchw, (0, 2, 3, 1))          # NCHW -> NHWC (only remaining glue op)

    inputs = [x] + list(packed["layer_arrays"]) + [packed["pavg"], packed["wfc"], packed["fcb"]]
    in_specs = [pl.BlockSpec((1, H, W, Cin), lambda n: (n, 0, 0, 0))]
    in_specs += [_const_spec(a) for a in inputs[1:]]

    scratch = [pltpu.VMEM((p[1] + 2, p[2] + 2 * _LP, p[3]), jnp.float32)
               for p in plan if p[0] == 'conv']

    out = pl.pallas_call(
        _make_kernel(plan),
        out_shape=jax.ShapeDtypeStruct((N, 1, K), jnp.float32),
        grid=(N,),
        in_specs=in_specs,
        out_specs=pl.BlockSpec((1, 1, K), lambda n: (n, 0, 0)),
        scratch_shapes=scratch,
        compiler_params=pltpu.CompilerParams(dimension_semantics=("parallel",)),
    )(*inputs)
    return out.reshape(N, K)


# --------------------------- pure-JAX reference --------------------------------

def reference_forward(params, x_nchw, cfg, features):
    x = x_nchw
    ci = 0
    for v in cfg:
        if v == 'M':
            n, c, h, w = x.shape
            x = x.reshape(n, c, h // 2, 2, w // 2, 2).max(axis=(3, 5))
        else:
            w_, b_ = params["convs"][ci]; ci += 1
            x = jax.lax.conv_general_dilated(
                x, w_, window_strides=(1, 1), padding="SAME",
                dimension_numbers=("NCHW", "HWIO", "NCHW"))
            x = jnp.maximum(x + b_.reshape(1, -1, 1, 1), 0.0)
    n, c, h, w = x.shape
    f0, f1 = features
    x = x.reshape(n, c, f0, h // f0, f1, w // f1).mean(axis=(3, 5))
    x = x.reshape(n, -1)
    return x @ params["fc_w"].T + params["fc_b"]


# --------------------------- main ----------------------------------------------

if __name__ == "__main__":
    # small config consistent with the module: cfg = [8, 'M', 16]
    # 16x16 input -> conv(3->8)+relu -> maxpool -> 8x8 -> conv(8->16)+relu -> avgpool(2,2) -> fc(64->10)
    cfg = [8, 'M', 16]
    output_neurons = 16
    features = (2, 2)
    num_classes = 10

    key = jax.random.PRNGKey(0)
    key, kx = jax.random.split(key)
    x = jax.random.normal(kx, (2, 3, 16, 16), jnp.float32)     # NCHW, like PyTorch

    params = init_params(key, cfg, output_neurons, features, num_classes)
    packed = pack_params(params, cfg, features, input_hw=(16, 16))

    fwd = jax.jit(functools.partial(small2dnet_forward, packed))
    out = fwd(x)
    jax.block_until_ready(out)
    assert out.shape == (2, num_classes) and out.dtype == jnp.float32

    ref = reference_forward(params, x, cfg, features)
    assert jnp.allclose(out, ref, rtol=2e-3, atol=2e-3), (out, ref)

    print("KERNEL_OK")
</pallas_src>

<mosaic_0001>
module attributes {stable_mosaic.version = 11 : i64} {
  func.func @kernel(%arg0: i32, %arg1: memref<1x16x16x3xf32, #tpu.memory_space<vmem>>, %arg2: memref<3x3x3x8xf32, #tpu.memory_space<vmem>>, %arg3: memref<1x8xf32, #tpu.memory_space<vmem>>, %arg4: memref<4x64x256xf32, #tpu.memory_space<vmem>>, %arg5: memref<3x3x8x16xf32, #tpu.memory_space<vmem>>, %arg6: memref<1x16xf32, #tpu.memory_space<vmem>>, %arg7: memref<4x64xf32, #tpu.memory_space<vmem>>, %arg8: memref<4x16x10xf32, #tpu.memory_space<vmem>>, %arg9: memref<1x10xf32, #tpu.memory_space<vmem>>, %arg10: memref<1x1x10xf32, #tpu.memory_space<vmem>>, %arg11: memref<18x32x3xf32, #tpu.memory_space<vmem>>, %arg12: memref<10x24x8xf32, #tpu.memory_space<vmem>>) attributes {dimension_semantics = [#tpu.dimension_semantics<parallel>], iteration_bounds = array<i64: 2>, scalar_prefetch = 0 : i64, scratch_operands = 2 : i64, tpu.core_type = #tpu.core_type<tc>, window_params = [{transform_indices = @transform_0, window_bounds = array<i64: 1, 16, 16, 3>}, {pipeline_mode = #tpu.pipeline_mode<synchronous>, transform_indices = @transform_1, window_bounds = array<i64: 3, 3, 3, 8>}, {pipeline_mode = #tpu.pipeline_mode<synchronous>, transform_indices = @transform_2, window_bounds = array<i64: 1, 8>}, {pipeline_mode = #tpu.pipeline_mode<synchronous>, transform_indices = @transform_3, window_bounds = array<i64: 4, 64, 256>}, {pipeline_mode = #tpu.pipeline_mode<synchronous>, transform_indices = @transform_4, window_bounds = array<i64: 3, 3, 8, 16>}, {pipeline_mode = #tpu.pipeline_mode<synchronous>, transform_indices = @transform_5, window_bounds = array<i64: 1, 16>}, {pipeline_mode = #tpu.pipeline_mode<synchronous>, transform_indices = @transform_6, window_bounds = array<i64: 4, 64>}, {pipeline_mode = #tpu.pipeline_mode<synchronous>, transform_indices = @transform_7, window_bounds = array<i64: 4, 16, 10>}, {pipeline_mode = #tpu.pipeline_mode<synchronous>, transform_indices = @transform_8, window_bounds = array<i64: 1, 10>}, {transform_indices = @transform_9, window_bounds = array<i64: 1, 1, 10>}]} {
    %c0 = arith.constant 0 : index
    %c0_0 = arith.constant 0 : index
    %c0_1 = arith.constant 0 : index
    %c0_2 = arith.constant 0 : index
    %0 = vector.load %arg1[%c0, %c0_0, %c0_1, %c0_2] : memref<1x16x16x3xf32, #tpu.memory_space<vmem>>, vector<1x16x16x3xf32>
    %1 = vector.shape_cast %0 : vector<1x16x16x3xf32> to vector<16x16x3xf32>
    %2 = vector.shape_cast %1 : vector<16x16x3xf32> to vector<256x3xf32>
    %cst = arith.constant 0.000000e+00 : f32
    %3 = vector.broadcast %cst : f32 to vector<18x32x3xf32>
    %c0_3 = arith.constant 0 : index
    %c0_4 = arith.constant 0 : index
    %c0_5 = arith.constant 0 : index
    %4 = vector.load %arg11[%c0_3, %c0_4, %c0_5] : memref<18x32x3xf32, #tpu.memory_space<vmem>>, vector<18x32x3xf32>
    tpu.vector_store %arg11[%c0_3, %c0_4, %c0_5], %3 {strides = array<i32>} : memref<18x32x3xf32, #tpu.memory_space<vmem>>, vector<18x32x3xf32>,
    %5 = vector.shape_cast %2 : vector<256x3xf32> to vector<16x16x3xf32>
    %c1 = arith.constant 1 : index
    %c8 = arith.constant 8 : index
    %c0_6 = arith.constant 0 : index
    %6 = vector.load %arg11[%c1, %c8, %c0_6] : memref<18x32x3xf32, #tpu.memory_space<vmem>>, vector<16x16x3xf32>
    tpu.vector_store %arg11[%c1, %c8, %c0_6], %5 {strides = array<i32>} : memref<18x32x3xf32, #tpu.memory_space<vmem>>, vector<16x16x3xf32>,
    %c0_7 = arith.constant 0 : index
    %c0_8 = arith.constant 0 : index
    %c0_9 = arith.constant 0 : index
    %7 = vector.load %arg11[%c0_7, %c0_8, %c0_9] : memref<18x32x3xf32, #tpu.memory_space<vmem>>, vector<18x32x3xf32>
    %cst_10 = arith.constant 0.000000e+00 : f32
    %8 = vector.broadcast %cst_10 : f32 to vector<256x8xf32>
    %9 = vector.extract_strided_slice %7 {offsets = [0, 7, 0], sizes = [16, 16, 3], strides = [1, 1, 1]} : vector<18x32x3xf32> to vector<16x16x3xf32>
    %10 = vector.shape_cast %9 : vector<16x16x3xf32> to vector<256x3xf32>
    %c0_11 = arith.constant 0 : index
    %c0_12 = arith.constant 0 : index
    %c0_13 = arith.constant 0 : index
    %c0_14 = arith.constant 0 : index
    %11 = vector.load %arg2[%c0_11, %c0_12, %c0_13, %c0_14] : memref<3x3x3x8xf32, #tpu.memory_space<vmem>>, vector<1x1x3x8xf32>
    %12 = vector.shape_cast %11 : vector<1x1x3x8xf32> to vector<3x8xf32>
    %cst_15 = arith.constant dense<0.000000e+00> : vector<256x8xf32>
    %13 = tpu.matmul %10, %12, %cst_15 {dimension_numbers = #tpu.dot_dimension_numbers<[1], [0], [0], [1], [0, 0, 1, 1], [], []>} : vector<256x3xf32>, vector<3x8xf32>, vector<256x8xf32> -> vector<256x8xf32>
    %14 = arith.addf %8, %13 : vector<256x8xf32>
    %15 = vector.extract_strided_slice %7 {offsets = [0, 8, 0], sizes = [16, 16, 3], strides = [1, 1, 1]} : vector<18x32x3xf32> to vector<16x16x3xf32>
    %16 = vector.shape_cast %15 : vector<16x16x3xf32> to vector<256x3xf32>
    %c0_16 = arith.constant 0 : index
    %c1_17 = arith.constant 1 : index
    %c0_18 = arith.constant 0 : index
    %c0_19 = arith.constant 0 : index
    %17 = vector.load %arg2[%c0_16, %c1_17, %c0_18, %c0_19] : memref<3x3x3x8xf32, #tpu.memory_space<vmem>>, vector<1x1x3x8xf32>
    %18 = vector.shape_cast %17 : vector<1x1x3x8xf32> to vector<3x8xf32>
    %cst_20 = arith.constant dense<0.000000e+00> : vector<256x8xf32>
    %19 = tpu.matmul %16, %18, %cst_20 {dimension_numbers = #tpu.dot_dimension_numbers<[1], [0], [0], [1], [0, 0, 1, 1], [], []>} : vector<256x3xf32>, vector<3x8xf32>, vector<256x8xf32> -> vector<256x8xf32>
    %20 = arith.addf %14, %19 : vector<256x8xf32>
    %21 = vector.extract_strided_slice %7 {offsets = [0, 9, 0], sizes = [16, 16, 3], strides = [1, 1, 1]} : vector<18x32x3xf32> to vector<16x16x3xf32>
    %22 = vector.shape_cast %21 : vector<16x16x3xf32> to vector<256x3xf32>
    %c0_21 = arith.constant 0 : index
    %c2 = arith.constant 2 : index
    %c0_22 = arith.constant 0 : index
    %c0_23 = arith.constant 0 : index
    %23 = vector.load %arg2[%c0_21, %c2, %c0_22, %c0_23] : memref<3x3x3x8xf32, #tpu.memory_space<vmem>>, vector<1x1x3x8xf32>
    %24 = vector.shape_cast %23 : vector<1x1x3x8xf32> to vector<3x8xf32>
    %cst_24 = arith.constant dense<0.000000e+00> : vector<256x8xf32>
    %25 = tpu.matmul %22, %24, %cst_24 {dimension_numbers = #tpu.dot_dimension_numbers<[1], [0], [0], [1], [0, 0, 1, 1], [], []>} : vector<256x3xf32>, vector<3x8xf32>, vector<256x8xf32> -> vector<256x8xf32>
    %26 = arith.addf %20, %25 : vector<256x8xf32>
    %27 = vector.extract_strided_slice %7 {offsets = [1, 7, 0], sizes = [16, 16, 3], strides = [1, 1, 1]} : vector<18x32x3xf32> to vector<16x16x3xf32>
    %28 = vector.shape_cast %27 : vector<16x16x3xf32> to vector<256x3xf32>
    %c1_25 = arith.constant 1 : index
    %c0_26 = arith.constant 0 : index
    %c0_27 = arith.constant 0 : index
    %c0_28 = arith.constant 0 : index
    %29 = vector.load %arg2[%c1_25, %c0_26, %c0_27, %c0_28] : memref<3x3x3x8xf32, #tpu.memory_space<vmem>>, vector<1x1x3x8xf32>
    %30 = vector.shape_cast %29 : vector<1x1x3x8xf32> to vector<3x8xf32>
    %cst_29 = arith.constant dense<0.000000e+00> : vector<256x8xf32>
    %31 = tpu.matmul %28, %30, %cst_29 {dimension_numbers = #tpu.dot_dimension_numbers<[1], [0], [0], [1], [0, 0, 1, 1], [], []>} : vector<256x3xf32>, vector<3x8xf32>, vector<256x8xf32> -> vector<256x8xf32>
    %32 = arith.addf %26, %31 : vector<256x8xf32>
    %33 = vector.extract_strided_slice %7 {offsets = [1, 8, 0], sizes = [16, 16, 3], strides = [1, 1, 1]} : vector<18x32x3xf32> to vector<16x16x3xf32>
    %34 = vector.shape_cast %33 : vector<16x16x3xf32> to vector<256x3xf32>
    %c1_30 = arith.constant 1 : index
    %c1_31 = arith.constant 1 : index
    %c0_32 = arith.constant 0 : index
    %c0_33 = arith.constant 0 : index
    %35 = vector.load %arg2[%c1_30, %c1_31, %c0_32, %c0_33] : memref<3x3x3x8xf32, #tpu.memory_space<vmem>>, vector<1x1x3x8xf32>
    %36 = vector.shape_cast %35 : vector<1x1x3x8xf32> to vector<3x8xf32>
    %cst_34 = arith.constant dense<0.000000e+00> : vector<256x8xf32>
    %37 = tpu.matmul %34, %36, %cst_34 {dimension_numbers = #tpu.dot_dimension_numbers<[1], [0], [0], [1], [0, 0, 1, 1], [], []>} : vector<256x3xf32>, vector<3x8xf32>, vector<256x8xf32> -> vector<256x8xf32>
    %38 = arith.addf %32, %37 : vector<256x8xf32>
    %39 = vector.extract_strided_slice %7 {offsets = [1, 9, 0], sizes = [16, 16, 3], strides = [1, 1, 1]} : vector<18x32x3xf32> to vector<16x16x3xf32>
    %40 = vector.shape_cast %39 : vector<16x16x3xf32> to vector<256x3xf32>
    %c1_35 = arith.constant 1 : index
    %c2_36 = arith.constant 2 : index
    %c0_37 = arith.constant 0 : index
    %c0_38 = arith.constant 0 : index
    %41 = vector.load %arg2[%c1_35, %c2_36, %c0_37, %c0_38] : memref<3x3x3x8xf32, #tpu.memory_space<vmem>>, vector<1x1x3x8xf32>
    %42 = vector.shape_cast %41 : vector<1x1x3x8xf32> to vector<3x8xf32>
    %cst_39 = arith.constant dense<0.000000e+00> : vector<256x8xf32>
    %43 = tpu.matmul %40, %42, %cst_39 {dimension_numbers = #tpu.dot_dimension_numbers<[1], [0], [0], [1], [0, 0, 1, 1], [], []>} : vector<256x3xf32>, vector<3x8xf32>, vector<256x8xf32> -> vector<256x8xf32>
    %44 = arith.addf %38, %43 : vector<256x8xf32>
    %45 = vector.extract_strided_slice %7 {offsets = [2, 7, 0], sizes = [16, 16, 3], strides = [1, 1, 1]} : vector<18x32x3xf32> to vector<16x16x3xf32>
    %46 = vector.shape_cast %45 : vector<16x16x3xf32> to vector<256x3xf32>
    %c2_40 = arith.constant 2 : index
    %c0_41 = arith.constant 0 : index
    %c0_42 = arith.constant 0 : index
    %c0_43 = arith.constant 0 : index
    %47 = vector.load %arg2[%c2_40, %c0_41, %c0_42, %c0_43] : memref<3x3x3x8xf32, #tpu.memory_space<vmem>>, vector<1x1x3x8xf32>
    %48 = vector.shape_cast %47 : vector<1x1x3x8xf32> to vector<3x8xf32>
    %cst_44 = arith.constant dense<0.000000e+00> : vector<256x8xf32>
    %49 = tpu.matmul %46, %48, %cst_44 {dimension_numbers = #tpu.dot_dimension_numbers<[1], [0], [0], [1], [0, 0, 1, 1], [], []>} : vector<256x3xf32>, vector<3x8xf32>, vector<256x8xf32> -> vector<256x8xf32>
    %50 = arith.addf %44, %49 : vector<256x8xf32>
    %51 = vector.extract_strided_slice %7 {offsets = [2, 8, 0], sizes = [16, 16, 3], strides = [1, 1, 1]} : vector<18x32x3xf32> to vector<16x16x3xf32>
    %52 = vector.shape_cast %51 : vector<16x16x3xf32> to vector<256x3xf32>
    %c2_45 = arith.constant 2 : index
    %c1_46 = arith.constant 1 : index
    %c0_47 = arith.constant 0 : index
    %c0_48 = arith.constant 0 : index
    %53 = vector.load %arg2[%c2_45, %c1_46, %c0_47, %c0_48] : memref<3x3x3x8xf32, #tpu.memory_space<vmem>>, vector<1x1x3x8xf32>
    %54 = vector.shape_cast %53 : vector<1x1x3x8xf32> to vector<3x8xf32>
    %cst_49 = arith.constant dense<0.000000e+00> : vector<256x8xf32>
    %55 = tpu.matmul %52, %54, %cst_49 {dimension_numbers = #tpu.dot_dimension_numbers<[1], [0], [0], [1], [0, 0, 1, 1], [], []>} : vector<256x3xf32>, vector<3x8xf32>, vector<256x8xf32> -> vector<256x8xf32>
    %56 = arith.addf %50, %55 : vector<256x8xf32>
    %57 = vector.extract_strided_slice %7 {offsets = [2, 9, 0], sizes = [16, 16, 3], strides = [1, 1, 1]} : vector<18x32x3xf32> to vector<16x16x3xf32>
    %58 = vector.shape_cast %57 : vector<16x16x3xf32> to vector<256x3xf32>
    %c2_50 = arith.constant 2 : index
    %c2_51 = arith.constant 2 : index
    %c0_52 = arith.constant 0 : index
    %c0_53 = arith.constant 0 : index
    %59 = vector.load %arg2[%c2_50, %c2_51, %c0_52, %c0_53] : memref<3x3x3x8xf32, #tpu.memory_space<vmem>>, vector<1x1x3x8xf32>
    %60 = vector.shape_cast %59 : vector<1x1x3x8xf32> to vector<3x8xf32>
    %cst_54 = arith.constant dense<0.000000e+00> : vector<256x8xf32>
    %61 = tpu.matmul %58, %60, %cst_54 {dimension_numbers = #tpu.dot_dimension_numbers<[1], [0], [0], [1], [0, 0, 1, 1], [], []>} : vector<256x3xf32>, vector<3x8xf32>, vector<256x8xf32> -> vector<256x8xf32>
    %62 = arith.addf %56, %61 : vector<256x8xf32>
    %c0_55 = arith.constant 0 : index
    %c0_56 = arith.constant 0 : index
    %63 = vector.load %arg3[%c0_55, %c0_56] : memref<1x8xf32, #tpu.memory_space<vmem>>, vector<1x8xf32>
    %64 = vector.shape_cast %63 : vector<1x8xf32> to vector<8xf32>
    %65 = vector.shape_cast %64 : vector<8xf32> to vector<1x8xf32>
    %66 = vector.broadcast %65 : vector<1x8xf32> to vector<256x8xf32>
    %67 = arith.addf %62, %66 : vector<256x8xf32>
    %cst_57 = arith.constant 0.000000e+00 : f32
    %68 = vector.broadcast %cst_57 : f32 to vector<256x8xf32>
    %69 = arith.maximumf %67, %68 : vector<256x8xf32>
    %c0_58 = arith.constant 0 : index
    %c0_59 = arith.constant 0 : index
    %c0_60 = arith.constant 0 : index
    %70 = vector.load %arg4[%c0_58, %c0_59, %c0_60] : memref<4x64x256xf32, #tpu.memory_space<vmem>>, vector<1x64x256xf32>
    %71 = vector.shape_cast %70 : vector<1x64x256xf32> to vector<64x256xf32>
    %cst_61 = arith.constant dense<0.000000e+00> : vector<64x8xf32>
    %72 = tpu.matmul %71, %69, %cst_61 {dimension_numbers = #tpu.dot_dimension_numbers<[1], [0], [0], [1], [0, 0, 1, 1], [], []>} : vector<64x256xf32>, vector<256x8xf32>, vector<64x8xf32> -> vector<64x8xf32>
    %c1_62 = arith.constant 1 : index
    %c0_63 = arith.constant 0 : index
    %c0_64 = arith.constant 0 : index
    %73 = vector.load %arg4[%c1_62, %c0_63, %c0_64] : memref<4x64x256xf32, #tpu.memory_space<vmem>>, vector<1x64x256xf32>
    %74 = vector.shape_cast %73 : vector<1x64x256xf32> to vector<64x256xf32>
    %cst_65 = arith.constant dense<0.000000e+00> : vector<64x8xf32>
    %75 = tpu.matmul %74, %69, %cst_65 {dimension_numbers = #tpu.dot_dimension_numbers<[1], [0], [0], [1], [0, 0, 1, 1], [], []>} : vector<64x256xf32>, vector<256x8xf32>, vector<64x8xf32> -> vector<64x8xf32>
    %76 = arith.maximumf %72, %75 : vector<64x8xf32>
    %c2_66 = arith.constant 2 : index
    %c0_67 = arith.constant 0 : index
    %c0_68 = arith.constant 0 : index
    %77 = vector.load %arg4[%c2_66, %c0_67, %c0_68] : memref<4x64x256xf32, #tpu.memory_space<vmem>>, vector<1x64x256xf32>
    %78 = vector.shape_cast %77 : vector<1x64x256xf32> to vector<64x256xf32>
    %cst_69 = arith.constant dense<0.000000e+00> : vector<64x8xf32>
    %79 = tpu.matmul %78, %69, %cst_69 {dimension_numbers = #tpu.dot_dimension_numbers<[1], [0], [0], [1], [0, 0, 1, 1], [], []>} : vector<64x256xf32>, vector<256x8xf32>, vector<64x8xf32> -> vector<64x8xf32>
    %80 = arith.maximumf %76, %79 : vector<64x8xf32>
    %c3 = arith.constant 3 : index
    %c0_70 = arith.constant 0 : index
    %c0_71 = arith.constant 0 : index
    %81 = vector.load %arg4[%c3, %c0_70, %c0_71] : memref<4x64x256xf32, #tpu.memory_space<vmem>>, vector<1x64x256xf32>
    %82 = vector.shape_cast %81 : vector<1x64x256xf32> to vector<64x256xf32>
    %cst_72 = arith.constant dense<0.000000e+00> : vector<64x8xf32>
    %83 = tpu.matmul %82, %69, %cst_72 {dimension_numbers = #tpu.dot_dimension_numbers<[1], [0], [0], [1], [0, 0, 1, 1], [], []>} : vector<64x256xf32>, vector<256x8xf32>, vector<64x8xf32> -> vector<64x8xf32>
    %84 = arith.maximumf %80, %83 : vector<64x8xf32>
    %cst_73 = arith.constant 0.000000e+00 : f32
    %85 = vector.broadcast %cst_73 : f32 to vector<10x24x8xf32>
    %c0_74 = arith.constant 0 : index
    %c0_75 = arith.constant 0 : index
    %c0_76 = arith.constant 0 : index
    %86 = vector.load %arg12[%c0_74, %c0_75, %c0_76] : memref<10x24x8xf32, #tpu.memory_space<vmem>>, vector<10x24x8xf32>
    tpu.vector_store %arg12[%c0_74, %c0_75, %c0_76], %85 {strides = array<i32>} : memref<10x24x8xf32, #tpu.memory_space<vmem>>, vector<10x24x8xf32>,
    %87 = vector.shape_cast %84 : vector<64x8xf32> to vector<8x8x8xf32>
    %c1_77 = arith.constant 1 : index
    %c8_78 = arith.constant 8 : index
    %c0_79 = arith.constant 0 : index
    %88 = vector.load %arg12[%c1_77, %c8_78, %c0_79] : memref<10x24x8xf32, #tpu.memory_space<vmem>>, vector<8x8x8xf32>
    tpu.vector_store %arg12[%c1_77, %c8_78, %c0_79], %87 {strides = array<i32>} : memref<10x24x8xf32, #tpu.memory_space<vmem>>, vector<8x8x8xf32>,
    %c0_80 = arith.constant 0 : index
    %c0_81 = arith.constant 0 : index
    %c0_82 = arith.constant 0 : index
    %89 = vector.load %arg12[%c0_80, %c0_81, %c0_82] : memref<10x24x8xf32, #tpu.memory_space<vmem>>, vector<10x24x8xf32>
    %cst_83 = arith.constant 0.000000e+00 : f32
    %90 = vector.broadcast %cst_83 : f32 to vector<64x16xf32>
    %91 = vector.extract_strided_slice %89 {offsets = [0, 7, 0], sizes = [8, 8, 8], strides = [1, 1, 1]} : vector<10x24x8xf32> to vector<8x8x8xf32>
    %92 = vector.shape_cast %91 : vector<8x8x8xf32> to vector<64x8xf32>
    %c0_84 = arith.constant 0 : index
    %c0_85 = arith.constant 0 : index
    %c0_86 = arith.constant 0 : index
    %c0_87 = arith.constant 0 : index
    %93 = vector.load %arg5[%c0_84, %c0_85, %c0_86, %c0_87] : memref<3x3x8x16xf32, #tpu.memory_space<vmem>>, vector<1x1x8x16xf32>
    %94 = vector.shape_cast %93 : vector<1x1x8x16xf32> to vector<8x16xf32>
    %cst_88 = arith.constant dense<0.000000e+00> : vector<64x16xf32>
    %95 = tpu.matmul %92, %94, %cst_88 {dimension_numbers = #tpu.dot_dimension_numbers<[1], [0], [0], [1], [0, 0, 1, 1], [], []>} : vector<64x8xf32>, vector<8x16xf32>, vector<64x16xf32> -> vector<64x16xf32>
    %96 = arith.addf %90, %95 : vector<64x16xf32>
    %97 = vector.extract_strided_slice %89 {offsets = [0, 8, 0], sizes = [8, 8, 8], strides = [1, 1, 1]} : vector<10x24x8xf32> to vector<8x8x8xf32>
    %98 = vector.shape_cast %97 : vector<8x8x8xf32> to vector<64x8xf32>
    %c0_89 = arith.constant 0 : index
    %c1_90 = arith.constant 1 : index
    %c0_91 = arith.constant 0 : index
    %c0_92 = arith.constant 0 : index
    %99 = vector.load %arg5[%c0_89, %c1_90, %c0_91, %c0_92] : memref<3x3x8x16xf32, #tpu.memory_space<vmem>>, vector<1x1x8x16xf32>
    %100 = vector.shape_cast %99 : vector<1x1x8x16xf32> to vector<8x16xf32>
    %cst_93 = arith.constant dense<0.000000e+00> : vector<64x16xf32>
    %101 = tpu.matmul %98, %100, %cst_93 {dimension_numbers = #tpu.dot_dimension_numbers<[1], [0], [0], [1], [0, 0, 1, 1], [], []>} : vector<64x8xf32>, vector<8x16xf32>, vector<64x16xf32> -> vector<64x16xf32>
    %102 = arith.addf %96, %101 : vector<64x16xf32>
    %103 = vector.extract_strided_slice %89 {offsets = [0, 9, 0], sizes = [8, 8, 8], strides = [1, 1, 1]} : vector<10x24x8xf32> to vector<8x8x8xf32>
    %104 = vector.shape_cast %103 : vector<8x8x8xf32> to vector<64x8xf32>
    %c0_94 = arith.constant 0 : index
    %c2_95 = arith.constant 2 : index
    %c0_96 = arith.constant 0 : index
    %c0_97 = arith.constant 0 : index
    %105 = vector.load %arg5[%c0_94, %c2_95, %c0_96, %c0_97] : memref<3x3x8x16xf32, #tpu.memory_space<vmem>>, vector<1x1x8x16xf32>
    %106 = vector.shape_cast %105 : vector<1x1x8x16xf32> to vector<8x16xf32>
    %cst_98 = arith.constant dense<0.000000e+00> : vector<64x16xf32>
    %107 = tpu.matmul %104, %106, %cst_98 {dimension_numbers = #tpu.dot_dimension_numbers<[1], [0], [0], [1], [0, 0, 1, 1], [], []>} : vector<64x8xf32>, vector<8x16xf32>, vector<64x16xf32> -> vector<64x16xf32>
    %108 = arith.addf %102, %107 : vector<64x16xf32>
    %109 = vector.extract_strided_slice %89 {offsets = [1, 7, 0], sizes = [8, 8, 8], strides = [1, 1, 1]} : vector<10x24x8xf32> to vector<8x8x8xf32>
    %110 = vector.shape_cast %109 : vector<8x8x8xf32> to vector<64x8xf32>
    %c1_99 = arith.constant 1 : index
    %c0_100 = arith.constant 0 : index
    %c0_101 = arith.constant 0 : index
    %c0_102 = arith.constant 0 : index
    %111 = vector.load %arg5[%c1_99, %c0_100, %c0_101, %c0_102] : memref<3x3x8x16xf32, #tpu.memory_space<vmem>>, vector<1x1x8x16xf32>
    %112 = vector.shape_cast %111 : vector<1x1x8x16xf32> to vector<8x16xf32>
    %cst_103 = arith.constant dense<0.000000e+00> : vector<64x16xf32>
    %113 = tpu.matmul %110, %112, %cst_103 {dimension_numbers = #tpu.dot_dimension_numbers<[1], [0], [0], [1], [0, 0, 1, 1], [], []>} : vector<64x8xf32>, vector<8x16xf32>, vector<64x16xf32> -> vector<64x16xf32>
    %114 = arith.addf %108, %113 : vector<64x16xf32>
    %115 = vector.extract_strided_slice %89 {offsets = [1, 8, 0], sizes = [8, 8, 8], strides = [1, 1, 1]} : vector<10x24x8xf32> to vector<8x8x8xf32>
    %116 = vector.shape_cast %115 : vector<8x8x8xf32> to vector<64x8xf32>
    %c1_104 = arith.constant 1 : index
    %c1_105 = arith.constant 1 : index
    %c0_106 = arith.constant 0 : index
    %c0_107 = arith.constant 0 : index
    %117 = vector.load %arg5[%c1_104, %c1_105, %c0_106, %c0_107] : memref<3x3x8x16xf32, #tpu.memory_space<vmem>>, vector<1x1x8x16xf32>
    %118 = vector.shape_cast %117 : vector<1x1x8x16xf32> to vector<8x16xf32>
    %cst_108 = arith.constant dense<0.000000e+00> : vector<64x16xf32>
    %119 = tpu.matmul %116, %118, %cst_108 {dimension_numbers = #tpu.dot_dimension_numbers<[1], [0], [0], [1], [0, 0, 1, 1], [], []>} : vector<64x8xf32>, vector<8x16xf32>, vector<64x16xf32> -> vector<64x16xf32>
    %120 = arith.addf %114, %119 : vector<64x16xf32>
    %121 = vector.extract_strided_slice %89 {offsets = [1, 9, 0], sizes = [8, 8, 8], strides = [1, 1, 1]} : vector<10x24x8xf32> to vector<8x8x8xf32>
    %122 = vector.shape_cast %121 : vector<8x8x8xf32> to vector<64x8xf32>
    %c1_109 = arith.constant 1 : index
    %c2_110 = arith.constant 2 : index
    %c0_111 = arith.constant 0 : index
    %c0_112 = arith.constant 0 : index
    %123 = vector.load %arg5[%c1_109, %c2_110, %c0_111, %c0_112] : memref<3x3x8x16xf32, #tpu.memory_space<vmem>>, vector<1x1x8x16xf32>
    %124 = vector.shape_cast %123 : vector<1x1x8x16xf32> to vector<8x16xf32>
    %cst_113 = arith.constant dense<0.000000e+00> : vector<64x16xf32>
    %125 = tpu.matmul %122, %124, %cst_113 {dimension_numbers = #tpu.dot_dimension_numbers<[1], [0], [0], [1], [0, 0, 1, 1], [], []>} : vector<64x8xf32>, vector<8x16xf32>, vector<64x16xf32> -> vector<64x16xf32>
    %126 = arith.addf %120, %125 : vector<64x16xf32>
    %127 = vector.extract_strided_slice %89 {offsets = [2, 7, 0], sizes = [8, 8, 8], strides = [1, 1, 1]} : vector<10x24x8xf32> to vector<8x8x8xf32>
    %128 = vector.shape_cast %127 : vector<8x8x8xf32> to vector<64x8xf32>
    %c2_114 = arith.constant 2 : index
    %c0_115 = arith.constant 0 : index
    %c0_116 = arith.constant 0 : index
    %c0_117 = arith.constant 0 : index
    %129 = vector.load %arg5[%c2_114, %c0_115, %c0_116, %c0_117] : memref<3x3x8x16xf32, #tpu.memory_space<vmem>>, vector<1x1x8x16xf32>
    %130 = vector.shape_cast %129 : vector<1x1x8x16xf32> to vector<8x16xf32>
    %cst_118 = arith.constant dense<0.000000e+00> : vector<64x16xf32>
    %131 = tpu.matmul %128, %130, %cst_118 {dimension_numbers = #tpu.dot_dimension_numbers<[1], [0], [0], [1], [0, 0, 1, 1], [], []>} : vector<64x8xf32>, vector<8x16xf32>, vector<64x16xf32> -> vector<64x16xf32>
    %132 = arith.addf %126, %131 : vector<64x16xf32>
    %133 = vector.extract_strided_slice %89 {offsets = [2, 8, 0], sizes = [8, 8, 8], strides = [1, 1, 1]} : vector<10x24x8xf32> to vector<8x8x8xf32>
    %134 = vector.shape_cast %133 : vector<8x8x8xf32> to vector<64x8xf32>
    %c2_119 = arith.constant 2 : index
    %c1_120 = arith.constant 1 : index
    %c0_121 = arith.constant 0 : index
    %c0_122 = arith.constant 0 : index
    %135 = vector.load %arg5[%c2_119, %c1_120, %c0_121, %c0_122] : memref<3x3x8x16xf32, #tpu.memory_space<vmem>>, vector<1x1x8x16xf32>
    %136 = vector.shape_cast %135 : vector<1x1x8x16xf32> to vector<8x16xf32>
    %cst_123 = arith.constant dense<0.000000e+00> : vector<64x16xf32>
    %137 = tpu.matmul %134, %136, %cst_123 {dimension_numbers = #tpu.dot_dimension_numbers<[1], [0], [0], [1], [0, 0, 1, 1], [], []>} : vector<64x8xf32>, vector<8x16xf32>, vector<64x16xf32> -> vector<64x16xf32>
    %138 = arith.addf %132, %137 : vector<64x16xf32>
    %139 = vector.extract_strided_slice %89 {offsets = [2, 9, 0], sizes = [8, 8, 8], strides = [1, 1, 1]} : vector<10x24x8xf32> to vector<8x8x8xf32>
    %140 = vector.shape_cast %139 : vector<8x8x8xf32> to vector<64x8xf32>
    %c2_124 = arith.constant 2 : index
    %c2_125 = arith.constant 2 : index
    %c0_126 = arith.constant 0 : index
    %c0_127 = arith.constant 0 : index
    %141 = vector.load %arg5[%c2_124, %c2_125, %c0_126, %c0_127] : memref<3x3x8x16xf32, #tpu.memory_space<vmem>>, vector<1x1x8x16xf32>
    %142 = vector.shape_cast %141 : vector<1x1x8x16xf32> to vector<8x16xf32>
    %cst_128 = arith.constant dense<0.000000e+00> : vector<64x16xf32>
    %143 = tpu.matmul %140, %142, %cst_128 {dimension_numbers = #tpu.dot_dimension_numbers<[1], [0], [0], [1], [0, 0, 1, 1], [], []>} : vector<64x8xf32>, vector<8x16xf32>, vector<64x16xf32> -> vector<64x16xf32>
    %144 = arith.addf %138, %143 : vector<64x16xf32>
    %c0_129 = arith.constant 0 : index
    %c0_130 = arith.constant 0 : index
    %145 = vector.load %arg6[%c0_129, %c0_130] : memref<1x16xf32, #tpu.memory_space<vmem>>, vector<1x16xf32>
    %146 = vector.shape_cast %145 : vector<1x16xf32> to vector<16xf32>
    %147 = vector.shape_cast %146 : vector<16xf32> to vector<1x16xf32>
    %148 = vector.broadcast %147 : vector<1x16xf32> to vector<64x16xf32>
    %149 = arith.addf %144, %148 : vector<64x16xf32>
    %cst_131 = arith.constant 0.000000e+00 : f32
    %150 = vector.broadcast %cst_131 : f32 to vector<64x16xf32>
    %151 = arith.maximumf %149, %150 : vector<64x16xf32>
    %c0_132 = arith.constant 0 : index
    %c0_133 = arith.constant 0 : index
    %152 = vector.load %arg7[%c0_132, %c0_133] : memref<4x64xf32, #tpu.memory_space<vmem>>, vector<4x64xf32>
    %cst_134 = arith.constant dense<0.000000e+00> : vector<4x16xf32>
    %153 = tpu.matmul %152, %151, %cst_134 {dimension_numbers = #tpu.dot_dimension_numbers<[1], [0], [0], [1], [0, 0, 1, 1], [], []>} : vector<4x64xf32>, vector<64x16xf32>, vector<4x16xf32> -> vector<4x16xf32>
    %c0_135 = arith.constant 0 : index
    %c0_136 = arith.constant 0 : index
    %154 = vector.load %arg9[%c0_135, %c0_136] : memref<1x10xf32, #tpu.memory_space<vmem>>, vector<1x10xf32>
    %155 = vector.extract_strided_slice %153 {offsets = [0, 0], sizes = [1, 16], strides = [1, 1]} : vector<4x16xf32> to vector<1x16xf32>
    %c0_137 = arith.constant 0 : index
    %c0_138 = arith.constant 0 : index
    %c0_139 = arith.constant 0 : index
    %156 = vector.load %arg8[%c0_137, %c0_138, %c0_139] : memref<4x16x10xf32, #tpu.memory_space<vmem>>, vector<1x16x10xf32>
    %157 = vector.shape_cast %156 : vector<1x16x10xf32> to vector<16x10xf32>
    %cst_140 = arith.constant dense<0.000000e+00> : vector<1x10xf32>
    %158 = tpu.matmul %155, %157, %cst_140 {dimension_numbers = #tpu.dot_dimension_numbers<[1], [0], [0], [1], [0, 0, 1, 1], [], []>} : vector<1x16xf32>, vector<16x10xf32>, vector<1x10xf32> -> vector<1x10xf32>
    %159 = arith.addf %154, %158 : vector<1x10xf32>
    %160 = vector.extract_strided_slice %153 {offsets = [1, 0], sizes = [1, 16], strides = [1, 1]} : vector<4x16xf32> to vector<1x16xf32>
    %c1_141 = arith.constant 1 : index
    %c0_142 = arith.constant 0 : index
    %c0_143 = arith.constant 0 : index
    %161 = vector.load %arg8[%c1_141, %c0_142, %c0_143] : memref<4x16x10xf32, #tpu.memory_space<vmem>>, vector<1x16x10xf32>
    %162 = vector.shape_cast %161 : vector<1x16x10xf32> to vector<16x10xf32>
    %cst_144 = arith.constant dense<0.000000e+00> : vector<1x10xf32>
    %163 = tpu.matmul %160, %162, %cst_144 {dimension_numbers = #tpu.dot_dimension_numbers<[1], [0], [0], [1], [0, 0, 1, 1], [], []>} : vector<1x16xf32>, vector<16x10xf32>, vector<1x10xf32> -> vector<1x10xf32>
    %164 = arith.addf %159, %163 : vector<1x10xf32>
    %165 = vector.extract_strided_slice %153 {offsets = [2, 0], sizes = [1, 16], strides = [1, 1]} : vector<4x16xf32> to vector<1x16xf32>
    %c2_145 = arith.constant 2 : index
    %c0_146 = arith.constant 0 : index
    %c0_147 = arith.constant 0 : index
    %166 = vector.load %arg8[%c2_145, %c0_146, %c0_147] : memref<4x16x10xf32, #tpu.memory_space<vmem>>, vector<1x16x10xf32>
    %167 = vector.shape_cast %166 : vector<1x16x10xf32> to vector<16x10xf32>
    %cst_148 = arith.constant dense<0.000000e+00> : vector<1x10xf32>
    %168 = tpu.matmul %165, %167, %cst_148 {dimension_numbers = #tpu.dot_dimension_numbers<[1], [0], [0], [1], [0, 0, 1, 1], [], []>} : vector<1x16xf32>, vector<16x10xf32>, vector<1x10xf32> -> vector<1x10xf32>
    %169 = arith.addf %164, %168 : vector<1x10xf32>
    %170 = vector.extract_strided_slice %153 {offsets = [3, 0], sizes = [1, 16], strides = [1, 1]} : vector<4x16xf32> to vector<1x16xf32>
    %c3_149 = arith.constant 3 : index
    %c0_150 = arith.constant 0 : index
    %c0_151 = arith.constant 0 : index
    %171 = vector.load %arg8[%c3_149, %c0_150, %c0_151] : memref<4x16x10xf32, #tpu.memory_space<vmem>>, vector<1x16x10xf32>
    %172 = vector.shape_cast %171 : vector<1x16x10xf32> to vector<16x10xf32>
    %cst_152 = arith.constant dense<0.000000e+00> : vector<1x10xf32>
    %173 = tpu.matmul %170, %172, %cst_152 {dimension_numbers = #tpu.dot_dimension_numbers<[1], [0], [0], [1], [0, 0, 1, 1], [], []>} : vector<1x16xf32>, vector<16x10xf32>, vector<1x10xf32> -> vector<1x10xf32>
    %174 = arith.addf %169, %173 : vector<1x10xf32>
    %c0_153 = arith.constant 0 : index
    %c0_154 = arith.constant 0 : index
    %c0_155 = arith.constant 0 : index
    %175 = vector.load %arg10[%c0_153, %c0_154, %c0_155] : memref<1x1x10xf32, #tpu.memory_space<vmem>>, vector<1x1x10xf32>
    %176 = vector.shape_cast %175 : vector<1x1x10xf32> to vector<1x10xf32>
    %177 = vector.shape_cast %174 : vector<1x10xf32> to vector<1x1x10xf32>
    tpu.vector_store %arg10[%c0_153, %c0_154, %c0_155], %177 {strides = array<i32>} : memref<1x1x10xf32, #tpu.memory_space<vmem>>, vector<1x1x10xf32>,
    return
  }
  func.func @transform_0(%arg0: i32) -> (i32, i32, i32, i32) {
    %c0_i32 = arith.constant 0 : i32
    %c0_i32_0 = arith.constant 0 : i32
    %c0_i32_1 = arith.constant 0 : i32
    %c0_i32_2 = arith.constant 0 : i32
    return %arg0, %c0_i32, %c0_i32_0, %c0_i32_1 : i32, i32, i32, i32
  }
  func.func @transform_1(%arg0: i32) -> (i32, i32, i32, i32) {
    %c0_i32 = arith.constant 0 : i32
    %c0_i32_0 = arith.constant 0 : i32
    %c0_i32_1 = arith.constant 0 : i32
    %c0_i32_2 = arith.constant 0 : i32
    %c0_i32_3 = arith.constant 0 : i32
    return %c0_i32, %c0_i32_0, %c0_i32_1, %c0_i32_2 : i32, i32, i32, i32
  }
  func.func @transform_2(%arg0: i32) -> (i32, i32) {
    %c0_i32 = arith.constant 0 : i32
    %c0_i32_0 = arith.constant 0 : i32
    %c0_i32_1 = arith.constant 0 : i32
    return %c0_i32, %c0_i32_0 : i32, i32
  }
  func.func @transform_3(%arg0: i32) -> (i32, i32, i32) {
    %c0_i32 = arith.constant 0 : i32
    %c0_i32_0 = arith.constant 0 : i32
    %c0_i32_1 = arith.constant 0 : i32
    %c0_i32_2 = arith.constant 0 : i32
    return %c0_i32, %c0_i32_0, %c0_i32_1 : i32, i32, i32
  }
  func.func @transform_4(%arg0: i32) -> (i32, i32, i32, i32) {
    %c0_i32 = arith.constant 0 : i32
    %c0_i32_0 = arith.constant 0 : i32
    %c0_i32_1 = arith.constant 0 : i32
    %c0_i32_2 = arith.constant 0 : i32
    %c0_i32_3 = arith.constant 0 : i32
    return %c0_i32, %c0_i32_0, %c0_i32_1, %c0_i32_2 : i32, i32, i32, i32
  }
  func.func @transform_5(%arg0: i32) -> (i32, i32) {
    %c0_i32 = arith.constant 0 : i32
    %c0_i32_0 = arith.constant 0 : i32
    %c0_i32_1 = arith.constant 0 : i32
    return %c0_i32, %c0_i32_0 : i32, i32
  }
  func.func @transform_6(%arg0: i32) -> (i32, i32) {
    %c0_i32 = arith.constant 0 : i32
    %c0_i32_0 = arith.constant 0 : i32
    %c0_i32_1 = arith.constant 0 : i32
    return %c0_i32, %c0_i32_0 : i32, i32
  }
  func.func @transform_7(%arg0: i32) -> (i32, i32, i32) {
    %c0_i32 = arith.constant 0 : i32
    %c0_i32_0 = arith.constant 0 : i32
    %c0_i32_1 = arith.constant 0 : i32
    %c0_i32_2 = arith.constant 0 : i32
    return %c0_i32, %c0_i32_0, %c0_i32_1 : i32, i32, i32
  }
  func.func @transform_8(%arg0: i32) -> (i32, i32) {
    %c0_i32 = arith.constant 0 : i32
    %c0_i32_0 = arith.constant 0 : i32
    %c0_i32_1 = arith.constant 0 : i32
    return %c0_i32, %c0_i32_0 : i32, i32
  }
  func.func @transform_9(%arg0: i32) -> (i32, i32, i32) {
    %c0_i32 = arith.constant 0 : i32
    %c0_i32_0 = arith.constant 0 : i32
    %c0_i32_1 = arith.constant 0 : i32
    return %arg0, %c0_i32, %c0_i32_0 : i32, i32, i32
  }
}

</mosaic_0001>

<bundles_post_ra>
// kernel: small2dnet_forward.1
= control target key start
LH: loop header
LB: loop body
LE: loop exit
PB: predicated region body
PF: predicated region fallthrough
CT: control target
= control target key end

     0   :  { %s6948_s0 = inlined_call_operand.vmem [shape: f32[2,16,16,3], index: 0, kind: input, shape index: {}]   ;;  %s6949_s1 = inlined_call_operand.hbm [shape: f32[3,3,3,8], index: 1, kind: input, shape index: {}]   ;;  %s6950_s2 = inlined_call_operand.vmem [shape: f32[1,8], index: 2, kind: input, shape index: {}]   ;;  %s6951_s3 = inlined_call_operand.vmem [shape: f32[4,64,256], index: 3, kind: input, shape index: {}]   ;;  %s6952_s4 = inlined_call_operand.vmem [shape: f32[3,3,8,16], index: 4, kind: input, shape index: {}]   ;;  %s6953_s5 = inlined_call_operand.vmem [shape: f32[1,16], index: 5, kind: input, shape index: {}]   ;;  %s6954_s6 = inlined_call_operand.vmem [shape: f32[4,64], index: 6, kind: input, shape index: {}]   ;;  %s6955_s7 = inlined_call_operand.hbm [shape: f32[4,16,10], index: 7, kind: input, shape index: {}]   ;;  %s6956_s8 = inlined_call_operand.vmem [shape: f32[1,10], index: 8, kind: input, shape index: {}]   ;;  %s6957_s9 = inlined_call_operand.hbm [shape: f32[2,1,10], index: 9, kind: output, shape index: {}]  }
   0x1   :  { %7055 = sst [smem:[#allocation79_spill]] %s6949_s1 }
   0x2   :  { %14 = vsyncpa [#allocation5], 0 }
   0x3   :  { %15 = vsyncpa [#allocation8], 0 }
   0x4   :  { %16 = vsyncpa [#allocation6], 0 }
   0x5   :  { %18 = vsyncpa [#allocation6 + $0x1], 0  ;;  %s4438_s30 = smov 0   ;;  %s4440_s10 = smov 0  }
   0x6   :  { %s4442_s11 = smov 0   ;;  %s4444_s12 = smov 0  }
   0x7 LB: > { %s4459_s13 = sadd.s32 4294967295, %s4379_s12   ;;  %s3725_s14 = sadd.s32 4294967294, %s4379_s12   ;;  %s4379_s12 = sphi %s4444_s12, %s7335_s12   ;;  %s4375_s11 = sphi %s4442_s11, %s7334_s11   ;;  %s4371_s10 = sphi %s4440_s10, %s7333_s10   ;;  %s4367_s30 = sphi %s4438_s30, %s7332_s30  }
   0x8   : > { %s4463_s15 = sadd.s32 1, %s4379_s12   ;;  %s225_s16 = sadd.s32 1, %s4375_s11 }
   0x9   : > { %s222_s17 = ssub.s32 %s4379_s12, %s4463_s15  ;;  %p235_p0 = scmp.ne.s32.totalorder %s4375_s11, %s4371_s10 }
   0xa   : > { %p223_p1 = scmp.eq.s32.totalorder %s222_s17, 0  ;;  %p236_p2 = scmp.eq.s32.totalorder %s4459_s13, 1 }
   0xb   : > { %p241_p3 = scmp.ne.s32.totalorder %s4371_s10, %s4367_s30  ;;  %p242_p4 = scmp.eq.s32.totalorder %s3725_s14, 1 }
   0xc   : > { %s4474_s18 = scalar_select %p223_p1, %s4375_s11, %s225_s16  }
   0xd   : > { %p4476_p5 = por %p236_p2, %p235_p0  ;;  %p4480_p6 = por %p242_p4, %p241_p3 }
   0xe   : > { %p3726_p7 = scmp.ge.s32.totalorder %s4379_s12, 1  ;;  %p249_p8 = scmp.lt.s32.totalorder %s4379_s12, 3 }
   0xf   : > { %p4191_p9 = scmp.eq.s32.totalorder %s4459_s13, 0  ;;  %s7059_s1 = sld [smem:[#allocation79_spill]] }
  0x10   : > { %p4487_p10 = pnand %p3726_p7, %p249_p8  ;;  %s4381_s25 = smov [#allocation4]  }
  0x11   : > { %s262_s26 = sshll.u32 %s4381_s25, 4  ;;  %s289_s29 = sshll.u32 %s6955_s7, 4  ;;  %s263_s26 = int_to_ptr.vmem [resolvable:$true] %s262_s26  ;;  %s290_s29 = int_to_ptr.hbm [resolvable:$true] %s289_s29 }
  0x12   : > { %p4180_p11 = pneg %p4487_p10  ;;  %s4382_s14 = smov 64  }
  0x13   : > { %s4383_s16 = smov 4   ;;  %s4384_s17 = smov [#allocation7]  }
  0x14   : > { %p4181_p12 = pnand %p4191_p9, %p4180_p11  ;;  %s291_s22 = sshll.u32 %s4384_s17, 4  ;;  %s292_s22 = int_to_ptr.vmem [resolvable:$true] %s291_s22 }
  0x15   : > { %s260_s24 = sshll.u32 %s7059_s1, 4  ;;  %s4385_s23 = smov 128   ;;  %s261_s24 = int_to_ptr.hbm [resolvable:$true] %s260_s24 }
  0x16   : > { %4183 = dma.hbm_to_vmem [thread:$0]  (!%p4181_p12), %s261_s24, 576, %s263_s26, [#allocation5], %s4382_s14, %s4382_s14, %s4383_s16  }
  0x17   : > { %s4386_s1 = smov 8   ;;  %318 = sbr.rel (%p4487_p10) target bundleno = 1864 (0x748), region = 56 }
  0x18   : > { %4186 = dma.hbm_to_vmem [thread:$0]  (!%p4181_p12), %s290_s29, 1024, %s292_s22, [#allocation8], %s4385_s23, %s4385_s23, %s4386_s1  }
  0x1c   : > { %4354 = dma.done.wait (%p4191_p9), [#allocation5], 576  }
  0x1d   : > { %4356 = vsyncadd (%p4191_p9), [#allocation5], 4294966720 }
  0x1e   : > { %4358 = dma.done.wait (%p4191_p9), [#allocation8], 1024  }
  0x1f   : > { %4360 = vsyncadd (%p4191_p9), [#allocation8], 4294966272  ;;  %vm396_vm0 = vcmask 23552   ;;  %v6958_v0 = vmov 0.0   ;;  %vm770_vm1 = vcmask 1042432   ;;  %vm1083_vm2 = vcmask 1046528   ;;  %s3644_s28 = scalar_lea.hbm %s6957_s9, %s4459_s13 }
  0x20   : > { %398 = vst.msk [vmem:[#allocation2 + $0x8] sm:$0xff] %vm396_vm0, %v6958_v0  ;;  %v705_v1 = vld [vmem:[#allocation4 + $0x4] sm:$0x7]  ;;  %v1165_v5 = vld [vmem:[#allocation4 + $0x8] sm:$0x7]  ;;  %p359_p13 = scmp.lt.s32.totalorder %s4459_s13, 1 }
  0x21   : > { %397 = vst.msk [vmem:[#allocation2] sm:$0xff] %vm396_vm0, %v6958_v0  ;;  %3735 = vmatpush.msk.msra.mxu0 %vm770_vm1, %v705_v1  ;;  %4168 = vmatpush.msk.msra.mxu1 %vm770_vm1, %v705_v1  ;;  %v703_v7 = vld [vmem:[#allocation4] sm:$0x7]  ;;  %v1387_v12 = vld [vmem:[#allocation4 + $0xc] sm:$0x7]  ;;  %vm622_vm3 = vcmask 1040384  }
  0x22   : > { %399 = vst.msk [vmem:[#allocation2 + $0x10] sm:$0xff] %vm396_vm0, %v6958_v0  ;;  %4169 = vmatpush.msk.msra.mxu3 %vm770_vm1, %v705_v1  ;;  %3801 = vmatpush.msk.msra.mxu2 %vm770_vm1, %v1165_v5  ;;  %s360_s1 = scalar_select %p359_p13, %s4459_s13, 1  ;;  %vm2817_vm4 = vcmask 64512   ;;  %vm3500_vm5 = vcmask 523264   ;;  %vm3527_vm6 = vcmask 130048   ;;  %vm3633_vm7 = vcmask 73728  }
  0x23   : > { %400 = vst.msk [vmem:[#allocation2 + $0x18] sm:$0xff] %vm396_vm0, %v6958_v0  ;;  %3768 = vmatpush.msk.msrb.mxu1 %vm770_vm1, %v703_v7  ;;  %s357_s25 = sand.u32 1, %s4371_s10   ;;  %s3648_s16 = sshll.u32 %s3644_s28, 4  ;;  %s3649_s16 = int_to_ptr.hbm [resolvable:$true] %s3648_s16 }
  0x24   : > { %401 = vst.msk [vmem:[#allocation2 + $0x20] sm:$0xff] %vm396_vm0, %v6958_v0  ;;  %s4167_s21 = sshll.u32 %s360_s1, 8  ;;  %3834 = vmatpush.msk.msrb.mxu3 %vm770_vm1, %v1387_v12  ;;  %s358_s29 = scalar_lea.vmem [#allocation9], %s357_s25 }
  0x25   : > { %402 = vst.msk [vmem:[#allocation2 + $0x28] sm:$0xff] %vm396_vm0, %v6958_v0  ;;  %s4669_s26 = scalar_lea.vmem %s6948_s0, %s4167_s21  ;;  %s3646_s14 = sshll.u32 %s358_s29, 4  ;;  %s3647_s14 = int_to_ptr.vmem [resolvable:$true] %s3646_s14 }
  0x26   : > { %403 = vst.msk [vmem:[#allocation2 + $0x30] sm:$0xff] %vm396_vm0, %v6958_v0  ;;  %v390_v13 = vld [vmem:[%s4669_s26 + $0xd0] sm:$0xff]  ;;  %v391_v14 = vld [vmem:[%s4669_s26 + $0xd8] sm:$0xff]  ;;  %v392_v15 = vld [vmem:[%s4669_s26 + $0xe0] sm:$0xff]  ;;  %s3636_s17 = scalar_lea.sflag [#allocation6], %s357_s25  ;;  %s4323_s22 = sshra.s32 %s3649_s16, 4  ;;  %s4324_s22 = int_to_ptr.hbm [resolvable:$true] %s4323_s22 }
  0x27   : > { %v4526_v2 = vld [vmem:[#allocation2 + $0x8] sm:$0xff]  ;;  %404 = vst.msk [vmem:[#allocation2 + $0x38] sm:$0xff] %vm396_vm0, %v6958_v0  ;;  %v364_v16 = vld [vmem:[%s4669_s26] sm:$0xff]  ;;  %v366_v19 = vld [vmem:[%s4669_s26 + $0x10] sm:$0xff]  ;;  %s4325_s23 = scalar_lea.hbm %s4324_s22, 1  ;;  %s4329_s21 = scalar_lea.hbm %s6957_s9, 2 }
  0x28   : > { %3736 = vmatmul.msk.f32.vlgmr.msra.gmra.mxu0 %vm396_vm0, %v4526_v2  ;;  %405 = vst.msk [vmem:[#allocation2 + $0x40] sm:$0xff] %vm396_vm0, %v6958_v0  ;;  %v1084_v3 = vrot.slane %v4526_v2, 1  ;;  %v393_v17 = vld [vmem:[%s4669_s26 + $0xe8] sm:$0xff]  ;;  %v367_v20 = vld [vmem:[%s4669_s26 + $0x18] sm:$0xff]  ;;  %v502_v21 = vld [vmem:[#allocation2] sm:$0xff]  ;;  %v624_v24 = vrot.slane %v4526_v2, 7  ;;  %p4326_p0 = scmp.ne.s32.totalorder %s4324_s22, %s4325_s23  ;;  %p4330_p3 = scmp.lt.s32.totalorder %s4324_s22, %s6957_s9 }
  0x29   : > { %406 = vst.msk [vmem:[#allocation2 + $0x48] sm:$0xff] %vm396_vm0, %v6958_v0  ;;  %v4619_v4 = vld [vmem:[#allocation2 + $0x10] sm:$0xff]  ;;  %v365_v18 = vld [vmem:[%s4669_s26 + $0x8] sm:$0xff]  ;;  %v623_v25 = vrot.slane %v502_v21, 7  ;;  %v368_v26 = vld [vmem:[%s4669_s26 + $0x20] sm:$0xff]  ;;  %p4331_p4 = scmp.lt.s32.totalorder %s4329_s21, %s4325_s23 }
  0x2a   : > { %407 = vst.msk [vmem:[#allocation2 + $0x50] sm:$0xff] %vm396_vm0, %v6958_v0  ;;  %v1085_v6 = vrot.slane %v4619_v4, 1  ;;  %v505_v9 = vld [vmem:[#allocation2 + $0x18] sm:$0xff]  ;;  %v626_v35 = vrot.slane %v4619_v4, 7  ;;  %v369_v37 = vld [vmem:[%s4669_s26 + $0x28] sm:$0xff]  ;;  %v370_v48 = vld [vmem:[%s4669_s26 + $0x30] sm:$0xff]  ;;  %p4327_p1 = pnand %p4326_p0, %p4476_p5 }
  0x2b   : > { %408 = vst.msk [vmem:[#allocation2 + $0x58] sm:$0xff] %vm396_vm0, %v6958_v0  ;;  %v1087_v10 = vrot.slane %v505_v9, 1  ;;  %v625_v30 = vsel %vm622_vm3, %v623_v25, %v624_v24  ;;  %v506_v41 = vld [vmem:[#allocation2 + $0x20] sm:$0xff]  ;;  %v371_v54 = vld [vmem:[%s4669_s26 + $0x38] sm:$0xff]  ;;  %v373_v7 = vld [vmem:[%s4669_s26 + $0x48] sm:$0xff]  ;;  %p4332_p7 = por %p4331_p4, %p4330_p3 }
  0x2c   : > { %409 = vst.msk [vmem:[#allocation2 + $0x60] sm:$0xff] %vm396_vm0, %v6958_v0  ;;  %v1086_v8 = vsel %vm1083_vm2, %v1084_v3, %v1085_v6  ;;  %v627_v38 = vsel %vm622_vm3, %v624_v24, %v626_v35  ;;  %v628_v44 = vrot.slane %v506_v41, 7  ;;  %v372_v1 = vld [vmem:[%s4669_s26 + $0x40] sm:$0xff]  ;;  %v375_v25 = vld [vmem:[%s4669_s26 + $0x58] sm:$0xff]  ;;  %p4328_p2 = pneg %p4327_p1 }
  0x2d   : > { %410 = vst.msk [vmem:[#allocation2 + $0x68] sm:$0xff] %vm396_vm0, %v6958_v0  ;;  %3802 = vmatmul.msk.f32.vlgmr.msra.gmra.mxu2 %vm396_vm0, %v1086_v8  ;;  %v1088_v11 = vsel %vm1083_vm2, %v1085_v6, %v1087_v10  ;;  %v376_v41 = vld [vmem:[%s4669_s26 + $0x60] sm:$0xff] }
  0x2e   : > { %411 = vst.msk [vmem:[#allocation2 + $0x70] sm:$0xff] %vm396_vm0, %v6958_v0  ;;  %v509_v33 = vld [vmem:[#allocation2 + $0x38] sm:$0xff]  ;;  %p4333_p8 = pnand %p4332_p7, %p4328_p2 }
  0x2f   : > { %412 = vst.msk [vmem:[#allocation2 + $0x78] sm:$0xff] %vm396_vm0, %v6958_v0  ;;  %v1092_v36 = vrot.slane %v509_v33, 1  ;;  %v510_v57 = vld [vmem:[#allocation2 + $0x40] sm:$0xff] }
  0x30   : > { %413 = vst.msk [vmem:[#allocation2 + $0x80] sm:$0xff] %vm396_vm0, %v6958_v0  ;;  %3737 = vmatmul.msk.f32.gmra.mxu0 %vm396_vm0, %v4619_v4  ;;  %v633_v60 = vrot.slane %v510_v57, 7 }
  0x31   : > { %414 = vst.msk [vmem:[#allocation2 + $0x88] sm:$0xff] %vm396_vm0, %v6958_v0 }
  0x32   : > { %415 = vst.msk [vmem:[#allocation2 + $0x90] sm:$0xff] %vm396_vm0, %v6958_v0  ;;  %v513_v51 = vld [vmem:[#allocation2 + $0x58] sm:$0xff] }
  0x33   : > { %416 = vst.msk [vmem:[#allocation2 + $0x98] sm:$0xff] %vm396_vm0, %v6958_v0  ;;  %v1097_v53 = vrot.slane %v513_v51, 1  ;;  %v514_v10 = vld [vmem:[#allocation2 + $0x60] sm:$0xff] }
  0x34   : > { %417 = vst.msk [vmem:[#allocation2 + $0xa0] sm:$0xff] %vm396_vm0, %v6958_v0 }
  0x35   : > { %418 = vst.msk [vmem:[#allocation2 + $0xa8] sm:$0xff] %vm396_vm0, %v6958_v0  ;;  %3803 = vmatmul.msk.f32.gmra.mxu2 %vm396_vm0, %v1088_v11 }
  0x36   : > { %419 = vst.msk [vmem:[#allocation2 + $0xb0] sm:$0xff] %vm396_vm0, %v6958_v0  ;;  %v517_v4 = vld [vmem:[#allocation2 + $0x78] sm:$0xff] }
  0x37   : > { %420 = vst.msk [vmem:[#allocation2 + $0xb8] sm:$0xff] %vm396_vm0, %v6958_v0  ;;  %v1102_v6 = vrot.slane %v517_v4, 1 }
  0x38   : > { %421 = vst.msk [vmem:[#allocation2 + $0xc0] sm:$0xff] %vm396_vm0, %v6958_v0 }
  0x39   : > { %422 = vst.msk [vmem:[#allocation2 + $0xc8] sm:$0xff] %vm396_vm0, %v6958_v0 }
  0x3a   : > { %423 = vst.msk [vmem:[#allocation2 + $0xd0] sm:$0xff] %vm396_vm0, %v6958_v0 }
  0x3b   : > { %424 = vst.msk [vmem:[#allocation2 + $0xd8] sm:$0xff] %vm396_vm0, %v6958_v0 }
  0x3c   : > { %425 = vst.msk [vmem:[#allocation2 + $0xe0] sm:$0xff] %vm396_vm0, %v6958_v0 }
  0x3d   : > { %426 = vst.msk [vmem:[#allocation2 + $0xe8] sm:$0xff] %vm396_vm0, %v6958_v0 }
  0x3e   : > { %427 = vst.msk [vmem:[#allocation2 + $0xf0] sm:$0xff] %vm396_vm0, %v6958_v0 }
  0x3f   : > { %428 = vst.msk [vmem:[#allocation2 + $0xf8] sm:$0xff] %vm396_vm0, %v6958_v0 }
  0x40   : > { %429 = vst.msk [vmem:[#allocation2 + $0x100] sm:$0xff] %vm396_vm0, %v6958_v0 }
  0x41   : > { %430 = vst.msk [vmem:[#allocation2 + $0x108] sm:$0xff] %vm396_vm0, %v6958_v0 }
  0x42   : > { %431 = vst.msk [vmem:[#allocation2 + $0x110] sm:$0xff] %vm396_vm0, %v6958_v0 }
  0x43   : > { %432 = vst.msk [vmem:[#allocation2 + $0x118] sm:$0xff] %vm396_vm0, %v6958_v0 }
  0x44   : > { %433 = vst.msk [vmem:[#allocation2 + $0x120] sm:$0xff] %vm396_vm0, %v6958_v0 }
  0x45   : > { %434 = vst.msk [vmem:[#allocation2 + $0x128] sm:$0xff] %vm396_vm0, %v6958_v0 }
  0x46   : > { %435 = vst.msk [vmem:[#allocation2 + $0x130] sm:$0xff] %vm396_vm0, %v6958_v0 }
  0x47   : > { %436 = vst.msk [vmem:[#allocation2 + $0x138] sm:$0xff] %vm396_vm0, %v6958_v0 }
  0x48   : > { %437 = vst.msk [vmem:[#allocation2 + $0x140] sm:$0xff] %vm396_vm0, %v6958_v0 }
  0x49   : > { %438 = vst.msk [vmem:[#allocation2 + $0x148] sm:$0xff] %vm396_vm0, %v6958_v0 }
  0x4a   : > { %439 = vst.msk [vmem:[#allocation2 + $0x150] sm:$0xff] %vm396_vm0, %v6958_v0 }
  0x4b   : > { %440 = vst.msk [vmem:[#allocation2 + $0x158] sm:$0xff] %vm396_vm0, %v6958_v0 }
  0x4c   : > { %441 = vst.msk [vmem:[#allocation2 + $0x160] sm:$0xff] %vm396_vm0, %v6958_v0 }
  0x4d   : > { %442 = vst.msk [vmem:[#allocation2 + $0x168] sm:$0xff] %vm396_vm0, %v6958_v0 }
  0x4e   : > { %443 = vst.msk [vmem:[#allocation2 + $0x170] sm:$0xff] %vm396_vm0, %v6958_v0 }
  0x4f   : > { %444 = vst.msk [vmem:[#allocation2 + $0x178] sm:$0xff] %vm396_vm0, %v6958_v0 }
  0x50   : > { %445 = vst.msk [vmem:[#allocation2 + $0x180] sm:$0xff] %vm396_vm0, %v6958_v0 }
  0x51   : > { %446 = vst.msk [vmem:[#allocation2 + $0x188] sm:$0xff] %vm396_vm0, %v6958_v0 }
  0x52   : > { %447 = vst.msk [vmem:[#allocation2 + $0x190] sm:$0xff] %vm396_vm0, %v6958_v0 }
  0x53   : > { %448 = vst.msk [vmem:[#allocation2 + $0x198] sm:$0xff] %vm396_vm0, %v6958_v0 }
  0x54   : > { %449 = vst.msk [vmem:[#allocation2 + $0x1a0] sm:$0xff] %vm396_vm0, %v6958_v0 }
  0x55   : > { %450 = vst.msk [vmem:[#allocation2 + $0x1a8] sm:$0xff] %vm396_vm0, %v6958_v0 }
  0x56   : > { %451 = vst.msk [vmem:[#allocation2 + $0x1b0] sm:$0xff] %vm396_vm0, %v6958_v0 }
  0x57   : > { %452 = vst.msk [vmem:[#allocation2 + $0x1b8] sm:$0xff] %vm396_vm0, %v6958_v0 }
  0x58   : > { %453 = vst.msk [vmem:[#allocation2 + $0x1c0] sm:$0xff] %vm396_vm0, %v6958_v0 }
  0x59   : > { %454 = vst.msk [vmem:[#allocation2 + $0x1c8] sm:$0xff] %vm396_vm0, %v6958_v0 }
  0x5a   : > { %455 = vst.msk [vmem:[#allocation2 + $0x1d0] sm:$0xff] %vm396_vm0, %v6958_v0 }
  0x5b   : > { %456 = vst.msk [vmem:[#allocation2 + $0x1d8] sm:$0xff] %vm396_vm0, %v6958_v0 }
  0x5c   : > { %457 = vst.msk [vmem:[#allocation2 + $0x1e0] sm:$0xff] %vm396_vm0, %v6958_v0 }
  0x5d   : > { %458 = vst.msk [vmem:[#allocation2 + $0x1e8] sm:$0xff] %vm396_vm0, %v6958_v0 }
  0x5e   : > { %459 = vst.msk [vmem:[#allocation2 + $0x1f0] sm:$0xff] %vm396_vm0, %v6958_v0 }
  0x5f   : > { %460 = vst.msk [vmem:[#allocation2 + $0x1f8] sm:$0xff] %vm396_vm0, %v6958_v0 }
  0x60   : > { %461 = vst.msk [vmem:[#allocation2 + $0x200] sm:$0xff] %vm396_vm0, %v6958_v0 }
  0x61   : > { %462 = vst.msk [vmem:[#allocation2 + $0x208] sm:$0xff] %vm396_vm0, %v6958_v0 }
  0x62   : > { %463 = vst.msk [vmem:[#allocation2 + $0x210] sm:$0xff] %vm396_vm0, %v6958_v0 }
  0x63   : > { %464 = vst.msk [vmem:[#allocation2 + $0x218] sm:$0xff] %vm396_vm0, %v6958_v0 }
  0x64   : > { %465 = vst.msk [vmem:[#allocation2 + $0x220] sm:$0xff] %vm396_vm0, %v6958_v0 }
  0x65   : > { %466 = vst.msk [vmem:[#allocation2 + $0x228] sm:$0xff] %vm396_vm0, %v6958_v0 }
  0x66   : > { %467 = vst.msk [vmem:[#allocation2 + $0x230] sm:$0xff] %vm396_vm0, %v6958_v0 }
  0x67   : > { %468 = vst.msk [vmem:[#allocation2 + $0x238] sm:$0xff] %vm396_vm0, %v6958_v0 }
  0x68   : > { %496 = vst.msk [vmem:[#allocation2 + $0x1c8] sm:$0xff] %vm396_vm0, %v390_v13  ;;  %v638_v13 = vrot.slane %v514_v10, 7  ;;  %v379_v10 = vld [vmem:[%s4669_s26 + $0x78] sm:$0xff] }
  0x69   : > { %497 = vst.msk [vmem:[#allocation2 + $0x1d0] sm:$0xff] %vm396_vm0, %v391_v14 }
  0x6a   : > { %498 = vst.msk [vmem:[#allocation2 + $0x1e8] sm:$0xff] %vm396_vm0, %v392_v15 }
  0x6b   : > { %470 = vst.msk [vmem:[#allocation2 + $0x28] sm:$0xff] %vm396_vm0, %v364_v16 }
  0x6c   : > { %499 = vst.msk [vmem:[#allocation2 + $0x1f0] sm:$0xff] %vm396_vm0, %v393_v17  ;;  %v374_v17 = vld [vmem:[%s4669_s26 + $0x50] sm:$0xff] }
  0x6d   : > { %471 = vst.msk [vmem:[#allocation2 + $0x30] sm:$0xff] %vm396_vm0, %v365_v18 }
  0x6e   : > { %472 = vst.msk [vmem:[#allocation2 + $0x48] sm:$0xff] %vm396_vm0, %v366_v19 }
  0x6f   : > { %v4697_v22 = vld [vmem:[#allocation2 + $0x1c8] sm:$0xff]  ;;  %473 = vst.msk [vmem:[#allocation2 + $0x50] sm:$0xff] %vm396_vm0, %v367_v20  ;;  %v521_v20 = vld [vmem:[#allocation2 + $0x98] sm:$0xff] }
  0x70   : > { %3764 = vmatmul.msk.f32.vlgmr.msra.gmra.mxu1 %vm396_vm0, %v4697_v22  ;;  %v4702_v23 = vld [vmem:[#allocation2 + $0x1d0] sm:$0xff]  ;;  %474 = vst.msk [vmem:[#allocation2 + $0x68] sm:$0xff] %vm396_vm0, %v368_v26  ;;  %v1107_v24 = vrot.slane %v521_v20, 1 }
  0x71   : > { %3765 = vmatmul.msk.f32.vlgmr.msra.gmra.mxu3 %vm396_vm0, %v4702_v23  ;;  %v4718_v32 = vld [vmem:[#allocation2 + $0x1e8] sm:$0xff]  ;;  %475 = vst.msk [vmem:[#allocation2 + $0x70] sm:$0xff] %vm396_vm0, %v369_v37 }
  0x72   : > { %v4708_v27 = vld [vmem:[#allocation2 + $0x28] sm:$0xff]  ;;  %476 = vst.msk [vmem:[#allocation2 + $0x88] sm:$0xff] %vm396_vm0, %v370_v48 }
  0x73   : > { %3738 = vmatmul.msk.f32.gmra.mxu0 %vm396_vm0, %v4708_v27  ;;  %v1089_v28 = vrot.slane %v4708_v27, 1  ;;  %v4737_v40 = vld [vmem:[#allocation2 + $0x1f0] sm:$0xff]  ;;  %v629_v45 = vrot.slane %v4708_v27, 7  ;;  %477 = vst.msk [vmem:[#allocation2 + $0x90] sm:$0xff] %vm396_vm0, %v371_v54 }
  0x74   : > { %v4714_v29 = vld [vmem:[#allocation2 + $0x30] sm:$0xff]  ;;  %478 = vst.msk [vmem:[#allocation2 + $0xa8] sm:$0xff] %vm396_vm0, %v372_v1 }
  0x75   : > { %v1090_v31 = vrot.slane %v4714_v29, 1  ;;  %v4742_v43 = vld [vmem:[#allocation2 + $0x48] sm:$0xff]  ;;  %v630_v49 = vsel %vm622_vm3, %v628_v44, %v629_v45  ;;  %v631_v52 = vrot.slane %v4714_v29, 7  ;;  %479 = vst.msk [vmem:[#allocation2 + $0xb0] sm:$0xff] %vm396_vm0, %v373_v7 }
  0x76   : > { %v4739_v42 = vld [vmem:[#allocation2 + $0x50] sm:$0xff]  ;;  %v1094_v46 = vrot.slane %v4742_v43, 1  ;;  %v634_v61 = vrot.slane %v4742_v43, 7  ;;  %480 = vst.msk [vmem:[#allocation2 + $0xc8] sm:$0xff] %vm396_vm0, %v374_v17 }
  0x77   : > { %v4721_v34 = vsel %vm1083_vm2, %v1089_v28, %v1090_v31  ;;  %v4735_v39 = vsel %vm1083_vm2, %v1090_v31, %v1092_v36  ;;  %v1095_v47 = vrot.slane %v4739_v42, 1  ;;  %v632_v55 = vsel %vm622_vm3, %v629_v45, %v631_v52  ;;  %v4775_v59 = vld [vmem:[#allocation2 + $0x68] sm:$0xff]  ;;  %481 = vst.msk [vmem:[#allocation2 + $0xd0] sm:$0xff] %vm396_vm0, %v375_v25 }
  0x78   : > { %3769 = vmatmul.msk.f32.vlgmr.msrb.gmra.mxu1 %vm396_vm0, %v625_v30  ;;  %3804 = vmatmul.msk.f32.gmra.mxu2 %vm396_vm0, %v4721_v34  ;;  %v4772_v58 = vld [vmem:[#allocation2 + $0x70] sm:$0xff]  ;;  %v1099_v62 = vrot.slane %v4775_v59, 1  ;;  %v4788_v2 = vsel %vm622_vm3, %v633_v60, %v634_v61  ;;  %v636_v5 = vrot.slane %v4739_v42, 7  ;;  %v639_v14 = vrot.slane %v4775_v59, 7  ;;  %v518_v30 = vld [vmem:[#allocation2 + $0x80] sm:$0xff]  ;;  %482 = vst.msk [vmem:[#allocation2 + $0xe8] sm:$0xff] %vm396_vm0, %v376_v41 }
  0x79   : > { %3766 = vmatmul.msk.f32.gmra.mxu3 %vm396_vm0, %v4718_v32  ;;  %v4757_v50 = vsel %vm1083_vm2, %v1094_v46, %v1095_v47  ;;  %v4770_v56 = vsel %vm1083_vm2, %v1095_v47, %v1097_v53  ;;  %v1100_v63 = vrot.slane %v4772_v58, 1  ;;  %v4814_v12 = vld [vmem:[#allocation2 + $0x88] sm:$0xff]  ;;  %v641_v21 = vrot.slane %v4772_v58, 7  ;;  %v525_v46 = vld [vmem:[#allocation2 + $0xb8] sm:$0xff]  ;;  %v522_v53 = vld [vmem:[#allocation2 + $0xa0] sm:$0xff]  ;;  %485 = vst.msk [vmem:[#allocation2 + $0x110] sm:$0xff] %vm396_vm0, %v379_v10 }
  0x7a   : > { %v4805_v8 = vsel %vm622_vm3, %v634_v61, %v636_v5  ;;  %v4810_v11 = vld [vmem:[#allocation2 + $0x90] sm:$0xff]  ;;  %v1104_v15 = vrot.slane %v4814_v12, 1  ;;  %v4828_v18 = vsel %vm622_vm3, %v638_v13, %v639_v14  ;;  %v643_v35 = vrot.slane %v518_v30, 7  ;;  %v529_v5 = vld [vmem:[#allocation2 + $0xd8] sm:$0xff]  ;;  %v380_v30 = vld [vmem:[%s4669_s26 + $0x80] sm:$0xff] }
  0x7b   : > { %3739 = vmatmul.msk.f32.gmra.mxu0 %vm396_vm0, %v4714_v29  ;;  %v4791_v3 = vsel %vm1083_vm2, %v1099_v62, %v1100_v63  ;;  %v4808_v9 = vsel %vm1083_vm2, %v1100_v63, %v1102_v6  ;;  %v1105_v16 = vrot.slane %v4810_v11, 1  ;;  %v4845_v26 = vsel %vm622_vm3, %v639_v14, %v641_v21  ;;  %v4854_v33 = vld [vmem:[#allocation2 + $0xa8] sm:$0xff]  ;;  %v378_v63 = vld [vmem:[%s4669_s26 + $0x70] sm:$0xff]  ;;  %486 = vst.msk [vmem:[#allocation2 + $0x128] sm:$0xff] %vm396_vm0, %v380_v30  ;;  %v383_v30 = vld [vmem:[%s4669_s26 + $0x98] sm:$0xff] }
  0x7c   : > { %v4850_v31 = vld [vmem:[#allocation2 + $0xb0] sm:$0xff]  ;;  %v644_v36 = vrot.slane %v4814_v12, 7  ;;  %v1109_v37 = vrot.slane %v4854_v33, 1  ;;  %v646_v47 = vrot.slane %v4810_v11, 7  ;;  %v1112_v48 = vrot.slane %v525_v46, 1  ;;  %484 = vst.msk [vmem:[#allocation2 + $0x108] sm:$0xff] %vm396_vm0, %v378_v63 }
  0x7d   : > { %v4831_v19 = vsel %vm1083_vm2, %v1104_v15, %v1105_v16  ;;  %v4848_v28 = vsel %vm1083_vm2, %v1105_v16, %v1107_v24  ;;  %v648_v57 = vrot.slane %v522_v53, 7  ;;  %v649_v60 = vrot.slane %v4854_v33, 7  ;;  %v526_v15 = vld [vmem:[#allocation2 + $0xc0] sm:$0xff]  ;;  %v381_v46 = vld [vmem:[%s4669_s26 + $0x88] sm:$0xff]  ;;  %489 = vst.msk [vmem:[#allocation2 + $0x150] sm:$0xff] %vm396_vm0, %v383_v30 }
  0x7e   : > { %v4868_v44 = vsel %vm622_vm3, %v643_v35, %v644_v36  ;;  %v4885_v51 = vsel %vm622_vm3, %v644_v36, %v646_v47  ;;  %v4890_v54 = vld [vmem:[#allocation2 + $0xd0] sm:$0xff]  ;;  %v651_v6 = vrot.slane %v4850_v31, 7  ;;  %v1117_v7 = vrot.slane %v529_v5, 1  ;;  %487 = vst.msk [vmem:[#allocation2 + $0x130] sm:$0xff] %vm396_vm0, %v381_v46  ;;  %v530_v53 = vld [vmem:[#allocation2 + $0xe0] sm:$0xff] }
  0x7f   : > { %v1115_v62 = vrot.slane %v4890_v54, 1  ;;  %v4908_v1 = vsel %vm622_vm3, %v648_v57, %v649_v60  ;;  %v4934_v17 = vld [vmem:[#allocation2 + $0xe8] sm:$0xff]  ;;  %v653_v20 = vrot.slane %v526_v15, 7  ;;  %v534_v46 = vld [vmem:[#allocation2 + $0x100] sm:$0xff] }
  0x80   : > { %3770 = vmatmul.msk.f32.gmra.mxu1 %vm396_vm0, %v627_v38  ;;  %3805 = vmatmul.msk.f32.gmra.mxu2 %vm396_vm0, %v4735_v39  ;;  %v1110_v38 = vrot.slane %v4850_v31, 1  ;;  %v4925_v13 = vsel %vm622_vm3, %v649_v60, %v651_v6  ;;  %v1119_v24 = vrot.slane %v4934_v17, 1  ;;  %v4972_v57 = vld [vmem:[#allocation2 + $0x110] sm:$0xff] }
  0x81   : > { %3767 = vmatmul.msk.f32.gmra.mxu3 %vm396_vm0, %v4737_v40  ;;  %v4928_v14 = vsel %vm1083_vm2, %v1115_v62, %v1117_v7  ;;  %7066 = vst [vmem:[#allocation19_spill] sm:$0xff] %v4972_v57  ;;  %v1125_v5 = vrot.slane %v4972_v57, 1  ;;  %v382_v6 = vld [vmem:[%s4669_s26 + $0x90] sm:$0xff] }
  0x82   : > { %v4871_v45 = vsel %vm1083_vm2, %v1109_v37, %v1110_v38  ;;  %v4888_v52 = vsel %vm1083_vm2, %v1110_v38, %v1112_v48  ;;  %7062 = vst [vmem:[#allocation15_spill] sm:$0xff] %v4928_v14  ;;  %v533_v37 = vld [vmem:[#allocation2 + $0xf8] sm:$0xff]  ;;  %v656_v38 = vrot.slane %v4890_v54, 7 }
  0x83   : > { %3740 = vmatmul.msk.f32.gmra.mxu0 %vm396_vm0, %v4742_v43  ;;  %7060 = vst [vmem:[#allocation13_spill] sm:$0xff] %v4888_v52  ;;  %v1122_v41 = vrot.slane %v533_v37, 1  ;;  %v4976_v60 = vld [vmem:[#allocation2 + $0x108] sm:$0xff] }
  0x84   : > { %v1124_v63 = vrot.slane %v4976_v60, 1  ;;  %488 = vst.msk [vmem:[#allocation2 + $0x148] sm:$0xff] %vm396_vm0, %v382_v6  ;;  %v664_v6 = vrot.slane %v4976_v60, 7 }
  0x86   : > { %v4993_v10 = vsel %vm1083_vm2, %v1124_v63, %v1125_v5  ;;  %v5020_v63 = vld [vmem:[#allocation2 + $0x128] sm:$0xff] }
  0x87   : > { %7067 = vst [vmem:[#allocation20_spill] sm:$0xff] %v4993_v10 }
  0x88   : > { %3771 = vmatmul.msk.f32.gmra.mxu1 %vm396_vm0, %v630_v49  ;;  %3806 = vmatmul.msk.f32.gmra.mxu2 %vm396_vm0, %v4757_v50  ;;  %7073 = vst [vmem:[#allocation26_spill] sm:$0xff] %v5020_v63 }
  0x89   : > { %3835 = vmatmul.msk.f32.vlgmr.msrb.gmra.mxu3 %vm396_vm0, %v630_v49  ;;  %v377_v49 = vld [vmem:[%s4669_s26 + $0x68] sm:$0xff] }
  0x8a   : > { %483 = vst.msk [vmem:[#allocation2 + $0xf0] sm:$0xff] %vm396_vm0, %v377_v49 }
  0x8b   : > { %3741 = vmatmul.msk.f32.gmra.mxu0 %vm396_vm0, %v4739_v42 }
  0x90   : > { %3772 = vmatmul.msk.f32.gmra.mxu1 %vm396_vm0, %v632_v55  ;;  %3807 = vmatmul.msk.f32.gmra.mxu2 %vm396_vm0, %v4770_v56 }
  0x91   : > { %3836 = vmatmul.msk.f32.gmra.mxu3 %vm396_vm0, %v632_v55  ;;  %v4894_v55 = vld [vmem:[#allocation2 + $0xc8] sm:$0xff]  ;;  %v4930_v16 = vld [vmem:[#allocation2 + $0xf0] sm:$0xff] }
  0x92   : > { %v1114_v61 = vrot.slane %v4894_v55, 1  ;;  %v654_v21 = vrot.slane %v4894_v55, 7  ;;  %v1120_v25 = vrot.slane %v4930_v16, 1 }
  0x93   : > { %3742 = vmatmul.msk.f32.gmra.mxu0 %vm396_vm0, %v4775_v59 }
  0x94   : > { %v4911_v4 = vsel %vm1083_vm2, %v1114_v61, %v1115_v62  ;;  %v4948_v35 = vsel %vm622_vm3, %v653_v20, %v654_v21  ;;  %v4951_v36 = vsel %vm1083_vm2, %v1119_v24, %v1120_v25  ;;  %v4967_v48 = vsel %vm622_vm3, %v654_v21, %v656_v38  ;;  %v537_v20 = vld [vmem:[#allocation2 + $0x118] sm:$0xff] }
  0x95   : > { %7061 = vst [vmem:[#allocation14_spill] sm:$0xff] %v4911_v4  ;;  %v4970_v49 = vsel %vm1083_vm2, %v1120_v25, %v1122_v41  ;;  %v658_v61 = vrot.slane %v530_v53, 7  ;;  %v659_v62 = vrot.slane %v4934_v17, 7  ;;  %v661_v24 = vrot.slane %v4930_v16, 7  ;;  %v5016_v53 = vld [vmem:[#allocation2 + $0x130] sm:$0xff] }
  0x96   : > { %7063 = vst [vmem:[#allocation16_spill] sm:$0xff] %v4951_v36  ;;  %v1127_v25 = vrot.slane %v537_v20, 1  ;;  %v1129_v20 = vrot.slane %v5020_v63, 1 }
  0x97   : > { %7065 = vst [vmem:[#allocation18_spill] sm:$0xff] %v4970_v49  ;;  %v4990_v7 = vsel %vm622_vm3, %v658_v61, %v659_v62  ;;  %v5011_v38 = vsel %vm622_vm3, %v659_v62, %v661_v24  ;;  %v663_v62 = vrot.slane %v534_v46, 7  ;;  %v1130_v24 = vrot.slane %v5016_v53, 1 }
  0x98   : > { %3773 = vmatmul.msk.f32.gmra.mxu1 %vm396_vm0, %v4788_v2  ;;  %3808 = vmatmul.msk.f32.gmra.mxu2 %vm396_vm0, %v4791_v3  ;;  %7070 = vst [vmem:[#allocation23_spill] sm:$0xff] %v5011_v38  ;;  %v5014_v41 = vsel %vm1083_vm2, %v1125_v5, %v1127_v25  ;;  %v384_v25 = vld [vmem:[%s4669_s26 + $0xa0] sm:$0xff] }
  0x99   : > { %3837 = vmatmul.msk.f32.gmra.mxu3 %vm396_vm0, %v4788_v2  ;;  %7071 = vst [vmem:[#allocation24_spill] sm:$0xff] %v5014_v41  ;;  %v5038_v46 = vsel %vm622_vm3, %v663_v62, %v664_v6 }
  0x9a   : > { %7072 = vst [vmem:[#allocation25_spill] sm:$0xff] %v5016_v53 }
  0x9b   : > { %3743 = vmatmul.msk.f32.gmra.mxu0 %vm396_vm0, %v4772_v58  ;;  %490 = vst.msk [vmem:[#allocation2 + $0x168] sm:$0xff] %vm396_vm0, %v384_v25  ;;  %v666_v25 = vrot.slane %v4972_v57, 7 }
  0x9c   : > { %7076 = vst [vmem:[#allocation29_spill] sm:$0xff] %v5038_v46 }
  0xa0   : > { %3774 = vmatmul.msk.f32.gmra.mxu1 %vm396_vm0, %v4805_v8  ;;  %3809 = vmatmul.msk.f32.gmra.mxu2 %vm396_vm0, %v4808_v9 }
  0xa1   : > { %3838 = vmatmul.msk.f32.gmra.mxu3 %vm396_vm0, %v4805_v8 }
  0xa3   : > { %3744 = vmatmul.msk.f32.gmra.mxu0 %vm396_vm0, %v4814_v12 }
  0xa5   : > { %v4964_v47 = vpop.f32.mrf.mxu0 }
  0xa6   : > { %7064 = vst [vmem:[#allocation17_spill] sm:$0xff] %v4964_v47 }
  0xa8   : > { %3775 = vmatmul.msk.f32.gmra.mxu1 %vm396_vm0, %v4828_v18  ;;  %3810 = vmatmul.msk.f32.gmra.mxu2 %vm396_vm0, %v4831_v19 }
  0xa9   : > { %3839 = vmatmul.msk.f32.gmra.mxu3 %vm396_vm0, %v4828_v18 }
  0xab   : > { %3745 = vmatmul.msk.f32.gmra.mxu0 %vm396_vm0, %v4810_v11 }
  0xad   : > { %v794_v15 = vpop.f32.mrf.mxu0 }
  0xb0   : > { %3776 = vmatmul.msk.f32.gmra.mxu1 %vm396_vm0, %v4845_v26  ;;  %3811 = vmatmul.msk.f32.gmra.mxu2 %vm396_vm0, %v4848_v28  ;;  %v4995_v21 = vpop.f32.mrf.mxu2 }
  0xb1   : > { %3840 = vmatmul.msk.f32.gmra.mxu3 %vm396_vm0, %v4845_v26  ;;  %7068 = vst [vmem:[#allocation21_spill] sm:$0xff] %v4995_v21  ;;  %v541_v21 = vld [vmem:[#allocation2 + $0x138] sm:$0xff] }
  0xb3   : > { %3746 = vmatmul.msk.f32.gmra.mxu0 %vm396_vm0, %v4854_v33 }
  0xb8   : > { %3777 = vmatmul.msk.f32.gmra.mxu1 %vm396_vm0, %v4868_v44  ;;  %3812 = vmatmul.msk.f32.gmra.mxu2 %vm396_vm0, %v4871_v45  ;;  %v1253_v5 = vpop.f32.mrf.mxu2 }
  0xb9   : > { %3841 = vmatmul.msk.f32.gmra.mxu3 %vm396_vm0, %v4868_v44 }
  0xbb   : > { %3747 = vmatmul.msk.f32.gmra.mxu0 %vm396_vm0, %v4850_v31 }
  0xc0   : > { %3778 = vmatmul.msk.f32.gmra.mxu1 %vm396_vm0, %v4885_v51  ;;  %3813 = vmatmul.msk.f32.gmra.mxu2 %vm396_vm0, %v4888_v52 }
  0xc1   : > { %3842 = vmatmul.msk.f32.gmra.mxu3 %vm396_vm0, %v4885_v51 }
  0xc3   : > { %3748 = vmatmul.msk.f32.gmra.mxu0 %vm396_vm0, %v4894_v55 }
  0xc8   : > { %3779 = vmatmul.msk.f32.gmra.mxu1 %vm396_vm0, %v4908_v1  ;;  %3814 = vmatmul.msk.f32.gmra.mxu2 %vm396_vm0, %v4911_v4 }
  0xc9   : > { %3843 = vmatmul.msk.f32.gmra.mxu3 %vm396_vm0, %v4908_v1 }
  0xcb   : > { %3749 = vmatmul.msk.f32.gmra.mxu0 %vm396_vm0, %v4890_v54 }
  0xd0   : > { %3780 = vmatmul.msk.f32.gmra.mxu1 %vm396_vm0, %v4925_v13  ;;  %3815 = vmatmul.msk.f32.gmra.mxu2 %vm396_vm0, %v4928_v14 }
  0xd1   : > { %3844 = vmatmul.msk.f32.gmra.mxu3 %vm396_vm0, %v4925_v13 }
  0xd3   : > { %3750 = vmatmul.msk.f32.gmra.mxu0 %vm396_vm0, %v4934_v17 }
  0xd8   : > { %3781 = vmatmul.msk.f32.gmra.mxu1 %vm396_vm0, %v4948_v35  ;;  %3816 = vmatmul.msk.f32.gmra.mxu2 %vm396_vm0, %v4951_v36  ;;  %v538_v36 = vld [vmem:[#allocation2 + $0x120] sm:$0xff] }
  0xd9   : > { %3845 = vmatmul.msk.f32.gmra.mxu3 %vm396_vm0, %v4948_v35 }
  0xdb   : > { %3751 = vmatmul.msk.f32.gmra.mxu0 %vm396_vm0, %v4930_v16 }
  0xe0   : > { %3782 = vmatmul.msk.f32.gmra.mxu1 %vm396_vm0, %v4967_v48  ;;  %3817 = vmatmul.msk.f32.gmra.mxu2 %vm396_vm0, %v4970_v49 }
  0xe1   : > { %3846 = vmatmul.msk.f32.gmra.mxu3 %vm396_vm0, %v4967_v48 }
  0xe3   : > { %3752 = vmatmul.msk.f32.gmra.mxu0 %vm396_vm0, %v4976_v60 }
  0xe8   : > { %3783 = vmatmul.msk.f32.gmra.mxu1 %vm396_vm0, %v4990_v7  ;;  %3818 = vmatmul.msk.f32.gmra.mxu2 %vm396_vm0, %v4993_v10 }
  0xe9   : > { %3847 = vmatmul.msk.f32.gmra.mxu3 %vm396_vm0, %v4990_v7 }
  0xeb   : > { %3753 = vmatmul.msk.f32.gmra.mxu0 %vm396_vm0, %v4972_v57 }
  0xed   : > { %v5008_v37 = vpop.f32.mrf.mxu1 }
  0xee   : > { %7069 = vst [vmem:[#allocation22_spill] sm:$0xff] %v5008_v37  ;;  %v5057_v37 = vsel %vm622_vm3, %v664_v6, %v666_v25  ;;  %v668_v6 = vrot.slane %v538_v36, 7 }
  0xef   : > { %7079 = vst [vmem:[#allocation32_spill] sm:$0xff] %v5057_v37 }
  0xf0   : > { %3784 = vmatmul.msk.f32.gmra.mxu1 %vm396_vm0, %v5011_v38  ;;  %v797_v61 = vpop.f32.mrf.mxu0  ;;  %3819 = vmatmul.msk.f32.gmra.mxu2 %vm396_vm0, %v5014_v41  ;;  %v5041_v41 = vsel %vm1083_vm2, %v1129_v20, %v1130_v24 }
  0xf1   : > { %3848 = vmatmul.msk.f32.gmra.mxu3 %vm396_vm0, %v5011_v38  ;;  %7077 = vst [vmem:[#allocation30_spill] sm:$0xff] %v5041_v41  ;;  %v5110_v38 = vld [vmem:[#allocation2 + $0x168] sm:$0xff] }
  0xf2   : > { %7090 = vst [vmem:[#allocation43_spill] sm:$0xff] %v5110_v38 }
  0xf3   : > { %3754 = vmatmul.msk.f32.gmra.mxu0 %vm396_vm0, %v5020_v63 }
  0xf4   : > { %v5033_v30 = vpop.f32.mrf.mxu3 }
  0xf5   : > { %7074 = vst [vmem:[#allocation27_spill] sm:$0xff] %v5033_v30  ;;  %v5035_v0 = vpop.f32.mrf.mxu1  ;;  %v1132_v30 = vrot.slane %v541_v21, 1  ;;  %v5062_v21 = vld [vmem:[#allocation2 + $0x150] sm:$0xff] }
  0xf6   : > { %7075 = vst [vmem:[#allocation28_spill] sm:$0xff] %v5035_v0  ;;  %v385_v0 = vld [vmem:[%s4669_s26 + $0xa8] sm:$0xff] }
  0xf7   : > { %491 = vst.msk [vmem:[#allocation2 + $0x170] sm:$0xff] %vm396_vm0, %v385_v0 }
  0xf8   : > { %3785 = vmatmul.msk.f32.gmra.mxu1 %vm396_vm0, %v5038_v46  ;;  %v800_v47 = vpop.f32.mrf.mxu0  ;;  %3820 = vmatmul.msk.f32.gmra.mxu2 %vm396_vm0, %v5041_v41  ;;  %v5060_v41 = vsel %vm1083_vm2, %v1130_v24, %v1132_v30  ;;  %7081 = vst [vmem:[#allocation34_spill] sm:$0xff] %v5062_v21  ;;  %v669_v24 = vrot.slane %v5020_v63, 7  ;;  %v387_v63 = vld [vmem:[%s4669_s26 + $0xb8] sm:$0xff] }
  0xf9   : > { %3849 = vmatmul.msk.f32.gmra.mxu3 %vm396_vm0, %v5038_v46  ;;  %7080 = vst [vmem:[#allocation33_spill] sm:$0xff] %v5060_v41  ;;  %v5066_v46 = vld [vmem:[#allocation2 + $0x148] sm:$0xff] }
  0xfa   : > { %7082 = vst [vmem:[#allocation35_spill] sm:$0xff] %v5066_v46 }
  0xfb   : > { %3755 = vmatmul.msk.f32.gmra.mxu0 %vm396_vm0, %v5016_v53  ;;  %v1256_v62 = vpop.f32.mrf.mxu2  ;;  %493 = vst.msk [vmem:[#allocation2 + $0x190] sm:$0xff] %vm396_vm0, %v387_v63 }
  0xfc   : > { %v5054_v20 = vpop.f32.mrf.mxu3 }
  0xfd   : > { %7078 = vst [vmem:[#allocation31_spill] sm:$0xff] %v5054_v20  ;;  %v974_v10 = vpop.f32.mrf.mxu1 }
  0xfe   : > { %v975_v49 = vadd.f32 %v974_v10, %v794_v15  ;;  %v1134_v10 = vrot.slane %v5066_v46, 1  ;;  %v1135_v15 = vrot.slane %v5062_v21, 1 }
 0x100   : > { %v1347_v14 = vadd.f32 %v1253_v5, %v975_v49  ;;  %3786 = vmatmul.msk.f32.gmra.mxu1 %vm396_vm0, %v5057_v37  ;;  %v803_v0 = vpop.f32.mrf.mxu0  ;;  %3821 = vmatmul.msk.f32.gmra.mxu2 %vm396_vm0, %v5060_v41  ;;  %v386_v49 = vld [vmem:[%s4669_s26 + $0xb0] sm:$0xff]  ;;  %v5082_v41 = vsel %vm622_vm3, %v668_v6, %v669_v24  ;;  %v5085_v36 = vsel %vm1083_vm2, %v1134_v10, %v1135_v15 }
 0x101   : > { %3850 = vmatmul.msk.f32.gmra.mxu3 %vm396_vm0, %v5057_v37  ;;  %492 = vst.msk [vmem:[#allocation2 + $0x188] sm:$0xff] %vm396_vm0, %v386_v49  ;;  %v545_v37 = vld [vmem:[#allocation2 + $0x158] sm:$0xff] }
 0x102   : > { %7084 = vst [vmem:[#allocation37_spill] sm:$0xff] %v5082_v41  ;;  %v1137_v6 = vrot.slane %v545_v37, 1  ;;  %v5106_v37 = vld [vmem:[#allocation2 + $0x170] sm:$0xff] }
 0x103   : > { %3756 = vmatmul.msk.f32.gmra.mxu0 %vm396_vm0, %v5066_v46  ;;  %v1259_v5 = vpop.f32.mrf.mxu2  ;;  %7085 = vst [vmem:[#allocation38_spill] sm:$0xff] %v5085_v36 }
 0x104   : > { %v5079_v30 = vpop.f32.mrf.mxu3  ;;  %7089 = vst [vmem:[#allocation42_spill] sm:$0xff] %v5106_v37 }
 0x105   : > { %7083 = vst [vmem:[#allocation36_spill] sm:$0xff] %v5079_v30  ;;  %v977_v25 = vpop.f32.mrf.mxu1  ;;  %v671_v30 = vrot.slane %v5016_v53, 7 }
 0x106   : > { %v978_v20 = vadd.f32 %v977_v25, %v797_v61  ;;  %v5104_v25 = vsel %vm1083_vm2, %v1135_v15, %v1137_v6  ;;  %v674_v15 = vrot.slane %v5066_v46, 7  ;;  %v549_v46 = vld [vmem:[#allocation2 + $0x178] sm:$0xff] }
 0x107   : > { %v5101_v10 = vsel %vm622_vm3, %v669_v24, %v671_v30  ;;  %7088 = vst [vmem:[#allocation41_spill] sm:$0xff] %v5104_v25  ;;  %v1140_v30 = vrot.slane %v5106_v37, 1 }
 0x108   : > { %v1348_v4 = vadd.f32 %v1256_v62, %v978_v20  ;;  %3787 = vmatmul.msk.f32.gmra.mxu1 %vm396_vm0, %v5082_v41  ;;  %v806_v49 = vpop.f32.mrf.mxu0  ;;  %3822 = vmatmul.msk.f32.gmra.mxu2 %vm396_vm0, %v5085_v36  ;;  %7087 = vst [vmem:[#allocation40_spill] sm:$0xff] %v5101_v10  ;;  %v5154_v57 = vld [vmem:[#allocation2 + $0x188] sm:$0xff] }
 0x109   : > { %3851 = vmatmul.msk.f32.gmra.mxu3 %vm396_vm0, %v5082_v41  ;;  %v542_v41 = vld [vmem:[#allocation2 + $0x140] sm:$0xff] }
 0x10a   : > { %v673_v24 = vrot.slane %v542_v41, 7 }
 0x10b   : > { %3757 = vmatmul.msk.f32.gmra.mxu0 %vm396_vm0, %v5062_v21  ;;  %v1262_v61 = vpop.f32.mrf.mxu2 }
 0x10c   : > { %v5098_v62 = vpop.f32.mrf.mxu3  ;;  %v5126_v41 = vsel %vm622_vm3, %v673_v24, %v674_v15  ;;  %v1142_v24 = vrot.slane %v549_v46, 1  ;;  %v5150_v46 = vld [vmem:[#allocation2 + $0x190] sm:$0xff] }
 0x10d   : > { %7086 = vst [vmem:[#allocation39_spill] sm:$0xff] %v5098_v62  ;;  %v980_v20 = vpop.f32.mrf.mxu1 }
 0x10e   : > { %v981_v36 = vadd.f32 %v980_v20, %v800_v47  ;;  %v1139_v47 = vrot.slane %v5110_v38, 1  ;;  %7092 = vst [vmem:[#allocation45_spill] sm:$0xff] %v5126_v41 }
 0x110   : > { %v1349_v53 = vadd.f32 %v1259_v5, %v981_v36  ;;  %3788 = vmatmul.msk.f32.gmra.mxu1 %vm396_vm0, %v5101_v10  ;;  %v809_v63 = vpop.f32.mrf.mxu0  ;;  %3823 = vmatmul.msk.f32.gmra.mxu2 %vm396_vm0, %v5104_v25  ;;  %v388_v5 = vld [vmem:[%s4669_s26 + $0xc0] sm:$0xff]  ;;  %v5129_v62 = vsel %vm1083_vm2, %v1139_v47, %v1140_v30 }
 0x111   : > { %3852 = vmatmul.msk.f32.gmra.mxu3 %vm396_vm0, %v5101_v10  ;;  %494 = vst.msk [vmem:[#allocation2 + $0x1a8] sm:$0xff] %vm396_vm0, %v388_v5 }
 0x112   : > { %7093 = vst [vmem:[#allocation46_spill] sm:$0xff] %v5129_v62 }
 0x113   : > { %3758 = vmatmul.msk.f32.gmra.mxu0 %vm396_vm0, %v5110_v38  ;;  %v1265_v36 = vpop.f32.mrf.mxu2 }
 0x114   : > { %v1415_v6 = vpop.f32.mrf.mxu3 }
 0x115   : > { %v5123_v20 = vadd.f32 %v1415_v6, %v1347_v14  ;;  %v983_v25 = vpop.f32.mrf.mxu1  ;;  %v676_v14 = vrot.slane %v5062_v21, 7  ;;  %v389_v6 = vld [vmem:[%s4669_s26 + $0xc8] sm:$0xff] }
 0x116   : > { %v984_v10 = vadd.f32 %v983_v25, %v803_v0  ;;  %495 = vst.msk [vmem:[#allocation2 + $0x1b0] sm:$0xff] %vm396_vm0, %v389_v6 }
 0x117   : > { %7091 = vst [vmem:[#allocation44_spill] sm:$0xff] %v5123_v20  ;;  %v5145_v47 = vsel %vm622_vm3, %v674_v15, %v676_v14  ;;  %v679_v15 = vrot.slane %v5110_v38, 7  ;;  %v1541_v38 = vld [vmem:[#allocation4 + $0x10] sm:$0x7] }
 0x118   : > { %v1350_v52 = vadd.f32 %v1262_v61, %v984_v10  ;;  %3789 = vmatmul.msk.f32.gmra.mxu1 %vm396_vm0, %v5126_v41  ;;  %v812_v5 = vpop.f32.mrf.mxu0  ;;  %3824 = vmatmul.msk.f32.gmra.mxu2 %vm396_vm0, %v5129_v62  ;;  %7095 = vst [vmem:[#allocation48_spill] sm:$0xff] %v5145_v47  ;;  %v5148_v62 = vsel %vm1083_vm2, %v1140_v30, %v1142_v24  ;;  %v1145_v30 = vrot.slane %v5150_v46, 1 }
 0x119   : > { %3853 = vmatmul.msk.f32.gmra.mxu3 %vm396_vm0, %v5126_v41  ;;  %7096 = vst [vmem:[#allocation49_spill] sm:$0xff] %v5148_v62  ;;  %v546_v41 = vld [vmem:[#allocation2 + $0x160] sm:$0xff]  ;;  %3867 = vmatpush.msk.msrb.mxu0 %vm770_vm1, %v1541_v38 }
 0x11b   : > { %3759 = vmatmul.msk.f32.gmra.mxu0 %vm396_vm0, %v5106_v37  ;;  %v1268_v0 = vpop.f32.mrf.mxu2 }
 0x11c   : > { %v1418_v61 = vpop.f32.mrf.mxu3 }
 0x11d   : > { %v5142_v10 = vadd.f32 %v1418_v61, %v1348_v4  ;;  %v986_v25 = vpop.f32.mrf.mxu1  ;;  %v678_v4 = vrot.slane %v546_v41, 7 }
 0x11e   : > { %v987_v20 = vadd.f32 %v986_v25, %v806_v49  ;;  %v1144_v49 = vrot.slane %v5154_v57, 1 }
 0x11f   : > { %7094 = vst [vmem:[#allocation47_spill] sm:$0xff] %v5142_v10  ;;  %v5168_v61 = vsel %vm622_vm3, %v678_v4, %v679_v15 }
 0x120   : > { %v1351_v21 = vadd.f32 %v1265_v36, %v987_v20  ;;  %3790 = vmatmul.msk.f32.gmra.mxu1 %vm396_vm0, %v5145_v47  ;;  %v815_v6 = vpop.f32.mrf.mxu0  ;;  %3825 = vmatmul.msk.f32.gmra.mxu2 %vm396_vm0, %v5148_v62  ;;  %7098 = vst [vmem:[#allocation51_spill] sm:$0xff] %v5168_v61  ;;  %v5171_v25 = vsel %vm1083_vm2, %v1144_v49, %v1145_v30  ;;  %v553_v62 = vld [vmem:[#allocation2 + $0x198] sm:$0xff] }
 0x121   : > { %3854 = vmatmul.msk.f32.gmra.mxu3 %vm396_vm0, %v5145_v47  ;;  %7099 = vst [vmem:[#allocation52_spill] sm:$0xff] %v5171_v25  ;;  %v1147_v4 = vrot.slane %v553_v62, 1 }
 0x123   : > { %3760 = vmatmul.msk.f32.gmra.mxu0 %vm396_vm0, %v5154_v57  ;;  %v1271_v36 = vpop.f32.mrf.mxu2 }
 0x124   : > { %v1421_v20 = vpop.f32.mrf.mxu3 }
 0x125   : > { %v5165_v14 = vadd.f32 %v1421_v20, %v1349_v53  ;;  %v989_v24 = vpop.f32.mrf.mxu1  ;;  %v681_v53 = vrot.slane %v5106_v37, 7  ;;  %v5195_v37 = vld [vmem:[#allocation2 + $0x1a8] sm:$0xff] }
 0x126   : > { %v990_v41 = vadd.f32 %v989_v24, %v809_v63 }
 0x127   : > { %7097 = vst [vmem:[#allocation50_spill] sm:$0xff] %v5165_v14  ;;  %v5186_v24 = vsel %vm622_vm3, %v679_v15, %v681_v53  ;;  %v550_v14 = vld [vmem:[#allocation2 + $0x180] sm:$0xff]  ;;  %v684_v15 = vrot.slane %v5154_v57, 7 }
 0x128   : > { %v1352_v10 = vadd.f32 %v1268_v0, %v990_v41  ;;  %3791 = vmatmul.msk.f32.gmra.mxu1 %vm396_vm0, %v5168_v61  ;;  %v818_v47 = vpop.f32.mrf.mxu0  ;;  %3826 = vmatmul.msk.f32.gmra.mxu2 %vm396_vm0, %v5171_v25  ;;  %7101 = vst [vmem:[#allocation54_spill] sm:$0xff] %v5186_v24  ;;  %v5189_v41 = vsel %vm1083_vm2, %v1145_v30, %v1147_v4 }
 0x129   : > { %3855 = vmatmul.msk.f32.gmra.mxu3 %vm396_vm0, %v5168_v61  ;;  %7102 = vst [vmem:[#allocation55_spill] sm:$0xff] %v5189_v41  ;;  %v5191_v61 = vld [vmem:[#allocation2 + $0x1b0] sm:$0xff] }
 0x12a   : > { %v1150_v30 = vrot.slane %v5191_v61, 1 }
 0x12b   : > { %3761 = vmatmul.msk.f32.gmra.mxu0 %vm396_vm0, %v5150_v46  ;;  %v1274_v63 = vpop.f32.mrf.mxu2 }
 0x12c   : > { %v1424_v0 = vpop.f32.mrf.mxu3 }
 0x12d   : > { %v5183_v49 = vadd.f32 %v1424_v0, %v1350_v52  ;;  %v992_v20 = vpop.f32.mrf.mxu1  ;;  %v683_v52 = vrot.slane %v550_v14, 7 }
 0x12e   : > { %v993_v25 = vadd.f32 %v992_v20, %v812_v5  ;;  %v1149_v5 = vrot.slane %v5195_v37, 1 }
 0x12f   : > { %7100 = vst [vmem:[#allocation53_spill] sm:$0xff] %v5183_v49  ;;  %v5209_v0 = vsel %vm622_vm3, %v683_v52, %v684_v15 }
 0x130   : > { %v1353_v62 = vadd.f32 %v1271_v36, %v993_v25  ;;  %3792 = vmatmul.msk.f32.gmra.mxu1 %vm396_vm0, %v5186_v24  ;;  %v821_v38 = vpop.f32.mrf.mxu0  ;;  %3827 = vmatmul.msk.f32.gmra.mxu2 %vm396_vm0, %v5189_v41  ;;  %7104 = vst [vmem:[#allocation57_spill] sm:$0xff] %v5209_v0  ;;  %v5212_v20 = vsel %vm1083_vm2, %v1149_v5, %v1150_v30  ;;  %v557_v41 = vld [vmem:[#allocation2 + $0x1b8] sm:$0xff] }
 0x131   : > { %3856 = vmatmul.msk.f32.gmra.mxu3 %vm396_vm0, %v5186_v24  ;;  %7105 = vst [vmem:[#allocation58_spill] sm:$0xff] %v5212_v20  ;;  %v1152_v52 = vrot.slane %v557_v41, 1 }
 0x133   : > { %3762 = vmatmul.msk.f32.gmra.mxu0 %vm396_vm0, %v5195_v37  ;;  %v1277_v36 = vpop.f32.mrf.mxu2 }
 0x134   : > { %v1427_v25 = vpop.f32.mrf.mxu3 }
 0x135   : > { %v5206_v53 = vadd.f32 %v1427_v25, %v1351_v21  ;;  %v995_v4 = vpop.f32.mrf.mxu1  ;;  %v686_v21 = vrot.slane %v5150_v46, 7 }
 0x136   : > { %v996_v14 = vadd.f32 %v995_v4, %v815_v6 }
 0x137   : > { %7103 = vst [vmem:[#allocation56_spill] sm:$0xff] %v5206_v53  ;;  %v5226_v4 = vsel %vm622_vm3, %v684_v15, %v686_v21  ;;  %v554_v53 = vld [vmem:[#allocation2 + $0x1a0] sm:$0xff]  ;;  %v689_v15 = vrot.slane %v5195_v37, 7  ;;  %v1154_v21 = vrot.slane %v4697_v22, 1 }
 0x138   : > { %v1354_v49 = vadd.f32 %v1274_v63, %v996_v14  ;;  %3793 = vmatmul.msk.f32.gmra.mxu1 %vm396_vm0, %v5209_v0  ;;  %v824_v24 = vpop.f32.mrf.mxu0  ;;  %3828 = vmatmul.msk.f32.gmra.mxu2 %vm396_vm0, %v5212_v20  ;;  %7107 = vst [vmem:[#allocation60_spill] sm:$0xff] %v5226_v4  ;;  %v5229_v14 = vsel %vm1083_vm2, %v1150_v30, %v1152_v52  ;;  %v1155_v30 = vrot.slane %v4702_v23, 1 }
 0x139   : > { %3857 = vmatmul.msk.f32.gmra.mxu3 %vm396_vm0, %v5209_v0  ;;  %7108 = vst [vmem:[#allocation61_spill] sm:$0xff] %v5229_v14 }
 0x13b   : > { %3763 = vmatmul.msk.f32.gmra.mxu0 %vm396_vm0, %v5191_v61  ;;  %v1280_v5 = vpop.f32.mrf.mxu2 }
 0x13c   : > { %v1430_v6 = vpop.f32.mrf.mxu3 }
 0x13d   : > { %v5223_v25 = vadd.f32 %v1430_v6, %v1352_v10  ;;  %v998_v63 = vpop.f32.mrf.mxu1  ;;  %v688_v10 = vrot.slane %v554_v53, 7 }
 0x13e   : > { %v999_v20 = vadd.f32 %v998_v63, %v818_v47  ;;  %v5248_v63 = vsel %vm1083_vm2, %v1154_v21, %v1155_v30 }
 0x13f   : > { %7106 = vst [vmem:[#allocation59_spill] sm:$0xff] %v5223_v25  ;;  %v5245_v6 = vsel %vm622_vm3, %v688_v10, %v689_v15 }
 0x140   : > { %v1355_v0 = vadd.f32 %v1277_v36, %v999_v20  ;;  %3794 = vmatmul.msk.f32.gmra.mxu1 %vm396_vm0, %v5226_v4  ;;  %v827_v41 = vpop.f32.mrf.mxu0  ;;  %3829 = vmatmul.msk.f32.gmra.mxu2 %vm396_vm0, %v5229_v14  ;;  %7110 = vst [vmem:[#allocation63_spill] sm:$0xff] %v5248_v63  ;;  %v561_v14 = vld [vmem:[#allocation2 + $0x1d8] sm:$0xff] }
 0x141   : > { %3858 = vmatmul.msk.f32.gmra.mxu3 %vm396_vm0, %v5226_v4 }
 0x143   : > { %3868 = vmatmul.msk.f32.vlgmr.msrb.gmra.mxu0 %vm396_vm0, %v4708_v27  ;;  %v1283_v47 = vpop.f32.mrf.mxu2  ;;  %v691_v27 = vrot.slane %v5191_v61, 7 }
 0x144   : > { %v1433_v36 = vpop.f32.mrf.mxu3 }
 0x145   : > { %v5242_v20 = vadd.f32 %v1433_v36, %v1353_v62  ;;  %v1001_v52 = vpop.f32.mrf.mxu1  ;;  %v1157_v62 = vrot.slane %v561_v14, 1  ;;  %v5262_v36 = vsel %vm622_vm3, %v689_v15, %v691_v27  ;;  %v694_v15 = vrot.slane %v4697_v22, 7 }
 0x146   : > { %v1002_v53 = vadd.f32 %v1001_v52, %v821_v38 }
 0x147   : > { %7109 = vst [vmem:[#allocation62_spill] sm:$0xff] %v5242_v20  ;;  %v5265_v52 = vsel %vm1083_vm2, %v1155_v30, %v1157_v62  ;;  %v558_v20 = vld [vmem:[#allocation2 + $0x1c0] sm:$0xff]  ;;  %v1160_v30 = vrot.slane %v4737_v40, 1 }
 0x148   : > { %v1356_v25 = vadd.f32 %v1280_v5, %v1002_v53  ;;  %3795 = vmatmul.msk.f32.gmra.mxu1 %vm396_vm0, %v5245_v6  ;;  %v830_v4 = vpop.f32.mrf.mxu0  ;;  %3830 = vmatmul.msk.f32.gmra.mxu2 %vm396_vm0, %v5248_v63  ;;  %7112 = vst [vmem:[#allocation65_spill] sm:$0xff] %v5265_v52  ;;  %v394_v53 = vld [vmem:[%s4669_s26 + $0xf0] sm:$0xff] }
 0x149   : > { %3859 = vmatmul.msk.f32.gmra.mxu3 %vm396_vm0, %v5245_v6  ;;  %500 = vst.msk [vmem:[#allocation2 + $0x208] sm:$0xff] %vm396_vm0, %v394_v53 }
 0x14b   : > { %3869 = vmatmul.msk.f32.gmra.mxu0 %vm396_vm0, %v4714_v29  ;;  %v1286_v38 = vpop.f32.mrf.mxu2 }
 0x14c   : > { %v1436_v10 = vpop.f32.mrf.mxu3 }
 0x14d   : > { %v5259_v21 = vadd.f32 %v1436_v10, %v1354_v49  ;;  %v1004_v5 = vpop.f32.mrf.mxu1  ;;  %v693_v49 = vrot.slane %v558_v20, 7  ;;  %v395_v20 = vld [vmem:[%s4669_s26 + $0xf8] sm:$0xff] }
 0x14e   : > { %v1005_v63 = vadd.f32 %v1004_v5, %v824_v24  ;;  %v1159_v24 = vrot.slane %v4718_v32, 1  ;;  %501 = vst.msk [vmem:[#allocation2 + $0x210] sm:$0xff] %vm396_vm0, %v395_v20 }
 0x14f   : > { %7111 = vst [vmem:[#allocation64_spill] sm:$0xff] %v5259_v21  ;;  %v5284_v5 = vsel %vm622_vm3, %v693_v49, %v694_v15  ;;  %v565_v21 = vld [vmem:[#allocation2 + $0x1f8] sm:$0xff] }
 0x150   : > { %v1357_v14 = vadd.f32 %v1283_v47, %v1005_v63  ;;  %3796 = vmatmul.msk.f32.gmra.mxu1 %vm396_vm0, %v5262_v36  ;;  %v833_v29 = vpop.f32.mrf.mxu0  ;;  %3831 = vmatmul.msk.f32.gmra.mxu2 %vm396_vm0, %v5265_v52  ;;  %v1863_v63 = vld [vmem:[#allocation4 + $0x18] sm:$0x7]  ;;  %v5287_v22 = vsel %vm1083_vm2, %v1159_v24, %v1160_v30  ;;  %v1162_v49 = vrot.slane %v565_v21, 1 }
 0x151   : > { %3860 = vmatmul.msk.f32.gmra.mxu3 %vm396_vm0, %v5262_v36  ;;  %3933 = vmatpush.msk.msrb.mxu2 %vm770_vm1, %v1863_v63 }
 0x152   : > { %v5307_v20 = vsel %vm1083_vm2, %v1160_v30, %v1162_v49  ;;  %v2017_v49 = vld [vmem:[#allocation4 + $0x1c] sm:$0x7] }
 0x153   : > { %3870 = vmatmul.msk.f32.gmra.mxu0 %vm396_vm0, %v4742_v43  ;;  %v1289_v47 = vpop.f32.mrf.mxu2  ;;  %v1701_v43 = vld [vmem:[#allocation4 + $0x14] sm:$0x7]  ;;  %3966 = vmatpush.msk.msra.mxu3 %vm770_vm1, %v2017_v49 }
 0x154   : > { %v1439_v27 = vpop.f32.mrf.mxu3  ;;  %3900 = vmatpush.msk.msra.mxu1 %vm770_vm1, %v1701_v43 }
 0x155   : > { %v5281_v62 = vadd.f32 %v1439_v27, %v1355_v0  ;;  %v1007_v10 = vpop.f32.mrf.mxu1  ;;  %v696_v0 = vrot.slane %v4702_v23, 7 }
 0x156   : > { %v1008_v53 = vadd.f32 %v1007_v10, %v827_v41 }
 0x157   : > { %7113 = vst [vmem:[#allocation66_spill] sm:$0xff] %v5281_v62  ;;  %v5304_v10 = vsel %vm622_vm3, %v694_v15, %v696_v0  ;;  %v562_v62 = vld [vmem:[#allocation2 + $0x1e0] sm:$0xff] }
 0x158   : > { %v1358_v52 = vadd.f32 %v1286_v38, %v1008_v53  ;;  %3797 = vmatmul.msk.f32.gmra.mxu1 %vm396_vm0, %v5284_v5  ;;  %v836_v63 = vpop.f32.mrf.mxu0  ;;  %3832 = vmatmul.msk.f32.gmra.mxu2 %vm396_vm0, %v5287_v22 }
 0x159   : > { %3861 = vmatmul.msk.f32.gmra.mxu3 %vm396_vm0, %v5284_v5 }
 0x15b   : > { %3871 = vmatmul.msk.f32.gmra.mxu0 %vm396_vm0, %v4739_v42  ;;  %v1292_v41 = vpop.f32.mrf.mxu2  ;;  %v698_v42 = vrot.slane %v562_v62, 7 }
 0x15c   : > { %v1442_v38 = vpop.f32.mrf.mxu3 }
 0x15d   : > { %v5301_v24 = vadd.f32 %v1442_v38, %v1356_v25  ;;  %v1010_v27 = vpop.f32.mrf.mxu1  ;;  %v699_v25 = vrot.slane %v4718_v32, 7  ;;  %v701_v32 = vrot.slane %v4737_v40, 7 }
 0x15e   : > { %v1011_v53 = vadd.f32 %v1010_v27, %v830_v4 }
 0x15f   : > { %7114 = vst [vmem:[#allocation67_spill] sm:$0xff] %v5301_v24  ;;  %v5321_v43 = vsel %vm622_vm3, %v698_v42, %v699_v25  ;;  %v5336_v27 = vsel %vm622_vm3, %v699_v25, %v701_v32  ;;  %v5338_v42 = vld [vmem:[#allocation2 + $0x208] sm:$0xff]  ;;  %v5354_v32 = vld [vmem:[#allocation2 + $0x210] sm:$0xff] }
 0x160   : > { %v1359_v23 = vadd.f32 %v1289_v47, %v1011_v53  ;;  %3798 = vmatmul.msk.f32.gmra.mxu1 %vm396_vm0, %v5304_v10  ;;  %v839_v21 = vpop.f32.mrf.mxu0  ;;  %3833 = vmatmul.msk.f32.gmra.mxu2 %vm396_vm0, %v5307_v20 }
 0x161   : > { %3862 = vmatmul.msk.f32.gmra.mxu3 %vm396_vm0, %v5304_v10 }
 0x163   : > { %3872 = vmatmul.msk.f32.gmra.mxu0 %vm396_vm0, %v4775_v59  ;;  %v1295_v15 = vpop.f32.mrf.mxu2 }
 0x164   : > { %v1445_v4 = vpop.f32.mrf.mxu3 }
 0x165   : > { %v5318_v30 = vadd.f32 %v1445_v4, %v1357_v14  ;;  %v1013_v47 = vpop.f32.mrf.mxu1 }
 0x166   : > { %v1014_v0 = vadd.f32 %v1013_v47, %v833_v29 }
 0x167   : > { %7115 = vst [vmem:[#allocation68_spill] sm:$0xff] %v5318_v30  ;;  %v7155_v30 = vld [vmem:[#allocation27_spill] sm:$0xff] }
 0x168   : > { %v1360_v38 = vadd.f32 %v1292_v41, %v1014_v0  ;;  %3799 = vmatmul.msk.f32.gmra.mxu1 %vm396_vm0, %v5321_v43  ;;  %v842_v62 = vpop.f32.mrf.mxu0  ;;  %3934 = vmatmul.msk.f32.vlgmr.msrb.gmra.mxu2 %vm396_vm0, %v4788_v2  ;;  %v566_v2 = vld [vmem:[#allocation2 + $0x200] sm:$0xff] }
 0x169   : > { %3863 = vmatmul.msk.f32.gmra.mxu3 %vm396_vm0, %v5321_v43 }
 0x16b   : > { %3873 = vmatmul.msk.f32.gmra.mxu0 %vm396_vm0, %v4772_v58  ;;  %v1298_v59 = vpop.f32.mrf.mxu2  ;;  %v1381_v58 = vrot.slane %v566_v2, 7 }
 0x16c   : > { %v1448_v14 = vpop.f32.mrf.mxu3 }
 0x16d   : > { %v5333_v29 = vadd.f32 %v1448_v14, %v1358_v52  ;;  %v1016_v41 = vpop.f32.mrf.mxu1  ;;  %v1382_v52 = vrot.slane %v5338_v42, 7 }
 0x16e   : > { %v1017_v53 = vadd.f32 %v1016_v41, %v836_v63 }
 0x16f   : > { %7116 = vst [vmem:[#allocation69_spill] sm:$0xff] %v5333_v29  ;;  %v5352_v49 = vsel %vm622_vm3, %v1381_v58, %v1382_v52 }
 0x170   : > { %v1361_v4 = vadd.f32 %v1295_v15, %v1017_v53  ;;  %3800 = vmatmul.msk.f32.gmra.mxu1 %vm396_vm0, %v5336_v27  ;;  %v845_v40 = vpop.f32.mrf.mxu0  ;;  %3935 = vmatmul.msk.f32.gmra.mxu2 %vm396_vm0, %v4805_v8 }
 0x171   : > { %3864 = vmatmul.msk.f32.gmra.mxu3 %vm396_vm0, %v5336_v27 }
 0x173   : > { %3874 = vmatmul.msk.f32.gmra.mxu0 %vm396_vm0, %v4814_v12  ;;  %v1301_v63 = vpop.f32.mrf.mxu2  ;;  %v1384_v12 = vrot.slane %v5354_v32, 7 }
 0x174   : > { %v1451_v25 = vpop.f32.mrf.mxu3 }
 0x175   : > { %v5349_v47 = vadd.f32 %v1451_v25, %v1359_v23  ;;  %v1019_v15 = vpop.f32.mrf.mxu1 }
 0x176   : > { %v1020_v0 = vadd.f32 %v1019_v15, %v839_v21 }
 0x177   : > { %7117 = vst [vmem:[#allocation70_spill] sm:$0xff] %v5349_v47 }
 0x178   : > { %v1362_v8 = vadd.f32 %v1298_v59, %v1020_v0  ;;  %3901 = vmatmul.msk.f32.vlgmr.msra.gmra.mxu1 %vm396_vm0, %v4721_v34  ;;  %v848_v14 = vpop.f32.mrf.mxu0  ;;  %3936 = vmatmul.msk.f32.gmra.mxu2 %vm396_vm0, %v4828_v18  ;;  %v5368_v34 = vsel %vm622_vm3, %v1382_v52, %v1384_v12 }
 0x179   : > { %3865 = vmatmul.msk.f32.gmra.mxu3 %vm396_vm0, %v5352_v49 }
 0x17b   : > { %3875 = vmatmul.msk.f32.gmra.mxu0 %vm396_vm0, %v4810_v11  ;;  %v1304_v23 = vpop.f32.mrf.mxu2 }
 0x17c   : > { %v1454_v21 = vpop.f32.mrf.mxu3 }
 0x17d   : > { %v5365_v41 = vadd.f32 %v1454_v21, %v1360_v38  ;;  %v1022_v59 = vpop.f32.mrf.mxu1 }
 0x17e   : > { %v1023_v53 = vadd.f32 %v1022_v59, %v842_v62 }
 0x17f   : > { %7118 = vst [vmem:[#allocation71_spill] sm:$0xff] %v5365_v41 }
 0x180   : > { %v1363_v2 = vadd.f32 %v1301_v63, %v1023_v53  ;;  %3902 = vmatmul.msk.f32.gmra.mxu1 %vm396_vm0, %v4735_v39  ;;  %v851_v18 = vpop.f32.mrf.mxu0  ;;  %3937 = vmatmul.msk.f32.gmra.mxu2 %vm396_vm0, %v4845_v26  ;;  %v4237_v26 = vld [vmem:[#allocation2 + $0x48] sm:$0xff] }
 0x181   : > { %3866 = vmatmul.msk.f32.gmra.mxu3 %vm396_vm0, %v5368_v34 }
 0x183   : > { %3876 = vmatmul.msk.f32.gmra.mxu0 %vm396_vm0, %v4854_v33  ;;  %v1307_v11 = vpop.f32.mrf.mxu2 }
 0x184   : > { %v1457_v38 = vpop.f32.mrf.mxu3 }
 0x185   : > { %v5378_v62 = vadd.f32 %v1457_v38, %v1361_v4  ;;  %v1025_v58 = vpop.f32.mrf.mxu1 }
 0x186   : > { %v1026_v52 = vadd.f32 %v1025_v58, %v845_v40 }
 0x187   : > { %7119 = vst [vmem:[#allocation72_spill] sm:$0xff] %v5378_v62  ;;  %v7156_v62 = vld [vmem:[#allocation21_spill] sm:$0xff] }
 0x188   : > { %v1364_v63 = vadd.f32 %v1304_v23, %v1026_v52  ;;  %3903 = vmatmul.msk.f32.gmra.mxu1 %vm396_vm0, %v4757_v50  ;;  %v854_v39 = vpop.f32.mrf.mxu0  ;;  %3938 = vmatmul.msk.f32.gmra.mxu2 %vm396_vm0, %v4868_v44  ;;  %v4238_v44 = vld [vmem:[#allocation2 + $0x50] sm:$0xff] }
 0x189   : > { %3967 = vmatmul.msk.f32.vlgmr.msra.gmra.mxu3 %vm396_vm0, %v4237_v26 }
 0x18b   : > { %3877 = vmatmul.msk.f32.gmra.mxu0 %vm396_vm0, %v4850_v31  ;;  %v1310_v25 = vpop.f32.mrf.mxu2 }
 0x18c   : > { %v1460_v15 = vpop.f32.mrf.mxu3 }
 0x18d   : > { %v5387_v4 = vadd.f32 %v1460_v15, %v1362_v8  ;;  %v1028_v0 = vpop.f32.mrf.mxu1 }
 0x18e   : > { %v1029_v40 = vadd.f32 %v1028_v0, %v848_v14 }
 0x18f   : > { %7120 = vst [vmem:[#allocation73_spill] sm:$0xff] %v5387_v4 }
 0x190   : > { %v1365_v12 = vadd.f32 %v1307_v11, %v1029_v40  ;;  %3904 = vmatmul.msk.f32.gmra.mxu1 %vm396_vm0, %v4770_v56  ;;  %v857_v23 = vpop.f32.mrf.mxu0  ;;  %3939 = vmatmul.msk.f32.gmra.mxu2 %vm396_vm0, %v4885_v51  ;;  %v4239_v51 = vld [vmem:[#allocation2 + $0x68] sm:$0xff] }
 0x191   : > { %3968 = vmatmul.msk.f32.gmra.mxu3 %vm396_vm0, %v4238_v44 }
 0x193   : > { %3878 = vmatmul.msk.f32.gmra.mxu0 %vm396_vm0, %v4894_v55  ;;  %v1313_v31 = vpop.f32.mrf.mxu2 }
 0x194   : > { %v1463_v21 = vpop.f32.mrf.mxu3 }
 0x195   : > { %v5396_v8 = vadd.f32 %v1463_v21, %v1363_v2  ;;  %v1031_v59 = vpop.f32.mrf.mxu1 }
 0x196   : > { %v1032_v14 = vadd.f32 %v1031_v59, %v851_v18 }
 0x197   : > { %7121 = vst [vmem:[#allocation74_spill] sm:$0xff] %v5396_v8 }
 0x198   : > { %v1366_v53 = vadd.f32 %v1310_v25, %v1032_v14  ;;  %3905 = vmatmul.msk.f32.gmra.mxu1 %vm396_vm0, %v4791_v3  ;;  %v860_v11 = vpop.f32.mrf.mxu0  ;;  %3940 = vmatmul.msk.f32.gmra.mxu2 %vm396_vm0, %v4908_v1  ;;  %v4240_v1 = vld [vmem:[#allocation2 + $0x70] sm:$0xff] }
 0x199   : > { %3969 = vmatmul.msk.f32.gmra.mxu3 %vm396_vm0, %v4239_v51 }
 0x19b   : > { %3879 = vmatmul.msk.f32.gmra.mxu0 %vm396_vm0, %v4890_v54  ;;  %v1316_v38 = vpop.f32.mrf.mxu2 }
 0x19c   : > { %v1466_v58 = vpop.f32.mrf.mxu3 }
 0x19d   : > { %v5405_v2 = vadd.f32 %v1466_v58, %v1364_v63  ;;  %v1034_v52 = vpop.f32.mrf.mxu1 }
 0x19e   : > { %v1035_v18 = vadd.f32 %v1034_v52, %v854_v39 }
 0x19f   : > { %7122 = vst [vmem:[#allocation75_spill] sm:$0xff] %v5405_v2 }
 0x1a0   : > { %v1367_v26 = vadd.f32 %v1313_v31, %v1035_v18  ;;  %3906 = vmatmul.msk.f32.gmra.mxu1 %vm396_vm0, %v4808_v9  ;;  %v863_v25 = vpop.f32.mrf.mxu0  ;;  %3941 = vmatmul.msk.f32.gmra.mxu2 %vm396_vm0, %v4925_v13  ;;  %v4241_v13 = vld [vmem:[#allocation2 + $0x88] sm:$0xff] }
 0x1a1   : > { %3970 = vmatmul.msk.f32.gmra.mxu3 %vm396_vm0, %v4240_v1 }
 0x1a3   : > { %3880 = vmatmul.msk.f32.gmra.mxu0 %vm396_vm0, %v4934_v17  ;;  %v1319_v54 = vpop.f32.mrf.mxu2 }
 0x1a4   : > { %v1469_v15 = vpop.f32.mrf.mxu3 }
 0x1a5   : > { %v5414_v63 = vadd.f32 %v1469_v15, %v1365_v12  ;;  %v1037_v0 = vpop.f32.mrf.mxu1 }
 0x1a6   : > { %v1038_v39 = vadd.f32 %v1037_v0, %v857_v23 }
 0x1a7   : > { %7123 = vst [vmem:[#allocation76_spill] sm:$0xff] %v5414_v63  ;;  %v7145_v63 = vld [vmem:[#allocation40_spill] sm:$0xff] }
 0x1a8   : > { %v1368_v40 = vadd.f32 %v1316_v38, %v1038_v39  ;;  %3907 = vmatmul.msk.f32.gmra.mxu1 %vm396_vm0, %v4831_v19  ;;  %v866_v44 = vpop.f32.mrf.mxu0  ;;  %3942 = vmatmul.msk.f32.gmra.mxu2 %vm396_vm0, %v4948_v35  ;;  %v4242_v35 = vld [vmem:[#allocation2 + $0x90] sm:$0xff] }
 0x1a9   : > { %3971 = vmatmul.msk.f32.gmra.mxu3 %vm396_vm0, %v4241_v13  ;;  %v7128_v13 = vld [vmem:[#allocation13_spill] sm:$0xff] }
 0x1ab   : > { %3881 = vmatmul.msk.f32.gmra.mxu0 %vm396_vm0, %v4930_v16  ;;  %v1322_v31 = vpop.f32.mrf.mxu2 }
 0x1ac   : > { %v1472_v21 = vpop.f32.mrf.mxu3 }
 0x1ad   : > { %v5423_v12 = vadd.f32 %v1472_v21, %v1366_v53  ;;  %v1040_v59 = vpop.f32.mrf.mxu1  ;;  %v7129_v21 = vld [vmem:[#allocation23_spill] sm:$0xff] }
 0x1ae   : > { %v1041_v23 = vadd.f32 %v1040_v59, %v860_v11 }
 0x1af   : > { %7124 = vst [vmem:[#allocation77_spill] sm:$0xff] %v5423_v12 }
 0x1b0   : > { %v1369_v14 = vadd.f32 %v1319_v54, %v1041_v23  ;;  %3908 = vmatmul.msk.f32.gmra.mxu1 %vm396_vm0, %v4848_v28  ;;  %v869_v51 = vpop.f32.mrf.mxu0  ;;  %3943 = vmatmul.msk.f32.gmra.mxu2 %vm396_vm0, %v4967_v48  ;;  %v7126_v48 = vld [vmem:[#allocation19_spill] sm:$0xff] }
 0x1b1   : > { %3972 = vmatmul.msk.f32.gmra.mxu3 %vm396_vm0, %v4242_v35 }
 0x1b3   : > { %3882 = vmatmul.msk.f32.gmra.mxu0 %vm396_vm0, %v4976_v60  ;;  %v1325_v38 = vpop.f32.mrf.mxu2 }
 0x1b4   : > { %v1475_v58 = vpop.f32.mrf.mxu3 }
 0x1b5   : > { %v5432_v53 = vadd.f32 %v1475_v58, %v1367_v26  ;;  %v1043_v52 = vpop.f32.mrf.mxu1  ;;  %v7132_v58 = vld [vmem:[#allocation14_spill] sm:$0xff] }
 0x1b6   : > { %v1044_v11 = vadd.f32 %v1043_v52, %v863_v25 }
 0x1b7   : > { %7125 = vst [vmem:[#allocation78_spill] sm:$0xff] %v5432_v53 }
 0x1b8   : > { %v1370_v18 = vadd.f32 %v1322_v31, %v1044_v11  ;;  %3909 = vmatmul.msk.f32.gmra.mxu1 %vm396_vm0, %v4871_v45  ;;  %v872_v1 = vpop.f32.mrf.mxu0  ;;  %3944 = vmatmul.msk.f32.gmra.mxu2 %vm396_vm0, %v4990_v7  ;;  %v4243_v7 = vld [vmem:[#allocation2 + $0xb0] sm:$0xff] }
 0x1b9   : > { %3973 = vmatmul.msk.f32.gmra.mxu3 %vm396_vm0, %v4854_v33  ;;  %v7130_v33 = vld [vmem:[#allocation26_spill] sm:$0xff]  ;;  %v7133_v11 = vld [vmem:[#allocation29_spill] sm:$0xff] }
 0x1bb   : > { %3883 = vmatmul.msk.f32.gmra.mxu0 %vm396_vm0, %v7126_v48  ;;  %v1328_v54 = vpop.f32.mrf.mxu2 }
 0x1bc   : > { %v1478_v15 = vpop.f32.mrf.mxu3 }
 0x1bd   : > { %v5442_v26 = vadd.f32 %v1478_v15, %v1368_v40  ;;  %v1046_v0 = vpop.f32.mrf.mxu1  ;;  %v7134_v15 = vld [vmem:[#allocation25_spill] sm:$0xff] }
 0x1be   : > { %v1047_v25 = vadd.f32 %v1046_v0, %v866_v44 }
 0x1bf   : > { %7127 = vst [vmem:[#allocation19_spill] sm:$0xff] %v5442_v26 }
 0x1c0   : > { %v1371_v39 = vadd.f32 %v1325_v38, %v1047_v25  ;;  %3910 = vmatmul.msk.f32.gmra.mxu1 %vm396_vm0, %v7128_v13  ;;  %v5446_v31 = vpop.f32.mrf.mxu0  ;;  %3945 = vmatmul.msk.f32.gmra.mxu2 %vm396_vm0, %v7129_v21 }
 0x1c1   : > { %3974 = vmatmul.msk.f32.gmra.mxu3 %vm396_vm0, %v4243_v7  ;;  %v7136_v7 = vld [vmem:[#allocation15_spill] sm:$0xff] }
 0x1c3   : > { %3884 = vmatmul.msk.f32.gmra.mxu0 %vm396_vm0, %v7130_v33  ;;  %v1331_v59 = vpop.f32.mrf.mxu2 }
 0x1c4   : > { %v1481_v40 = vpop.f32.mrf.mxu3 }
 0x1c5   : > { %v5453_v23 = vadd.f32 %v1481_v40, %v1369_v14  ;;  %v1049_v44 = vpop.f32.mrf.mxu1 }
 0x1c6   : > { %v1050_v35 = vadd.f32 %v1049_v44, %v869_v51  ;;  %v7137_v44 = vld [vmem:[#allocation32_spill] sm:$0xff] }
 0x1c7   : > { %7131 = vst [vmem:[#allocation13_spill] sm:$0xff] %v5453_v23  ;;  %v7149_v23 = vld [vmem:[#allocation20_spill] sm:$0xff] }
 0x1c8   : > { %v1372_v38 = vadd.f32 %v1328_v54, %v1050_v35  ;;  %3911 = vmatmul.msk.f32.gmra.mxu1 %vm396_vm0, %v7132_v58  ;;  %v5457_v52 = vpop.f32.mrf.mxu0  ;;  %3946 = vmatmul.msk.f32.gmra.mxu2 %vm396_vm0, %v7133_v11  ;;  %v4244_v35 = vld [vmem:[#allocation2 + $0xd0] sm:$0xff] }
 0x1c9   : > { %3975 = vmatmul.msk.f32.gmra.mxu3 %vm396_vm0, %v4894_v55  ;;  %v7138_v55 = vld [vmem:[#allocation35_spill] sm:$0xff] }
 0x1cb   : > { %3885 = vmatmul.msk.f32.gmra.mxu0 %vm396_vm0, %v7134_v15  ;;  %v1334_v0 = vpop.f32.mrf.mxu2 }
 0x1cc   : > { %v1484_v14 = vpop.f32.mrf.mxu3 }
 0x1cd   : > { %v5465_v25 = vadd.f32 %v1484_v14, %v1370_v18  ;;  %v1052_v51 = vpop.f32.mrf.mxu1 }
 0x1ce   : > { %v1053_v54 = vadd.f32 %v1052_v51, %v872_v1 }
 0x1cf   : > { %7135 = vst [vmem:[#allocation23_spill] sm:$0xff] %v5465_v25 }
 0x1d0   : > { %v1373_v21 = vadd.f32 %v1331_v59, %v1053_v54  ;;  %3912 = vmatmul.msk.f32.gmra.mxu1 %vm396_vm0, %v7136_v7  ;;  %v5469_v40 = vpop.f32.mrf.mxu0  ;;  %3947 = vmatmul.msk.f32.gmra.mxu2 %vm396_vm0, %v7137_v44  ;;  %v7140_v59 = vld [vmem:[#allocation16_spill] sm:$0xff]  ;;  %v7141_v54 = vld [vmem:[#allocation37_spill] sm:$0xff]  ;;  %v7142_v44 = vld [vmem:[#allocation34_spill] sm:$0xff] }
 0x1d1   : > { %3976 = vmatmul.msk.f32.gmra.mxu3 %vm396_vm0, %v4244_v35 }
 0x1d3   : > { %3886 = vmatmul.msk.f32.gmra.mxu0 %vm396_vm0, %v7138_v55  ;;  %v1337_v11 = vpop.f32.mrf.mxu2 }
 0x1d4   : > { %v1487_v18 = vpop.f32.mrf.mxu3 }
 0x1d5   : > { %v5476_v14 = vadd.f32 %v1487_v18, %v1371_v39  ;;  %v1055_v1 = vpop.f32.mrf.mxu1  ;;  %v7144_v18 = vld [vmem:[#allocation18_spill] sm:$0xff] }
 0x1d7   : > { %7139 = vst [vmem:[#allocation26_spill] sm:$0xff] %v5476_v14 }
 0x1d8   : > { %3913 = vmatmul.msk.f32.gmra.mxu1 %vm396_vm0, %v7140_v59  ;;  %v5480_v51 = vpop.f32.mrf.mxu0  ;;  %3948 = vmatmul.msk.f32.gmra.mxu2 %vm396_vm0, %v7141_v54 }
 0x1d9   : > { %3977 = vmatmul.msk.f32.gmra.mxu3 %vm396_vm0, %v4934_v17  ;;  %v7146_v17 = vld [vmem:[#allocation43_spill] sm:$0xff] }
 0x1db   : > { %3887 = vmatmul.msk.f32.gmra.mxu0 %vm396_vm0, %v7142_v44  ;;  %v1340_v35 = vpop.f32.mrf.mxu2 }
 0x1dc   : > { %v1490_v4 = vpop.f32.mrf.mxu3 }
 0x1dd   : > { %v5488_v8 = vadd.f32 %v1490_v4, %v1372_v38  ;;  %v1058_v39 = vpop.f32.mrf.mxu1  ;;  %v7148_v38 = vld [vmem:[#allocation22_spill] sm:$0xff] }
 0x1de   : > { %v1056_v26 = vadd.f32 %v1055_v1, %v7148_v38  ;;  %v1059_v29 = vadd.f32 %v1058_v39, %v7155_v30 }
 0x1df   : > { %7143 = vst [vmem:[#allocation14_spill] sm:$0xff] %v5488_v8  ;;  %v7150_v8 = vld [vmem:[#allocation45_spill] sm:$0xff] }
 0x1e0   : > { %3914 = vmatmul.msk.f32.gmra.mxu1 %vm396_vm0, %v7144_v18  ;;  %v5492_v2 = vpop.f32.mrf.mxu0  ;;  %3949 = vmatmul.msk.f32.gmra.mxu2 %vm396_vm0, %v7145_v63  ;;  %v7151_v63 = vld [vmem:[#allocation42_spill] sm:$0xff] }
 0x1e1   : > { %3978 = vmatmul.msk.f32.gmra.mxu3 %vm396_vm0, %v4930_v16  ;;  %v1374_v16 = vadd.f32 %v1334_v0, %v1056_v26  ;;  %v7158_v26 = vld [vmem:[#allocation48_spill] sm:$0xff] }
 0x1e3   : > { %3888 = vmatmul.msk.f32.gmra.mxu0 %vm396_vm0, %v7146_v17  ;;  %v1343_v54 = vpop.f32.mrf.mxu2 }
 0x1e4   : > { %v1493_v12 = vpop.f32.mrf.mxu3 }
 0x1e5   : > { %v5500_v53 = vadd.f32 %v1493_v12, %v1373_v21  ;;  %v1061_v4 = vpop.f32.mrf.mxu1  ;;  %v7152_v21 = vld [vmem:[#allocation17_spill] sm:$0xff] }
 0x1e7   : > { %7147 = vst [vmem:[#allocation29_spill] sm:$0xff] %v5500_v53  ;;  %v7153_v53 = vld [vmem:[#allocation28_spill] sm:$0xff] }
 0x1e8   : > { %3915 = vmatmul.msk.f32.gmra.mxu1 %vm396_vm0, %v7149_v23  ;;  %v5505_v14 = vpop.f32.mrf.mxu0  ;;  %3950 = vmatmul.msk.f32.gmra.mxu2 %vm396_vm0, %v7150_v8  ;;  %v972_v25 = vadd.f32 %v7153_v53, %v7152_v21  ;;  %v7157_v8 = vld [vmem:[#allocation24_spill] sm:$0xff]  ;;  %v7159_v53 = vld [vmem:[#allocation39_spill] sm:$0xff] }
 0x1e9   : > { %3979 = vmatmul.msk.f32.gmra.mxu3 %vm396_vm0, %v4976_v60 }
 0x1ea   : > { %v1346_v47 = vadd.f32 %v7156_v62, %v972_v25 }
 0x1eb   : > { %3889 = vmatmul.msk.f32.gmra.mxu0 %vm396_vm0, %v7151_v63  ;;  %v1888_v12 = vpop.f32.mrf.mxu2 }
 0x1ec   : > { %v1496_v1 = vpop.f32.mrf.mxu3  ;;  %v1508_v0 = vadd.f32 %v7159_v53, %v1346_v47 }
 0x1ed   : > { %v5515_v38 = vadd.f32 %v1496_v1, %v1374_v16  ;;  %v1064_v24 = vpop.f32.mrf.mxu1  ;;  %v1375_v16 = vadd.f32 %v1337_v11, %v1059_v29  ;;  %v7163_v29 = vld [vmem:[#allocation51_spill] sm:$0xff]  ;;  %v7164_v11 = vld [vmem:[#allocation44_spill] sm:$0xff] }
 0x1ee   : > { %v1662_v62 = vadd.f32 %v5446_v31, %v1508_v0 }
 0x1ef   : > { %7154 = vst [vmem:[#allocation25_spill] sm:$0xff] %v5515_v38  ;;  %v7161_v38 = vld [vmem:[#allocation31_spill] sm:$0xff] }
 0x1f0   : > { %3916 = vmatmul.msk.f32.gmra.mxu1 %vm396_vm0, %v7157_v8  ;;  %v5521_v60 = vpop.f32.mrf.mxu0  ;;  %3951 = vmatmul.msk.f32.gmra.mxu2 %vm396_vm0, %v7158_v26  ;;  %v1062_v41 = vadd.f32 %v1061_v4, %v7161_v38  ;;  %v7162_v8 = vld [vmem:[#allocation30_spill] sm:$0xff]  ;;  %v1663_v4 = vadd.f32 %v5457_v52, %v7164_v11 }
 0x1f1   : > { %3980 = vmatmul.msk.f32.gmra.mxu3 %vm396_vm0, %v7126_v48 }
 0x1f2   : > { %v1376_v47 = vadd.f32 %v1340_v35, %v1062_v41  ;;  %v7168_v41 = vld [vmem:[#allocation54_spill] sm:$0xff]  ;;  %v7169_v35 = vld [vmem:[#allocation47_spill] sm:$0xff] }
 0x1f3   : > { %3890 = vmatmul.msk.f32.gmra.mxu0 %vm396_vm0, %v5154_v57  ;;  %v1891_v30 = vpop.f32.mrf.mxu2 }
 0x1f4   : > { %v1499_v25 = vpop.f32.mrf.mxu3 }
 0x1f5   : > { %v5531_v39 = vadd.f32 %v1499_v25, %v1375_v16  ;;  %v1726_v21 = vpop.f32.mrf.mxu1  ;;  %v7166_v16 = vld [vmem:[#allocation36_spill] sm:$0xff] }
 0x1f6   : > { %v1822_v1 = vadd.f32 %v1726_v21, %v1662_v62  ;;  %v1065_v62 = vadd.f32 %v1064_v24, %v7166_v16  ;;  %v7167_v21 = vld [vmem:[#allocation33_spill] sm:$0xff] }
 0x1f7   : > { %7160 = vst [vmem:[#allocation15_spill] sm:$0xff] %v5531_v39 }
 0x1f8   : > { %v1984_v26 = vadd.f32 %v1888_v12, %v1822_v1  ;;  %3917 = vmatmul.msk.f32.gmra.mxu1 %vm396_vm0, %v7162_v8  ;;  %v5536_v48 = vpop.f32.mrf.mxu0  ;;  %3952 = vmatmul.msk.f32.gmra.mxu2 %vm396_vm0, %v7163_v29  ;;  %v1377_v52 = vadd.f32 %v1343_v54, %v1065_v62  ;;  %v1664_v1 = vadd.f32 %v5469_v40, %v7169_v35  ;;  %v2177_v54 = vld [vmem:[#allocation4 + $0x20] sm:$0x7]  ;;  %v7173_v40 = vld [vmem:[#allocation50_spill] sm:$0xff] }
 0x1f9   : > { %3981 = vmatmul.msk.f32.gmra.mxu3 %vm396_vm0, %v7130_v33  ;;  %3999 = vmatpush.msk.msra.mxu0 %vm770_vm1, %v2177_v54 }
 0x1fb   : > { %3891 = vmatmul.msk.f32.gmra.mxu0 %vm396_vm0, %v5150_v46  ;;  %v1894_v31 = vpop.f32.mrf.mxu2 }
 0x1fc   : > { %v1502_v12 = vpop.f32.mrf.mxu3 }
 0x1fd   : > { %v5546_v38 = vadd.f32 %v1502_v12, %v1376_v47  ;;  %v1729_v53 = vpop.f32.mrf.mxu1  ;;  %v7171_v12 = vld [vmem:[#allocation38_spill] sm:$0xff] }
 0x1fe   : > { %v1823_v0 = vadd.f32 %v1729_v53, %v1663_v4 }
 0x1ff   : > { %7165 = vst [vmem:[#allocation32_spill] sm:$0xff] %v5546_v38 }
 0x200   : > { %v1985_v25 = vadd.f32 %v1891_v30, %v1823_v0  ;;  %3918 = vmatmul.msk.f32.gmra.mxu1 %vm396_vm0, %v7167_v21  ;;  %v5551_v33 = vpop.f32.mrf.mxu0  ;;  %3953 = vmatmul.msk.f32.gmra.mxu2 %vm396_vm0, %v7168_v41 }
 0x201   : > { %3982 = vmatmul.msk.f32.gmra.mxu3 %vm396_vm0, %v7134_v15  ;;  %v7172_v15 = vld [vmem:[#allocation57_spill] sm:$0xff] }
 0x203   : > { %3892 = vmatmul.msk.f32.gmra.mxu0 %vm396_vm0, %v5195_v37  ;;  %v1897_v47 = vpop.f32.mrf.mxu2 }
 0x204   : > { %v1505_v24 = vpop.f32.mrf.mxu3 }
 0x205   : > { %v5561_v30 = vadd.f32 %v1505_v24, %v1377_v52  ;;  %v1732_v29 = vpop.f32.mrf.mxu1  ;;  %v7176_v24 = vld [vmem:[#allocation60_spill] sm:$0xff] }
 0x206   : > { %v1824_v11 = vadd.f32 %v1732_v29, %v1664_v1  ;;  %v7175_v1 = vld [vmem:[#allocation41_spill] sm:$0xff]  ;;  %v5586_v29 = vld [vmem:[#allocation2 + $0x1c8] sm:$0xff] }
 0x207   : > { %7170 = vst [vmem:[#allocation35_spill] sm:$0xff] %v5561_v30 }
 0x208   : > { %v1986_v4 = vadd.f32 %v1894_v31, %v1824_v11  ;;  %3919 = vmatmul.msk.f32.gmra.mxu1 %vm396_vm0, %v7171_v12  ;;  %v5565_v53 = vpop.f32.mrf.mxu0  ;;  %3954 = vmatmul.msk.f32.gmra.mxu2 %vm396_vm0, %v7172_v15  ;;  %v1665_v31 = vadd.f32 %v5480_v51, %v7173_v40  ;;  %v7177_v51 = vld [vmem:[#allocation53_spill] sm:$0xff] }
 0x209   : > { %3983 = vmatmul.msk.f32.gmra.mxu3 %vm396_vm0, %v7138_v55 }
 0x20b   : > { %3893 = vmatmul.msk.f32.gmra.mxu0 %vm396_vm0, %v5191_v61  ;;  %v1900_v52 = vpop.f32.mrf.mxu2 }
 0x20c   : > { %v2042_v0 = vpop.f32.mrf.mxu3 }
 0x20d   : > { %v5576_v16 = vadd.f32 %v2042_v0, %v1984_v26  ;;  %v1735_v62 = vpop.f32.mrf.mxu1  ;;  %v1666_v26 = vadd.f32 %v5492_v2, %v7177_v51  ;;  %v7180_v2 = vld [vmem:[#allocation56_spill] sm:$0xff] }
 0x20e   : > { %v1825_v41 = vadd.f32 %v1735_v62, %v1665_v31  ;;  %v7179_v31 = vld [vmem:[#allocation46_spill] sm:$0xff]  ;;  %v5602_v62 = vld [vmem:[#allocation2 + $0x1d0] sm:$0xff] }
 0x20f   : > { %7174 = vst [vmem:[#allocation16_spill] sm:$0xff] %v5576_v16  ;;  %v7221_v16 = vld [vmem:[#allocation70_spill] sm:$0xff] }
 0x210   : > { %v1987_v35 = vadd.f32 %v1897_v47, %v1825_v41  ;;  %3920 = vmatmul.msk.f32.gmra.mxu1 %vm396_vm0, %v7175_v1  ;;  %v5580_v55 = vpop.f32.mrf.mxu0  ;;  %3955 = vmatmul.msk.f32.gmra.mxu2 %vm396_vm0, %v7176_v24 }
 0x211   : > { %3984 = vmatmul.msk.f32.gmra.mxu3 %vm396_vm0, %v7142_v44 }
 0x213   : > { %3894 = vmatmul.msk.f32.gmra.mxu0 %vm396_vm0, %v5586_v29  ;;  %v1903_v44 = vpop.f32.mrf.mxu2 }
 0x214   : > { %v2045_v47 = vpop.f32.mrf.mxu3 }
 0x215   : > { %v5592_v11 = vadd.f32 %v2045_v47, %v1985_v25  ;;  %v1738_v15 = vpop.f32.mrf.mxu1  ;;  %v1667_v25 = vadd.f32 %v5505_v14, %v7180_v2  ;;  %v7182_v47 = vld [vmem:[#allocation49_spill] sm:$0xff]  ;;  %v7183_v14 = vld [vmem:[#allocation59_spill] sm:$0xff] }
 0x216   : > { %v1826_v54 = vadd.f32 %v1738_v15, %v1666_v26  ;;  %v4247_v15 = vld [vmem:[#allocation2 + $0x1e8] sm:$0xff] }
 0x217   : > { %7178 = vst [vmem:[#allocation37_spill] sm:$0xff] %v5592_v11 }
 0x218   : > { %v1988_v40 = vadd.f32 %v1900_v52, %v1826_v54  ;;  %3921 = vmatmul.msk.f32.gmra.mxu1 %vm396_vm0, %v7179_v31  ;;  %v5596_v0 = vpop.f32.mrf.mxu0  ;;  %3956 = vmatmul.msk.f32.gmra.mxu2 %vm396_vm0, %v5245_v6 }
 0x219   : > { %3985 = vmatmul.msk.f32.gmra.mxu3 %vm396_vm0, %v7146_v17 }
 0x21b   : > { %3895 = vmatmul.msk.f32.gmra.mxu0 %vm396_vm0, %v5602_v62  ;;  %v1906_v17 = vpop.f32.mrf.mxu2 }
 0x21c   : > { %v2048_v41 = vpop.f32.mrf.mxu3 }
 0x21d   : > { %v5608_v52 = vadd.f32 %v2048_v41, %v1986_v4  ;;  %v1741_v24 = vpop.f32.mrf.mxu1  ;;  %v1668_v4 = vadd.f32 %v5521_v60, %v7183_v14  ;;  %v7186_v60 = vld [vmem:[#allocation62_spill] sm:$0xff] }
 0x21e   : > { %v1827_v51 = vadd.f32 %v1741_v24, %v1667_v25  ;;  %v7185_v24 = vld [vmem:[#allocation52_spill] sm:$0xff] }
 0x21f   : > { %7181 = vst [vmem:[#allocation34_spill] sm:$0xff] %v5608_v52 }
 0x220   : > { %v1989_v26 = vadd.f32 %v1903_v44, %v1827_v51  ;;  %3922 = vmatmul.msk.f32.gmra.mxu1 %vm396_vm0, %v7182_v47  ;;  %v5612_v6 = vpop.f32.mrf.mxu0  ;;  %3957 = vmatmul.msk.f32.gmra.mxu2 %vm396_vm0, %v5262_v36 }
 0x221   : > { %3986 = vmatmul.msk.f32.gmra.mxu3 %vm396_vm0, %v7151_v63  ;;  %v4248_v63 = vld [vmem:[#allocation2 + $0x1f0] sm:$0xff] }
 0x223   : > { %3896 = vmatmul.msk.f32.gmra.mxu0 %vm396_vm0, %v4247_v15 }
 0x224   : > { %v2051_v54 = vpop.f32.mrf.mxu3 }
 0x225   : > { %v5621_v44 = vadd.f32 %v2051_v54, %v1987_v35  ;;  %v1744_v2 = vpop.f32.mrf.mxu1  ;;  %v1669_v35 = vadd.f32 %v5536_v48, %v7186_v60 }
 0x226   : > { %v1828_v25 = vadd.f32 %v1744_v2, %v1668_v4  ;;  %v1909_v4 = vpop.f32.mrf.mxu2 }
 0x227   : > { %7184 = vst [vmem:[#allocation18_spill] sm:$0xff] %v5621_v44 }
 0x228   : > { %v1990_v41 = vadd.f32 %v1906_v17, %v1828_v25  ;;  %3923 = vmatmul.msk.f32.gmra.mxu1 %vm396_vm0, %v7185_v24  ;;  %v5625_v36 = vpop.f32.mrf.mxu0  ;;  %3958 = vmatmul.msk.f32.gmra.mxu2 %vm396_vm0, %v5284_v5  ;;  %v7187_v25 = vld [vmem:[#allocation55_spill] sm:$0xff] }
 0x229   : > { %3987 = vmatmul.msk.f32.gmra.mxu3 %vm396_vm0, %v5154_v57 }
 0x22b   : > { %3897 = vmatmul.msk.f32.gmra.mxu0 %vm396_vm0, %v4248_v63 }
 0x22c   : > { %v2054_v51 = vpop.f32.mrf.mxu3 }
 0x22d   : > { %v5634_v14 = vadd.f32 %v2054_v51, %v1988_v40  ;;  %v1747_v17 = vpop.f32.mrf.mxu1  ;;  %v7188_v40 = vld [vmem:[#allocation58_spill] sm:$0xff]  ;;  %v7191_v51 = vld [vmem:[#allocation63_spill] sm:$0xff] }
 0x22e   : > { %v1829_v54 = vadd.f32 %v1747_v17, %v1669_v35  ;;  %v7189_v35 = vld [vmem:[#allocation61_spill] sm:$0xff] }
 0x230   : > { %v1991_v2 = vadd.f32 %v1909_v4, %v1829_v54  ;;  %3924 = vmatmul.msk.f32.gmra.mxu1 %vm396_vm0, %v7187_v25  ;;  %v5638_v5 = vpop.f32.mrf.mxu0  ;;  %3959 = vmatmul.msk.f32.gmra.mxu2 %vm396_vm0, %v5304_v10  ;;  %v5696_v4 = vld [vmem:[#allocation2 + $0x230] sm:$0xff] }
 0x231   : > { %3988 = vmatmul.msk.f32.gmra.mxu3 %vm396_vm0, %v5150_v46 }
 0x233   : > { %3898 = vmatmul.msk.f32.gmra.mxu0 %vm396_vm0, %v5338_v42 }
 0x234   : > { %v2057_v57 = vpop.f32.mrf.mxu3 }
 0x235   : > { %v5646_v48 = vadd.f32 %v2057_v57, %v1989_v26  ;;  %v569_v57 = vld [vmem:[#allocation2 + $0x218] sm:$0xff] }
 0x238   : > { %3925 = vmatmul.msk.f32.gmra.mxu1 %vm396_vm0, %v7188_v40  ;;  %v5650_v60 = vpop.f32.mrf.mxu0  ;;  %3960 = vmatmul.msk.f32.gmra.mxu2 %vm396_vm0, %v5321_v43 }
 0x239   : > { %3989 = vmatmul.msk.f32.gmra.mxu3 %vm396_vm0, %v5195_v37 }
 0x23b   : > { %3899 = vmatmul.msk.f32.gmra.mxu0 %vm396_vm0, %v5354_v32 }
 0x23c   : > { %v2060_v46 = vpop.f32.mrf.mxu3 }
 0x23d   : > { %v5658_v10 = vadd.f32 %v2060_v46, %v1990_v41 }
 0x240   : > { %3926 = vmatmul.msk.f32.gmra.mxu1 %vm396_vm0, %v7189_v35  ;;  %v5662_v26 = vpop.f32.mrf.mxu0  ;;  %3961 = vmatmul.msk.f32.gmra.mxu2 %vm396_vm0, %v5336_v27  ;;  %v5682_v27 = vld [vmem:[#allocation2 + $0x228] sm:$0xff] }
 0x241   : > { %7190 = vst [vmem:[#allocation40_spill] sm:$0xff] %v5662_v26  ;;  %3990 = vmatmul.msk.f32.gmra.mxu3 %vm396_vm0, %v5191_v61  ;;  %v570_v61 = vld [vmem:[#allocation2 + $0x220] sm:$0xff] }
 0x243   : > { %4000 = vmatmul.msk.f32.vlgmr.msra.gmra.mxu0 %vm396_vm0, %v4757_v50  ;;  %v7193_v50 = vld [vmem:[#allocation65_spill] sm:$0xff] }
 0x244   : > { %v2063_v37 = vpop.f32.mrf.mxu3 }
 0x245   : > { %v5670_v43 = vadd.f32 %v2063_v37, %v1991_v2  ;;  %v1695_v2 = vrot.slane %v5338_v42, 1 }
 0x248   : > { %3927 = vmatmul.msk.f32.gmra.mxu1 %vm396_vm0, %v7191_v51  ;;  %v5674_v41 = vpop.f32.mrf.mxu0  ;;  %3962 = vmatmul.msk.f32.gmra.mxu2 %vm396_vm0, %v5352_v49  ;;  %v1857_v49 = vrot.slane %v570_v61, 7 }
 0x249   : > { %7192 = vst [vmem:[#allocation43_spill] sm:$0xff] %v5674_v41  ;;  %3991 = vmatmul.msk.f32.gmra.mxu3 %vm396_vm0, %v5586_v29  ;;  %v1858_v29 = vrot.slane %v5682_v27, 7 }
 0x24b   : > { %4001 = vmatmul.msk.f32.gmra.mxu0 %vm396_vm0, %v4770_v56  ;;  %v1859_v56 = vsel %vm622_vm3, %v1857_v49, %v1858_v29  ;;  %v7206_v49 = vld [vmem:[#allocation24_spill] sm:$0xff] }
 0x250   : > { %3928 = vmatmul.msk.f32.gmra.mxu1 %vm396_vm0, %v7193_v50  ;;  %v5686_v17 = vpop.f32.mrf.mxu0  ;;  %3963 = vmatmul.msk.f32.gmra.mxu2 %vm396_vm0, %v5368_v34  ;;  %v1860_v34 = vrot.slane %v5696_v4, 7 }
 0x251   : > { %7194 = vst [vmem:[#allocation22_spill] sm:$0xff] %v5686_v17  ;;  %3992 = vmatmul.msk.f32.gmra.mxu3 %vm396_vm0, %v5602_v62 }
 0x253   : > { %4002 = vmatmul.msk.f32.gmra.mxu0 %vm396_vm0, %v4791_v3  ;;  %v1861_v3 = vsel %vm622_vm3, %v1858_v29, %v1860_v34 }
 0x258   : > { %3929 = vmatmul.msk.f32.gmra.mxu1 %vm396_vm0, %v5287_v22  ;;  %v5700_v54 = vpop.f32.mrf.mxu0  ;;  %3964 = vmatmul.msk.f32.gmra.mxu2 %vm396_vm0, %v1859_v56  ;;  %v5790_v56 = vpop.f32.mrf.mxu2 }
 0x259   : > { %7195 = vst [vmem:[#allocation20_spill] sm:$0xff] %v5700_v54  ;;  %3993 = vmatmul.msk.f32.gmra.mxu3 %vm396_vm0, %v4247_v15  ;;  %v1696_v15 = vrot.slane %v5354_v32, 1 }
 0x25b   : > { %4003 = vmatmul.msk.f32.gmra.mxu0 %vm396_vm0, %v4808_v9  ;;  %v5719_v9 = vsel %vm1083_vm2, %v1695_v2, %v1696_v15 }
 0x260   : > { %3930 = vmatmul.msk.f32.gmra.mxu1 %vm396_vm0, %v5307_v20  ;;  %v5710_v62 = vpop.f32.mrf.mxu0  ;;  %3965 = vmatmul.msk.f32.gmra.mxu2 %vm396_vm0, %v1861_v3 }
 0x261   : > { %7196 = vst [vmem:[#allocation45_spill] sm:$0xff] %v5710_v62  ;;  %3994 = vmatmul.msk.f32.gmra.mxu3 %vm396_vm0, %v4248_v63  ;;  %v1698_v63 = vrot.slane %v569_v57, 1 }
 0x263   : > { %4004 = vmatmul.msk.f32.gmra.mxu0 %vm396_vm0, %v4831_v19  ;;  %v5730_v37 = vsel %vm1083_vm2, %v1696_v15, %v1698_v63 }
 0x268   : > { %3931 = vmatmul.msk.f32.gmra.mxu1 %vm396_vm0, %v5719_v9  ;;  %v5723_v46 = vpop.f32.mrf.mxu0 }
 0x269   : > { %7197 = vst [vmem:[#allocation42_spill] sm:$0xff] %v5723_v46  ;;  %3995 = vmatmul.msk.f32.gmra.mxu3 %vm396_vm0, %v5338_v42 }
 0x26b   : > { %4005 = vmatmul.msk.f32.gmra.mxu0 %vm396_vm0, %v4848_v28 }
 0x270   : > { %3932 = vmatmul.msk.f32.gmra.mxu1 %vm396_vm0, %v5730_v37  ;;  %v5734_v19 = vpop.f32.mrf.mxu0 }
 0x271   : > { %7198 = vst [vmem:[#allocation17_spill] sm:$0xff] %v5734_v19  ;;  %3996 = vmatmul.msk.f32.gmra.mxu3 %vm396_vm0, %v5354_v32 }
 0x273   : > { %4006 = vmatmul.msk.f32.gmra.mxu0 %vm396_vm0, %v4871_v45 }
 0x278   : > { %v5740_v61 = vpop.f32.mrf.mxu0 }
 0x279   : > { %7199 = vst [vmem:[#allocation28_spill] sm:$0xff] %v5740_v61  ;;  %3997 = vmatmul.msk.f32.gmra.mxu3 %vm396_vm0, %v5682_v27 }
 0x27b   : > { %4007 = vmatmul.msk.f32.gmra.mxu0 %vm396_vm0, %v7128_v13 }
 0x280   : > { %v5746_v28 = vpop.f32.mrf.mxu0 }
 0x281   : > { %7200 = vst [vmem:[#allocation27_spill] sm:$0xff] %v5746_v28  ;;  %3998 = vmatmul.msk.f32.gmra.mxu3 %vm396_vm0, %v5696_v4 }
 0x283   : > { %4008 = vmatmul.msk.f32.gmra.mxu0 %vm396_vm0, %v7132_v58 }
 0x288   : > { %v5752_v42 = vpop.f32.mrf.mxu0 }
 0x289   : > { %7201 = vst [vmem:[#allocation21_spill] sm:$0xff] %v5752_v42 }
 0x28b   : > { %4009 = vmatmul.msk.f32.gmra.mxu0 %vm396_vm0, %v7136_v7 }
 0x290   : > { %v5756_v45 = vpop.f32.mrf.mxu0 }
 0x291   : > { %7202 = vst [vmem:[#allocation48_spill] sm:$0xff] %v5756_v45 }
 0x293   : > { %4010 = vmatmul.msk.f32.gmra.mxu0 %vm396_vm0, %v7140_v59 }
 0x298   : > { %v5760_v32 = vpop.f32.mrf.mxu0 }
 0x299   : > { %7203 = vst [vmem:[#allocation39_spill] sm:$0xff] %v5760_v32 }
 0x29b   : > { %4011 = vmatmul.msk.f32.gmra.mxu0 %vm396_vm0, %v7144_v18 }
 0x2a0   : > { %v5764_v13 = vpop.f32.mrf.mxu0 }
 0x2a1   : > { %7204 = vst [vmem:[#allocation31_spill] sm:$0xff] %v5764_v13 }
 0x2a3   : > { %4012 = vmatmul.msk.f32.gmra.mxu0 %vm396_vm0, %v7149_v23  ;;  %v5784_v23 = vpop.f32.mrf.mxu1 }
 0x2a8   : > { %v5768_v58 = vpop.f32.mrf.mxu0 }
 0x2a9   : > { %7205 = vst [vmem:[#allocation30_spill] sm:$0xff] %v5768_v58 }
 0x2ab   : > { %4013 = vmatmul.msk.f32.gmra.mxu0 %vm396_vm0, %v7206_v49  ;;  %v5796_v3 = vpop.f32.mrf.mxu1 }
 0x2b0   : > { %v5772_v7 = vpop.f32.mrf.mxu0 }
 0x2b1   : > { %7207 = vst [vmem:[#allocation51_spill] sm:$0xff] %v5772_v7 }
 0x2b3   : > { %4014 = vmatmul.msk.f32.gmra.mxu0 %vm396_vm0, %v7162_v8  ;;  %v5792_v8 = vpop.f32.mrf.mxu3 }
 0x2b8   : > { %v5776_v59 = vpop.f32.mrf.mxu0 }
 0x2b9   : > { %7208 = vst [vmem:[#allocation44_spill] sm:$0xff] %v5776_v59 }
 0x2bb   : > { %4015 = vmatmul.msk.f32.gmra.mxu0 %vm396_vm0, %v7167_v21  ;;  %v5800_v21 = vpop.f32.mrf.mxu2 }
 0x2c0   : > { %v5780_v18 = vpop.f32.mrf.mxu0 }
 0x2c1   : > { %7209 = vst [vmem:[#allocation36_spill] sm:$0xff] %v5780_v18 }
 0x2c3   : > { %4016 = vmatmul.msk.f32.gmra.mxu0 %vm396_vm0, %v7171_v12  ;;  %v5802_v12 = vpop.f32.mrf.mxu3  ;;  %v5810_v15 = vpop.f32.mrf.mxu2 }
 0x2c8   : > { %v5786_v29 = vpop.f32.mrf.mxu0 }
 0x2c9   : > { %7210 = vst [vmem:[#allocation33_spill] sm:$0xff] %v5786_v29  ;;  %v7222_v29 = vld [vmem:[#allocation72_spill] sm:$0xff] }
 0x2cb   : > { %4017 = vmatmul.msk.f32.gmra.mxu0 %vm396_vm0, %v7175_v1  ;;  %v5808_v1 = vpop.f32.mrf.mxu1  ;;  %v5814_v63 = vpop.f32.mrf.mxu3 }
 0x2cc   : > { %v5820_v26 = vpop.f32.mrf.mxu2 }
 0x2d0   : > { %v5794_v34 = vpop.f32.mrf.mxu0 }
 0x2d1   : > { %7211 = vst [vmem:[#allocation54_spill] sm:$0xff] %v5794_v34 }
 0x2d3   : > { %4018 = vmatmul.msk.f32.gmra.mxu0 %vm396_vm0, %v7179_v31  ;;  %v1759_v31 = vpop.f32.mrf.mxu1 }
 0x2d4   : > { %v1924_v54 = vpop.f32.mrf.mxu2 }
 0x2d8   : > { %v5804_v2 = vpop.f32.mrf.mxu0 }
 0x2d9   : > { %7212 = vst [vmem:[#allocation47_spill] sm:$0xff] %v5804_v2  ;;  %v573_v2 = vld [vmem:[#allocation2 + $0x238] sm:$0xff] }
 0x2db   : > { %4019 = vmatmul.msk.f32.gmra.mxu0 %vm396_vm0, %v7182_v47  ;;  %v5824_v47 = vpop.f32.mrf.mxu3  ;;  %v1762_v41 = vpop.f32.mrf.mxu1 }
 0x2dc   : > { %v1927_v19 = vpop.f32.mrf.mxu2 }
 0x2e0   : > { %v5812_v57 = vpop.f32.mrf.mxu0 }
 0x2e3   : > { %4020 = vmatmul.msk.f32.gmra.mxu0 %vm396_vm0, %v7185_v24  ;;  %v5830_v62 = vpop.f32.mrf.mxu3  ;;  %v1765_v46 = vpop.f32.mrf.mxu1 }
 0x2e4   : > { %v1930_v45 = vpop.f32.mrf.mxu2 }
 0x2e8   : > { %v5818_v49 = vpop.f32.mrf.mxu0 }
 0x2eb   : > { %4021 = vmatmul.msk.f32.gmra.mxu0 %vm396_vm0, %v7187_v25  ;;  %v2081_v61 = vpop.f32.mrf.mxu3  ;;  %v1768_v42 = vpop.f32.mrf.mxu1 }
 0x2ec   : > { %v1933_v30 = vpop.f32.mrf.mxu2 }
 0x2f0   : > { %v5826_v17 = vpop.f32.mrf.mxu0 }
 0x2f3   : > { %4022 = vmatmul.msk.f32.gmra.mxu0 %vm396_vm0, %v7188_v40  ;;  %v2084_v40 = vpop.f32.mrf.mxu3  ;;  %v1771_v13 = vpop.f32.mrf.mxu1 }
 0x2f8   : > { %v5832_v24 = vpop.f32.mrf.mxu0 }
 0x2fb   : > { %4023 = vmatmul.msk.f32.gmra.mxu0 %vm396_vm0, %v7189_v35  ;;  %v2087_v35 = vpop.f32.mrf.mxu3  ;;  %v5848_v58 = vpop.f32.mrf.mxu1 }
 0x2fc   : > { %7213 = vst [vmem:[#allocation38_spill] sm:$0xff] %v5848_v58 }
 0x300   : > { %v5836_v25 = vpop.f32.mrf.mxu0 }
 0x303   : > { %4024 = vmatmul.msk.f32.gmra.mxu0 %vm396_vm0, %v7191_v51  ;;  %v5854_v51 = vpop.f32.mrf.mxu2  ;;  %v5856_v7 = vpop.f32.mrf.mxu3 }
 0x304   : > { %7214 = vst [vmem:[#allocation57_spill] sm:$0xff] %v5854_v51  ;;  %v5858_v38 = vpop.f32.mrf.mxu1  ;;  %v7220_v51 = vld [vmem:[#allocation71_spill] sm:$0xff] }
 0x305   : > { %7215 = vst [vmem:[#allocation50_spill] sm:$0xff] %v5856_v7  ;;  %v2172_v7 = vrot.slane %v5696_v4, 1 }
 0x306   : > { %7216 = vst [vmem:[#allocation41_spill] sm:$0xff] %v5858_v38  ;;  %v1676_v38 = vadd.f32 %v5638_v5, %v7220_v51  ;;  %v7226_v5 = vld [vmem:[#allocation68_spill] sm:$0xff] }
 0x308   : > { %v5840_v32 = vpop.f32.mrf.mxu0 }
 0x30b   : > { %4025 = vmatmul.msk.f32.gmra.mxu0 %vm396_vm0, %v7193_v50  ;;  %v5862_v28 = vpop.f32.mrf.mxu2 }
 0x30c   : > { %7217 = vst [vmem:[#allocation60_spill] sm:$0xff] %v5862_v28  ;;  %v5868_v18 = vpop.f32.mrf.mxu1  ;;  %v1677_v28 = vadd.f32 %v5650_v60, %v7222_v29 }
 0x30d   : > { %7219 = vst [vmem:[#allocation46_spill] sm:$0xff] %v5868_v18  ;;  %v7224_v18 = vld [vmem:[#allocation69_spill] sm:$0xff] }
 0x30e   : > { %v1837_v4 = vadd.f32 %v1771_v13, %v1677_v28 }
 0x310   : > { %v5844_v59 = vpop.f32.mrf.mxu0 }
 0x313   : > { %4026 = vmatmul.msk.f32.gmra.mxu0 %vm396_vm0, %v5287_v22  ;;  %v5864_v22 = vpop.f32.mrf.mxu3  ;;  %v5878_v11 = vpop.f32.mrf.mxu2 }
 0x314   : > { %7218 = vst [vmem:[#allocation53_spill] sm:$0xff] %v5864_v22  ;;  %v1836_v22 = vadd.f32 %v1768_v42, %v1676_v38  ;;  %v7227_v38 = vld [vmem:[#allocation67_spill] sm:$0xff]  ;;  %v2174_v42 = vrot.slane %v573_v2, 1 }
 0x315   : > { %7223 = vst [vmem:[#allocation56_spill] sm:$0xff] %v5878_v11  ;;  %v1672_v60 = vadd.f32 %v5580_v55, %v7227_v38  ;;  %v1999_v11 = vadd.f32 %v1933_v30, %v1837_v4 }
 0x316   : > { %v1998_v51 = vadd.f32 %v1930_v45, %v1836_v22  ;;  %v2175_v30 = vsel %vm1083_vm2, %v2172_v7, %v2174_v42 }
 0x317   : > { %v1832_v13 = vadd.f32 %v5808_v1, %v1672_v60  ;;  %v2153_v45 = vadd.f32 %v2087_v35, %v1999_v11  ;;  %v2304_v60 = vadd.f32 %v5826_v17, %v5658_v10  ;;  %v2302_v17 = vadd.f32 %v5812_v57, %v5634_v14  ;;  %v7246_v57 = vld [vmem:[#allocation34_spill] sm:$0xff] }
 0x318   : > { %v5850_v39 = vpop.f32.mrf.mxu0 }
 0x31b   : > { %4027 = vmatmul.msk.f32.gmra.mxu0 %vm396_vm0, %v5307_v20  ;;  %v2171_v20 = vrot.slane %v5682_v27, 1  ;;  %v1674_v27 = vadd.f32 %v5612_v6, %v7224_v18  ;;  %v5883_v44 = vpop.f32.mrf.mxu3  ;;  %v2152_v6 = vadd.f32 %v2084_v40, %v1998_v51  ;;  %v5893_v18 = vpop.f32.mrf.mxu1 }
 0x31c   : > { %7225 = vst [vmem:[#allocation49_spill] sm:$0xff] %v5883_v44 }
 0x320   : > { %v2238_v50 = vpop.f32.mrf.mxu0 }
 0x323   : > { %4028 = vmatmul.msk.f32.gmra.mxu0 %vm396_vm0, %v5719_v9  ;;  %v1675_v9 = vadd.f32 %v5625_v36, %v7221_v16  ;;  %v1673_v16 = vadd.f32 %v5596_v0, %v7226_v5  ;;  %v1834_v36 = vadd.f32 %v1762_v41, %v1674_v27 }
 0x325   : > { %v1835_v52 = vadd.f32 %v1765_v46, %v1675_v9  ;;  %v1833_v29 = vadd.f32 %v1759_v31, %v1673_v16  ;;  %v7228_v46 = vld [vmem:[#allocation66_spill] sm:$0xff]  ;;  %v1996_v0 = vadd.f32 %v1924_v54, %v1834_v36  ;;  %v7229_v9 = vld [vmem:[#allocation64_spill] sm:$0xff]  ;;  %v5915_v31 = vpop.f32.mrf.mxu3 }
 0x326   : > { %v1671_v28 = vadd.f32 %v5565_v53, %v7228_v46  ;;  %7231 = vst [vmem:[#allocation52_spill] sm:$0xff] %v5915_v31 }
 0x327   : > { %v2150_v53 = vadd.f32 %v5830_v62, %v1996_v0 }
 0x328   : > { %v2241_v58 = vpop.f32.mrf.mxu0  ;;  %v1831_v55 = vadd.f32 %v5796_v3, %v1671_v28 }
 0x32a   : > { %v1993_v1 = vadd.f32 %v5800_v21, %v1831_v55  ;;  %v5930_v21 = vpop.f32.mrf.mxu1 }
 0x32b   : > { %4029 = vmatmul.msk.f32.gmra.mxu0 %vm396_vm0, %v5730_v37  ;;  %v2173_v37 = vsel %vm1083_vm2, %v2171_v20, %v2172_v7  ;;  %v1997_v20 = vadd.f32 %v1927_v19, %v1835_v52  ;;  %v1995_v52 = vadd.f32 %v5820_v26, %v1833_v29  ;;  %v5904_v19 = vld [vmem:[%s6950_s2] ss:$0 sm:$0xff]  ;;  %v2310_v7 = vadd.f32 %v2238_v50, %v2150_v53 }
 0x32c   : > { %v2147_v35 = vadd.f32 %v5802_v12, %v1993_v1  ;;  %v2340_v46 = vadd.f32 %v5904_v19, %v2304_v60 }
 0x32d   : > { %v2151_v41 = vadd.f32 %v2081_v61, %v1997_v20  ;;  %v2149_v3 = vadd.f32 %v5824_v47, %v1995_v52  ;;  %v2346_v27 = vadd.f32 %v5904_v19, %v2310_v7  ;;  %v7251_v52 = vld [vmem:[#allocation33_spill] sm:$0xff] }
 0x32f   : > { %v2311_v54 = vadd.f32 %v2241_v58, %v2151_v41  ;;  %v5943_v36 = vmax.f32 %v2346_v27, 0.0 }
 0x330   : > { %v2244_v34 = vpop.f32.mrf.mxu0 }
 0x331   : > { %v2312_v22 = vadd.f32 %v2244_v34, %v2152_v6  ;;  %v5908_v34 = vpop.f32.mrf.mxu2  ;;  %7236 = vst [vmem:[#allocation63_spill] sm:$0xff] %v5943_v36 }
 0x332   : > { %7230 = vst [vmem:[#allocation59_spill] sm:$0xff] %v5908_v34  ;;  %v5974_v10 = vpop.f32.mrf.mxu1 }
 0x333   : > { %4030 = vmatmul.msk.f32.gmra.mxu0 %vm396_vm0, %v2173_v37  ;;  %v1670_v37 = vadd.f32 %v5551_v33, %v7229_v9  ;;  %v1994_v33 = vadd.f32 %v5810_v15, %v1832_v13  ;;  %v2348_v26 = vadd.f32 %v5904_v19, %v2312_v22  ;;  %v2347_v15 = vadd.f32 %v5904_v19, %v2311_v54 }
 0x334   : > { %v2338_v9 = vadd.f32 %v5904_v19, %v2302_v17 }
 0x335   : > { %v1830_v61 = vadd.f32 %v5784_v23, %v1670_v37  ;;  %v2148_v58 = vadd.f32 %v5814_v63, %v1994_v33  ;;  %v2309_v23 = vadd.f32 %v5850_v39, %v2149_v3  ;;  %v5926_v4 = vmax.f32 %v2348_v26, 0.0  ;;  %v7254_v33 = vld [vmem:[#allocation36_spill] sm:$0xff] }
 0x336   : > { %v5937_v5 = vmax.f32 %v2347_v15, 0.0  ;;  %v5995_v37 = vmax.f32 %v2340_v46, 0.0  ;;  %v6013_v26 = vmax.f32 %v2338_v9, 0.0  ;;  %v7263_v46 = vld [vmem:[#allocation23_spill] sm:$0xff] }
 0x337   : > { %v1992_v47 = vadd.f32 %v5790_v56, %v1830_v61  ;;  %v2308_v50 = vadd.f32 %v5844_v59, %v2148_v58  ;;  %7233 = vst [vmem:[#allocation55_spill] sm:$0xff] %v5926_v4  ;;  %v2307_v56 = vadd.f32 %v5840_v32, %v2147_v35  ;;  %v2345_v12 = vadd.f32 %v5904_v19, %v2309_v23  ;;  %v7253_v61 = vld [vmem:[#allocation16_spill] sm:$0xff] }
 0x338   : > { %v2247_v2 = vpop.f32.mrf.mxu0  ;;  %7235 = vst [vmem:[#allocation61_spill] sm:$0xff] %v5937_v5  ;;  %v2305_v32 = vadd.f32 %v5832_v24, %v5670_v43  ;;  %v2303_v24 = vadd.f32 %v5818_v49, %v5646_v48  ;;  %v7243_v48 = vld [vmem:[#allocation18_spill] sm:$0xff]  ;;  %v7244_v49 = vld [vmem:[#allocation47_spill] sm:$0xff]  ;;  %v2298_v3 = vadd.f32 %v7254_v33, %v7253_v61 }
 0x339   : > { %v2313_v11 = vadd.f32 %v2247_v2, %v2153_v45  ;;  %v2146_v63 = vadd.f32 %v5792_v8, %v1992_v47  ;;  %v2344_v16 = vadd.f32 %v5904_v19, %v2308_v50  ;;  %v5947_v8 = vpop.f32.mrf.mxu2  ;;  %v2343_v51 = vadd.f32 %v5904_v19, %v2307_v56  ;;  %v7247_v45 = vld [vmem:[#allocation54_spill] sm:$0xff]  ;;  %7248 = vst [vmem:[#allocation67_spill] sm:$0xff] %v5995_v37 }
 0x33a   : > { %v5952_v38 = vmax.f32 %v2345_v12, 0.0  ;;  %v2341_v20 = vadd.f32 %v5904_v19, %v2305_v32  ;;  %v2301_v13 = vadd.f32 %v7244_v49, %v7243_v48  ;;  %v2339_v0 = vadd.f32 %v5904_v19, %v2303_v24  ;;  %7255 = vst [vmem:[#allocation18_spill] sm:$0xff] %v6013_v26  ;;  %v7264_v48 = vld [vmem:[#allocation27_spill] sm:$0xff] }
 0x33b   : > { %v2349_v62 = vadd.f32 %v5904_v19, %v2313_v11  ;;  %4031 = vmatmul.msk.f32.gmra.mxu0 %vm396_vm0, %v2175_v30  ;;  %v2306_v59 = vadd.f32 %v5836_v25, %v2146_v63  ;;  %v5956_v25 = vpop.f32.mrf.mxu3  ;;  %v5961_v29 = vmax.f32 %v2344_v16, 0.0  ;;  %v5970_v6 = vmax.f32 %v2343_v51, 0.0  ;;  %v7250_v30 = vld [vmem:[#allocation37_spill] sm:$0xff] }
 0x33c   : > { %7237 = vst [vmem:[#allocation65_spill] sm:$0xff] %v5952_v38  ;;  %v5986_v41 = vmax.f32 %v2341_v20, 0.0  ;;  %v2300_v22 = vadd.f32 %v7247_v45, %v7246_v57  ;;  %v2299_v53 = vadd.f32 %v7251_v52, %v7250_v30  ;;  %v2337_v54 = vadd.f32 %v5904_v19, %v2301_v13 }
 0x33d   : > { %v5920_v40 = vmax.f32 %v2349_v62, 0.0  ;;  %7238 = vst [vmem:[#allocation24_spill] sm:$0xff] %v5956_v25  ;;  %v2342_v42 = vadd.f32 %v5904_v19, %v2306_v59  ;;  %v6006_v11 = vmax.f32 %v2339_v0, 0.0  ;;  %v6017_v62 = vpop.f32.mrf.mxu1  ;;  %v2334_v23 = vadd.f32 %v5904_v19, %v2298_v3 }
 0x33e   : > { %7239 = vst [vmem:[#allocation71_spill] sm:$0xff] %v5961_v29  ;;  %v2336_v7 = vadd.f32 %v5904_v19, %v2300_v22  ;;  %v2335_v1 = vadd.f32 %v5904_v19, %v2299_v53  ;;  %v6020_v58 = vmax.f32 %v2337_v54, 0.0  ;;  %v1686_v49 = vadd.f32 %v7264_v48, %v7263_v46 }
 0x33f   : > { %7232 = vst [vmem:[#allocation62_spill] sm:$0xff] %v5920_v40  ;;  %2414 = vmatpush.msrb.mxu1 %v5920_v40  ;;  %2513 = vmatpush.msrb.mxu3 %v5920_v40  ;;  %v5979_v28 = vmax.f32 %v2342_v42, 0.0  ;;  %v6039_v63 = vmax.f32 %v2334_v23, 0.0  ;;  %v7273_v40 = vld [vmem:[#allocation31_spill] sm:$0xff] }
 0x340   : > { %v5932_v39 = vpop.f32.mrf.mxu0  ;;  %7241 = vst [vmem:[#allocation72_spill] sm:$0xff] %v5970_v6  ;;  %v6025_v15 = vmax.f32 %v2336_v7, 0.0  ;;  %v6033_v50 = vmax.f32 %v2335_v1, 0.0  ;;  %v2398_v7 = vld [vmem:[%s6951_s3] sm:$0xff] }
 0x341   : > { %7234 = vst [vmem:[#allocation58_spill] sm:$0xff] %v5932_v39  ;;  %2415 = vmatpush.msrb.mxu1 %v5926_v4  ;;  %2514 = vmatpush.msrb.mxu3 %v5926_v4  ;;  %v5990_v14 = vpop.f32.mrf.mxu2  ;;  %v7272_v4 = vld [vmem:[#allocation25_spill] sm:$0xff] }
 0x342   : > { %7242 = vst [vmem:[#allocation69_spill] sm:$0xff] %v5979_v28  ;;  %v1690_v39 = vadd.f32 %v7273_v40, %v7272_v4 }
 0x343   : > { %2416 = vmatpush.msrb.mxu1 %v5937_v5  ;;  %2515 = vmatpush.msrb.mxu3 %v5937_v5  ;;  %7245 = vst [vmem:[#allocation68_spill] sm:$0xff] %v5986_v41  ;;  %v5999_v55 = vpop.f32.mrf.mxu3 }
 0x344   : > { %7252 = vst [vmem:[#allocation64_spill] sm:$0xff] %v6006_v11 }
 0x345   : > { %2417 = vmatpush.msrb.mxu1 %v5943_v36  ;;  %2516 = vmatpush.msrb.mxu3 %v5943_v36  ;;  %7256 = vst [vmem:[#allocation47_spill] sm:$0xff] %v6020_v58  ;;  %v6045_v56 = vpop.f32.mrf.mxu1 }
 0x346   : > { %7257 = vst [vmem:[#allocation34_spill] sm:$0xff] %v6025_v15 }
 0x347   : > { %2418 = vmatpush.msrb.mxu1 %v5952_v38  ;;  %2517 = vmatpush.msrb.mxu3 %v5952_v38  ;;  %7259 = vst [vmem:[#allocation37_spill] sm:$0xff] %v6033_v50  ;;  %v7271_v38 = vld [vmem:[#allocation44_spill] sm:$0xff] }
 0x348   : > { %v5965_v43 = vpop.f32.mrf.mxu0  ;;  %7260 = vst [vmem:[#allocation33_spill] sm:$0xff] %v6039_v63 }
 0x349   : > { %7240 = vst [vmem:[#allocation70_spill] sm:$0xff] %v5965_v43  ;;  %2419 = vmatpush.msrb.mxu1 %v5961_v29  ;;  %2518 = vmatpush.msrb.mxu3 %v5961_v29  ;;  %v6029_v47 = vpop.f32.mrf.mxu2  ;;  %v7270_v29 = vld [vmem:[#allocation35_spill] sm:$0xff] }
 0x34a   : > { %v1693_v36 = vadd.f32 %v7271_v38, %v7270_v29  ;;  %v7277_v38 = vld [vmem:[#allocation48_spill] sm:$0xff] }
 0x34b   : > { %2420 = vmatpush.msrb.mxu1 %v5970_v6  ;;  %2519 = vmatpush.msrb.mxu3 %v5970_v6  ;;  %v6037_v27 = vpop.f32.mrf.mxu3 }
 0x34d   : > { %2421 = vmatpush.msrb.mxu1 %v5979_v28  ;;  %2520 = vmatpush.msrb.mxu3 %v5979_v28  ;;  %v1798_v32 = vpop.f32.mrf.mxu1  ;;  %v7269_v28 = vld [vmem:[#allocation30_spill] sm:$0xff] }
 0x34e   : > { %v1846_v57 = vadd.f32 %v1798_v32, %v1686_v49 }
 0x34f   : > { %2422 = vmatpush.msrb.mxu1 %v5986_v41  ;;  %2521 = vmatpush.msrb.mxu3 %v5986_v41  ;;  %v7268_v41 = vld [vmem:[#allocation15_spill] sm:$0xff] }
 0x350   : > { %v6001_v2 = vpop.f32.mrf.mxu0  ;;  %v1691_v6 = vadd.f32 %v7269_v28, %v7268_v41  ;;  %v7276_v41 = vld [vmem:[#allocation14_spill] sm:$0xff] }
 0x351   : > { %7249 = vst [vmem:[#allocation66_spill] sm:$0xff] %v6001_v2  ;;  %2423 = vmatpush.msrb.mxu1 %v5995_v37  ;;  %2522 = vmatpush.msrb.mxu3 %v5995_v37  ;;  %v6049_v59 = vpop.f32.mrf.mxu2  ;;  %v1688_v29 = vadd.f32 %v7277_v38, %v7276_v41  ;;  %v7288_v38 = vld [vmem:[#allocation76_spill] sm:$0xff] }
 0x353   : > { %2424 = vmatpush.msrb.mxu1 %v6006_v11  ;;  %2523 = vmatpush.msrb.mxu3 %v6006_v11  ;;  %v6051_v16 = vpop.f32.mrf.mxu3  ;;  %v7267_v11 = vld [vmem:[#allocation51_spill] sm:$0xff] }
 0x355   : > { %2425 = vmatpush.msrb.mxu1 %v6013_v26  ;;  %2524 = vmatpush.msrb.mxu3 %v6013_v26  ;;  %v6057_v20 = vpop.f32.mrf.mxu1  ;;  %v7266_v26 = vld [vmem:[#allocation32_spill] sm:$0xff] }
 0x357   : > { %2426 = vmatpush.msrb.mxu1 %v6020_v58  ;;  %2525 = vmatpush.msrb.mxu3 %v6020_v58  ;;  %v2406_v58 = vld [vmem:[%s6951_s3 + $0x40] sm:$0xff] }
 0x358   : > { %v6031_v35 = vpop.f32.mrf.mxu0 }
 0x359   : > { %7258 = vst [vmem:[#allocation54_spill] sm:$0xff] %v6031_v35  ;;  %2427 = vmatpush.msrb.mxu1 %v6025_v15  ;;  %2526 = vmatpush.msrb.mxu3 %v6025_v15  ;;  %v1960_v60 = vpop.f32.mrf.mxu2 }
 0x35a   : > { %v2008_v22 = vadd.f32 %v1960_v60, %v1846_v57  ;;  %v2400_v60 = vld [vmem:[%s6951_s3 + $0x10] sm:$0xff]  ;;  %v2402_v57 = vld [vmem:[%s6951_s3 + $0x20] sm:$0xff] }
 0x35b   : > { %2428 = vmatpush.msrb.mxu1 %v6033_v50  ;;  %2527 = vmatpush.msrb.mxu3 %v6033_v50  ;;  %v2114_v42 = vpop.f32.mrf.mxu3 }
 0x35c   : > { %v2162_v9 = vadd.f32 %v2114_v42, %v2008_v22 }
 0x35d   : > { %2429 = vmatpush.msrb.mxu1 %v6039_v63  ;;  %2528 = vmatpush.msrb.mxu3 %v6039_v63  ;;  %v1804_v45 = vpop.f32.mrf.mxu1 }
 0x35e   : > { %2430 = vmatmul.f32.vlgmr.msrb.gmra.mxu1 %v2398_v7  ;;  %v2404_v7 = vld [vmem:[%s6951_s3 + $0x30] sm:$0xff] }
 0x360   : > { %v6047_v12 = vpop.f32.mrf.mxu0 }
 0x361   : > { %7261 = vst [vmem:[#allocation16_spill] sm:$0xff] %v6047_v12  ;;  %v6059_v17 = vpop.f32.mrf.mxu2 }
 0x363   : > { %v6063_v13 = vpop.f32.mrf.mxu3 }
 0x365   : > { %v1807_v61 = vpop.f32.mrf.mxu1 }
 0x366   : > { %2433 = vmatmul.f32.gmra.mxu1 %v2400_v60 }
 0x368   : > { %v6053_v51 = vpop.f32.mrf.mxu0 }
 0x369   : > { %7262 = vst [vmem:[#allocation36_spill] sm:$0xff] %v6053_v51  ;;  %v6067_v30 = vpop.f32.mrf.mxu2 }
 0x36b   : > { %v6071_v54 = vpop.f32.mrf.mxu3 }
 0x36d   : > { %v1810_v23 = vpop.f32.mrf.mxu1 }
 0x36e   : > { %2436 = vmatmul.f32.gmra.mxu1 %v2402_v57  ;;  %v1692_v57 = vadd.f32 %v7267_v11, %v7266_v26  ;;  %v7274_v11 = vld [vmem:[#allocation29_spill] sm:$0xff]  ;;  %v7275_v26 = vld [vmem:[#allocation39_spill] sm:$0xff]  ;;  %v1850_v12 = vadd.f32 %v1810_v23, %v1690_v39 }
 0x36f   : > { %v1689_v44 = vadd.f32 %v7275_v26, %v7274_v11  ;;  %v7280_v26 = vld [vmem:[#allocation13_spill] sm:$0xff] }
 0x370   : > { %v6055_v24 = vpop.f32.mrf.mxu0 }
 0x371   : > { %v1969_v3 = vpop.f32.mrf.mxu2 }
 0x373   : > { %v2123_v1 = vpop.f32.mrf.mxu3 }
 0x375   : > { %v1813_v49 = vpop.f32.mrf.mxu1 }
 0x376   : > { %2439 = vmatmul.f32.gmra.mxu1 %v2404_v7  ;;  %v1851_v43 = vadd.f32 %v1813_v49, %v1691_v6  ;;  %v7279_v6 = vld [vmem:[#allocation21_spill] sm:$0xff]  ;;  %v1848_v49 = vadd.f32 %v1804_v45, %v1688_v29  ;;  %v7289_v29 = vld [vmem:[#allocation20_spill] sm:$0xff] }
 0x378   : > { %v6065_v0 = vpop.f32.mrf.mxu0 }
 0x379   : > { %v1972_v42 = vpop.f32.mrf.mxu2 }
 0x37a   : > { %v2012_v51 = vadd.f32 %v1972_v42, %v1850_v12 }
 0x37b   : > { %v2126_v46 = vpop.f32.mrf.mxu3 }
 0x37d   : > { %v1816_v63 = vpop.f32.mrf.mxu1 }
 0x37e   : > { %2442 = vmatmul.f32.gmra.mxu1 %v2406_v58  ;;  %v1852_v7 = vadd.f32 %v1816_v63, %v1692_v57  ;;  %v2408_v58 = vld [vmem:[%s6951_s3 + $0x50] sm:$0xff]  ;;  %v1849_v57 = vadd.f32 %v1807_v61, %v1689_v44 }
 0x37f   : > { %v7281_v44 = vld [vmem:[#allocation28_spill] sm:$0xff] }
 0x380   : > { %v2274_v52 = vpop.f32.mrf.mxu0  ;;  %v2011_v23 = vadd.f32 %v1969_v3, %v1849_v57 }
 0x381   : > { %v6069_v53 = vadd.f32 %v2274_v52, %v2162_v9  ;;  %v1975_v22 = vpop.f32.mrf.mxu2 }
 0x382   : > { %v2013_v31 = vadd.f32 %v1975_v22, %v1851_v43  ;;  %v1685_v43 = vadd.f32 %v7281_v44, %v7280_v26 }
 0x383   : > { %7265 = vst [vmem:[#allocation23_spill] sm:$0xff] %v6069_v53  ;;  %v2129_v9 = vpop.f32.mrf.mxu3 }
 0x384   : > { %v2167_v25 = vadd.f32 %v2129_v9, %v2013_v31 }
 0x385   : > { %v1819_v37 = vpop.f32.mrf.mxu1 }
 0x386   : > { %v1853_v2 = vadd.f32 %v1819_v37, %v1693_v36  ;;  %2445 = vmatmul.f32.gmra.mxu1 %v2408_v58  ;;  %v7278_v36 = vld [vmem:[#allocation26_spill] sm:$0xff] }
 0x387   : > { %v1687_v37 = vadd.f32 %v7279_v6, %v7278_v36  ;;  %v7290_v36 = vld [vmem:[#allocation75_spill] sm:$0xff] }
 0x388   : > { %v6073_v33 = vpop.f32.mrf.mxu0 }
 0x389   : > { %v1978_v50 = vpop.f32.mrf.mxu2  ;;  %v1847_v39 = vadd.f32 %v6057_v20, %v1687_v37  ;;  %v7282_v20 = vld [vmem:[#allocation19_spill] sm:$0xff] }
 0x38a   : > { %v2014_v28 = vadd.f32 %v1978_v50, %v1852_v7  ;;  %v2166_v7 = vadd.f32 %v2126_v46, %v2012_v51  ;;  %v7283_v51 = vld [vmem:[#allocation17_spill] sm:$0xff]  ;;  %v7285_v46 = vld [vmem:[#allocation42_spill] sm:$0xff]  ;;  %v7295_v26 = vld [vmem:[#allocation23_spill] sm:$0xff] }
 0x38b   : > { %v2132_v15 = vpop.f32.mrf.mxu3  ;;  %v2009_v45 = vadd.f32 %v6059_v17, %v1847_v39  ;;  %v7286_v17 = vld [vmem:[#allocation77_spill] sm:$0xff]  ;;  %v2358_v44 = vadd.f32 %v5904_v19, %v7295_v26  ;;  %v4032_v26 = vld [vmem:[%s6951_s3 + $0x80] sm:$0xff] }
 0x38c   : > { %v2168_v4 = vadd.f32 %v2132_v15, %v2014_v28  ;;  %v2410_v15 = vld [vmem:[%s6951_s3 + $0x60] sm:$0xff]  ;;  %2529 = vmatmul.f32.vlgmr.msrb.gmra.mxu3 %v4032_v26 }
 0x38d   : > { %v2163_v9 = vadd.f32 %v6063_v13, %v2009_v45  ;;  %v7302_v45 = vld [vmem:[#allocation38_spill] sm:$0xff] }
 0x38e   : > { %2448 = vmatmul.f32.gmra.mxu1 %v2410_v15  ;;  %v7297_v15 = vld [vmem:[#allocation40_spill] sm:$0xff] }
 0x38f   : > { %v2323_v13 = vadd.f32 %v6073_v33, %v2163_v9 }
 0x390   : > { %v6078_v32 = vpop.f32.mrf.mxu0 }
 0x391   : > { %v1981_v35 = vpop.f32.mrf.mxu2  ;;  %v2359_v39 = vadd.f32 %v5904_v19, %v2323_v13 }
 0x392   : > { %v2015_v40 = vadd.f32 %v1981_v35, %v1853_v2  ;;  %v2010_v2 = vadd.f32 %v6067_v30, %v1848_v49  ;;  %v2165_v35 = vadd.f32 %v2123_v1, %v2011_v23  ;;  %v7284_v1 = vld [vmem:[#allocation78_spill] sm:$0xff] }
 0x393   : > { %v2135_v63 = vpop.f32.mrf.mxu3  ;;  %v7292_v23 = vld [vmem:[#allocation74_spill] sm:$0xff] }
 0x394   : > { %v2169_v34 = vadd.f32 %v2135_v63, %v2015_v40  ;;  %v2164_v30 = vadd.f32 %v6071_v54, %v2010_v2  ;;  %v7287_v54 = vld [vmem:[#allocation45_spill] sm:$0xff]  ;;  %v1681_v63 = vadd.f32 %v7289_v29, %v7288_v38 }
 0x395   : > { %v7296_v2 = vld [vmem:[#allocation73_spill] sm:$0xff] }
 0x396   : > { %v1841_v37 = vadd.f32 %v5893_v18, %v1681_v63  ;;  %v7309_v38 = vld [vmem:[#allocation57_spill] sm:$0xff] }
 0x397   : > { %v7310_v63 = vld [vmem:[#allocation53_spill] sm:$0xff] }
 0x398   : > { %v2283_v48 = vpop.f32.mrf.mxu0 }
 0x399   : > { %v2325_v61 = vadd.f32 %v2283_v48, %v2165_v35  ;;  %v1682_v48 = vadd.f32 %v7287_v54, %v7286_v17  ;;  %v1678_v35 = vadd.f32 %v7297_v15, %v7296_v2  ;;  %v7307_v54 = vld [vmem:[#allocation49_spill] sm:$0xff]  ;;  %v7315_v2 = vld [vmem:[#allocation62_spill] sm:$0xff]  ;;  %v7316_v15 = vld [vmem:[#allocation55_spill] sm:$0xff] }
 0x39b   : > { %v1842_v57 = vadd.f32 %v5930_v21, %v1682_v48  ;;  %v7291_v21 = vld [vmem:[#allocation22_spill] sm:$0xff] }
 0x39c   : > { %v1680_v6 = vadd.f32 %v7291_v21, %v7290_v36  ;;  %v7312_v36 = vld [vmem:[#allocation50_spill] sm:$0xff] }
 0x3a0   : > { %v2286_v52 = vpop.f32.mrf.mxu0 }
 0x3a1   : > { %v2326_v31 = vadd.f32 %v2286_v52, %v2166_v7  ;;  %v2324_v52 = vadd.f32 %v6078_v32, %v2164_v30  ;;  %v2361_v32 = vadd.f32 %v5904_v19, %v2325_v61  ;;  %v7293_v7 = vld [vmem:[#allocation43_spill] sm:$0xff]  ;;  %v1838_v30 = vadd.f32 %v7302_v45, %v1678_v35  ;;  %v7303_v61 = vld [vmem:[#allocation56_spill] sm:$0xff]  ;;  %v7317_v35 = vld [vmem:[#allocation61_spill] sm:$0xff] }
 0x3a2   : > { %v1679_v18 = vadd.f32 %v7293_v7, %v7292_v23  ;;  %v4036_v45 = vld [vmem:[%s6951_s3 + $0xa0] sm:$0xff] }
 0x3a3   : > { %v2360_v40 = vadd.f32 %v5904_v19, %v2324_v52  ;;  %v6204_v52 = vmax.f32 %v2358_v44, 0.0  ;;  %v2000_v29 = vadd.f32 %v7309_v38, %v1838_v30  ;;  %v4033_v44 = vld [vmem:[%s6951_s3 + $0x88] sm:$0xff]  ;;  %v2409_v38 = vld [vmem:[%s6951_s3 + $0x58] sm:$0xff] }
 0x3a4   : > { %v4037_v30 = vld [vmem:[%s6951_s3 + $0xa8] sm:$0xff] }
 0x3a5   : > { %v2154_v21 = vadd.f32 %v7312_v36, %v2000_v29  ;;  %v4049_v29 = vld [vmem:[%s6951_s3 + $0x108] sm:$0xff]  ;;  %v4055_v36 = vld [vmem:[%s6951_s3 + $0x138] sm:$0xff] }
 0x3a8   : > { %v2289_v60 = vpop.f32.mrf.mxu0 }
 0x3a9   : > { %v2327_v58 = vadd.f32 %v2289_v60, %v2167_v25  ;;  %v1684_v25 = vadd.f32 %v7283_v51, %v7282_v20  ;;  %v7301_v20 = vld [vmem:[#allocation36_spill] sm:$0xff] }
 0x3ab   : > { %v2363_v3 = vadd.f32 %v5904_v19, %v2327_v58  ;;  %v1844_v22 = vadd.f32 %v6017_v62, %v1684_v25  ;;  %v7294_v58 = vld [vmem:[#allocation46_spill] sm:$0xff] }
 0x3ad   : > { %v6143_v41 = vmax.f32 %v2363_v3, 0.0 }
 0x3b0   : > { %v2292_v5 = vpop.f32.mrf.mxu0 }
 0x3b1   : > { %v2328_v53 = vadd.f32 %v2292_v5, %v2168_v4 }
 0x3b3   : > { %v2364_v5 = vadd.f32 %v5904_v19, %v2328_v53  ;;  %v1683_v53 = vadd.f32 %v7285_v46, %v7284_v1  ;;  %v7304_v1 = vld [vmem:[#allocation52_spill] sm:$0xff] }
 0x3b5   : > { %v6132_v60 = vmax.f32 %v2364_v5, 0.0  ;;  %v1843_v28 = vadd.f32 %v5974_v10, %v1683_v53  ;;  %v2412_v10 = vld [vmem:[%s6951_s3 + $0x70] sm:$0xff]  ;;  %v7299_v5 = vld [vmem:[#allocation59_spill] sm:$0xff] }
 0x3b6   : > { %2451 = vmatmul.f32.gmra.mxu1 %v2412_v10  ;;  %v7305_v53 = vld [vmem:[#allocation16_spill] sm:$0xff]  ;;  %v7311_v10 = vld [vmem:[#allocation66_spill] sm:$0xff] }
 0x3b7   : > { %v2005_v49 = vadd.f32 %v5990_v14, %v1843_v28  ;;  %v1840_v14 = vadd.f32 %v7294_v58, %v1680_v6  ;;  %v7308_v28 = vld [vmem:[#allocation54_spill] sm:$0xff] }
 0x3b8   : > { %v2295_v50 = vpop.f32.mrf.mxu0  ;;  %v7313_v6 = vld [vmem:[#allocation70_spill] sm:$0xff] }
 0x3b9   : > { %v2329_v11 = vadd.f32 %v2295_v50, %v2169_v34  ;;  %v1845_v34 = vadd.f32 %v6045_v56, %v1685_v43  ;;  %v2362_v56 = vadd.f32 %v5904_v19, %v2326_v31  ;;  %v6169_v50 = vmax.f32 %v2361_v32, 0.0  ;;  %v7298_v31 = vld [vmem:[#allocation41_spill] sm:$0xff] }
 0x3ba   : > { %v6182_v43 = vmax.f32 %v2360_v40, 0.0  ;;  %v2002_v3 = vadd.f32 %v7303_v61, %v1840_v14  ;;  %v7323_v61 = vld [vmem:[#allocation68_spill] sm:$0xff] }
 0x3bb   : > { %v2365_v12 = vadd.f32 %v5904_v19, %v2329_v11  ;;  %v2007_v62 = vadd.f32 %v6049_v59, %v1845_v34  ;;  %v2006_v59 = vadd.f32 %v6029_v47, %v1844_v22  ;;  %v6157_v4 = vmax.f32 %v2362_v56, 0.0  ;;  %v7306_v56 = vld [vmem:[#allocation60_spill] sm:$0xff] }
 0x3bc   : > { %v2004_v11 = vadd.f32 %v5947_v8, %v1842_v57  ;;  %v1839_v8 = vadd.f32 %v7298_v31, %v1679_v18  ;;  %v6194_v34 = vmax.f32 %v2359_v39, 0.0  ;;  %v2156_v48 = vadd.f32 %v7307_v54, %v2002_v3  ;;  %v2401_v31 = vld [vmem:[%s6951_s3 + $0x18] sm:$0xff]  ;;  %v7324_v3 = vld [vmem:[#allocation67_spill] sm:$0xff] }
 0x3bd   : > { %v6124_v42 = vmax.f32 %v2365_v12, 0.0  ;;  %v2161_v33 = vadd.f32 %v6051_v16, %v2007_v62  ;;  %v2160_v47 = vadd.f32 %v6037_v27, %v2006_v59  ;;  %v2159_v27 = vadd.f32 %v5999_v55, %v2005_v49  ;;  %v7300_v55 = vld [vmem:[#allocation24_spill] sm:$0xff]  ;;  %v7329_v54 = vld [vmem:[#allocation37_spill] sm:$0xff] }
 0x3be   : > { %v2003_v12 = vadd.f32 %v7299_v5, %v1841_v37  ;;  %v2001_v17 = vadd.f32 %v7306_v56, %v1839_v8  ;;  %v2316_v59 = vadd.f32 %v7311_v10, %v2156_v48  ;;  %v7318_v8 = vld [vmem:[#allocation63_spill] sm:$0xff]  ;;  %v4034_v5 = vld [vmem:[%s6951_s3 + $0x90] sm:$0xff] }
 0x3bf   : > { %2455 = vmatpush.msra.mxu2 %v6124_v42  ;;  %2554 = vmatpush.msra.mxu1 %v6124_v42  ;;  %v2321_v16 = vadd.f32 %v6065_v0, %v2161_v33  ;;  %v2320_v0 = vadd.f32 %v6055_v24, %v2160_v47  ;;  %v2158_v24 = vadd.f32 %v7300_v55, %v2004_v11  ;;  %v7319_v55 = vld [vmem:[#allocation65_spill] sm:$0xff]  ;;  %v7327_v56 = vld [vmem:[#allocation47_spill] sm:$0xff] }
 0x3c0   : > { %2661 = vmatpush.msra.mxu3 %v6124_v42  ;;  %v2319_v51 = vadd.f32 %v7301_v20, %v2159_v27  ;;  %v2157_v46 = vadd.f32 %v7304_v1, %v2003_v12  ;;  %v2155_v57 = vadd.f32 %v7310_v63, %v2001_v17  ;;  %v2352_v23 = vadd.f32 %v5904_v19, %v2316_v59  ;;  %v4035_v12 = vld [vmem:[%s6951_s3 + $0x98] sm:$0xff]  ;;  %v7321_v20 = vld [vmem:[#allocation72_spill] sm:$0xff]  ;;  %v4052_v10 = vld [vmem:[%s6951_s3 + $0x120] sm:$0xff] }
 0x3c1   : > { %2456 = vmatpush.msra.mxu2 %v6132_v60  ;;  %2555 = vmatpush.msra.mxu1 %v6132_v60  ;;  %v2357_v25 = vadd.f32 %v5904_v19, %v2321_v16  ;;  %v2318_v22 = vadd.f32 %v7305_v53, %v2158_v24  ;;  %v2356_v9 = vadd.f32 %v5904_v19, %v2320_v0  ;;  %v7314_v16 = vld [vmem:[#allocation58_spill] sm:$0xff]  ;;  %v7320_v24 = vld [vmem:[#allocation71_spill] sm:$0xff]  ;;  %v7325_v1 = vld [vmem:[#allocation64_spill] sm:$0xff] }
 0x3c2   : > { %2662 = vmatpush.msra.mxu3 %v6132_v60  ;;  %v2317_v62 = vadd.f32 %v7308_v28, %v2157_v46  ;;  %v2355_v13 = vadd.f32 %v5904_v19, %v2319_v51  ;;  %v2315_v37 = vadd.f32 %v7313_v6, %v2155_v57  ;;  %v2314_v39 = vadd.f32 %v7314_v16, %v2154_v21  ;;  %v2403_v51 = vld [vmem:[%s6951_s3 + $0x28] sm:$0xff]  ;;  %v2405_v46 = vld [vmem:[%s6951_s3 + $0x38] sm:$0xff]  ;;  %v4050_v63 = vld [vmem:[%s6951_s3 + $0x110] sm:$0xff] }
 0x3c3   : > { %2457 = vmatpush.msra.mxu2 %v6143_v41  ;;  %2556 = vmatpush.msra.mxu1 %v6143_v41  ;;  %v6213_v32 = vmax.f32 %v2357_v25, 0.0  ;;  %v2354_v33 = vadd.f32 %v5904_v19, %v2318_v22  ;;  %v6222_v40 = vmax.f32 %v2356_v9, 0.0  ;;  %v6249_v11 = vmax.f32 %v2352_v23, 0.0  ;;  %v7322_v25 = vld [vmem:[#allocation69_spill] sm:$0xff]  ;;  %v7326_v53 = vld [vmem:[#allocation18_spill] sm:$0xff]  ;;  %v2407_v48 = vld [vmem:[%s6951_s3 + $0x48] sm:$0xff] }
 0x3c4   : > { %2663 = vmatpush.msra.mxu3 %v6143_v41  ;;  %v2353_v49 = vadd.f32 %v5904_v19, %v2317_v62  ;;  %v6230_v47 = vmax.f32 %v2355_v13, 0.0  ;;  %v2351_v18 = vadd.f32 %v5904_v19, %v2315_v37  ;;  %v2350_v14 = vadd.f32 %v5904_v19, %v2314_v39  ;;  %v2399_v19 = vld [vmem:[%s6951_s3 + $0x8] sm:$0xff]  ;;  %v4038_v22 = vld [vmem:[%s6951_s3 + $0xb0] sm:$0xff]  ;;  %v4039_v9 = vld [vmem:[%s6951_s3 + $0xb8] sm:$0xff] }
 0x3c5   : > { %2458 = vmatpush.msra.mxu2 %v6157_v4  ;;  %2557 = vmatpush.msra.mxu1 %v6157_v4  ;;  %v6237_v7 = vmax.f32 %v2354_v33, 0.0  ;;  %v7328_v17 = vld [vmem:[#allocation34_spill] sm:$0xff]  ;;  %v7330_v28 = vld [vmem:[#allocation33_spill] sm:$0xff]  ;;  %v4041_v13 = vld [vmem:[%s6951_s3 + $0xc8] sm:$0xff] }
 0x3c6   : > { %2664 = vmatpush.msra.mxu3 %v6157_v4  ;;  %v6243_v58 = vmax.f32 %v2353_v49, 0.0  ;;  %v6254_v27 = vmax.f32 %v2351_v18, 0.0  ;;  %v6259_v0 = vmax.f32 %v2350_v14, 0.0  ;;  %v4040_v62 = vld [vmem:[%s6951_s3 + $0xc0] sm:$0xff]  ;;  %v4051_v57 = vld [vmem:[%s6951_s3 + $0x118] sm:$0xff]  ;;  %v4053_v59 = vld [vmem:[%s6951_s3 + $0x128] sm:$0xff] }
 0x3c7   : > { %2459 = vmatpush.msra.mxu2 %v6169_v50  ;;  %2558 = vmatpush.msra.mxu1 %v6169_v50  ;;  %v4054_v33 = vld [vmem:[%s6951_s3 + $0x130] sm:$0xff]  ;;  %v4056_v21 = vld [vmem:[%s6951_s3 + $0x140] sm:$0xff]  ;;  %v4057_v6 = vld [vmem:[%s6951_s3 + $0x148] sm:$0xff] }
 0x3c8   : > { %2665 = vmatpush.msra.mxu3 %v6169_v50  ;;  %v4064_v49 = vld [vmem:[%s6951_s3 + $0x180] sm:$0xff]  ;;  %v4059_v16 = vld [vmem:[%s6951_s3 + $0x158] sm:$0xff]  ;;  %v4066_v23 = vld [vmem:[%s6951_s3 + $0x190] sm:$0xff] }
 0x3c9   : > { %2460 = vmatpush.msra.mxu2 %v6182_v43  ;;  %2559 = vmatpush.msra.mxu1 %v6182_v43  ;;  %v4061_v18 = vld [vmem:[%s6951_s3 + $0x168] sm:$0xff] }
 0x3ca   : > { %2666 = vmatpush.msra.mxu3 %v6182_v43 }
 0x3cb   : > { %2461 = vmatpush.msra.mxu2 %v6194_v34  ;;  %2560 = vmatpush.msra.mxu1 %v6194_v34 }
 0x3cc   : > { %2667 = vmatpush.msra.mxu3 %v6194_v34 }
 0x3cd   : > { %2462 = vmatpush.msra.mxu2 %v6204_v52  ;;  %2561 = vmatpush.msra.mxu1 %v6204_v52 }
 0x3ce   : > { %2668 = vmatpush.msra.mxu3 %v6204_v52 }
 0x3cf   : > { %2463 = vmatpush.msra.mxu2 %v6213_v32  ;;  %2562 = vmatpush.msra.mxu1 %v6213_v32 }
 0x3d0   : > { %2669 = vmatpush.msra.mxu3 %v6213_v32 }
 0x3d1   : > { %2464 = vmatpush.msra.mxu2 %v6222_v40  ;;  %2563 = vmatpush.msra.mxu1 %v6222_v40 }
 0x3d2   : > { %2670 = vmatpush.msra.mxu3 %v6222_v40 }
 0x3d3   : > { %2465 = vmatpush.msra.mxu2 %v6230_v47  ;;  %2564 = vmatpush.msra.mxu1 %v6230_v47 }
 0x3d4   : > { %2671 = vmatpush.msra.mxu3 %v6230_v47 }
 0x3d5   : > { %2466 = vmatpush.msra.mxu2 %v6237_v7  ;;  %2565 = vmatpush.msra.mxu1 %v6237_v7 }
 0x3d6   : > { %2672 = vmatpush.msra.mxu3 %v6237_v7 }
 0x3d7   : > { %2467 = vmatpush.msra.mxu2 %v6243_v58  ;;  %2566 = vmatpush.msra.mxu1 %v6243_v58 }
 0x3d8   : > { %2673 = vmatpush.msra.mxu3 %v6243_v58 }
 0x3d9   : > { %2468 = vmatpush.msra.mxu2 %v6249_v11  ;;  %2567 = vmatpush.msra.mxu1 %v6249_v11 }
 0x3da   : > { %2674 = vmatpush.msra.mxu3 %v6249_v11 }
 0x3db   : > { %2469 = vmatpush.msra.mxu2 %v6254_v27  ;;  %2568 = vmatpush.msra.mxu1 %v6254_v27 }
 0x3dc   : > { %2675 = vmatpush.msra.mxu3 %v6254_v27 }
 0x3dd   : > { %2470 = vmatpush.msra.mxu2 %v6259_v0  ;;  %2569 = vmatpush.msra.mxu1 %v6259_v0 }
 0x3de   : > { %2676 = vmatpush.msra.mxu3 %v6259_v0  ;;  %2471 = vmatmul.f32.vlgmr.msra.gmra.mxu2 %v2399_v19  ;;  %v4065_v19 = vld [vmem:[%s6951_s3 + $0x188] sm:$0xff] }
 0x3df   : > { %2620 = vmatpush.msrb.mxu2 %v7315_v2  ;;  %2727 = vmatpush.msrb.mxu1 %v7315_v2  ;;  %v4072_v2 = vld [vmem:[%s6951_s3 + $0x1c0] sm:$0xff] }
 0x3e0   : > { %2570 = vmatmul.f32.vlgmr.msra.gmra.mxu1 %v4033_v44  ;;  %2532 = vmatmul.f32.gmra.mxu3 %v4034_v5  ;;  %v4069_v5 = vld [vmem:[%s6951_s3 + $0x1a8] sm:$0xff] }
 0x3e1   : > { %2621 = vmatpush.msrb.mxu2 %v7316_v15  ;;  %2728 = vmatpush.msrb.mxu1 %v7316_v15  ;;  %v4067_v15 = vld [vmem:[%s6951_s3 + $0x198] sm:$0xff] }
 0x3e3   : > { %2622 = vmatpush.msrb.mxu2 %v7317_v35  ;;  %2729 = vmatpush.msrb.mxu1 %v7317_v35 }
 0x3e5   : > { %2623 = vmatpush.msrb.mxu2 %v7318_v8  ;;  %2730 = vmatpush.msrb.mxu1 %v7318_v8  ;;  %v4074_v8 = vld [vmem:[%s6951_s3 + $0x1d0] sm:$0xff] }
 0x3e6   : > { %2474 = vmatmul.f32.gmra.mxu2 %v2401_v31 }
 0x3e7   : > { %2624 = vmatpush.msrb.mxu2 %v7319_v55  ;;  %2731 = vmatpush.msrb.mxu1 %v7319_v55 }
 0x3e8   : > { %2573 = vmatmul.f32.gmra.mxu1 %v4035_v12  ;;  %2535 = vmatmul.f32.gmra.mxu3 %v4036_v45  ;;  %v4078_v45 = vld [vmem:[%s6951_s3 + $0x1f0] sm:$0xff] }
 0x3e9   : > { %2625 = vmatpush.msrb.mxu2 %v7320_v24  ;;  %2732 = vmatpush.msrb.mxu1 %v7320_v24  ;;  %v4076_v24 = vld [vmem:[%s6951_s3 + $0x1e0] sm:$0xff] }
 0x3eb   : > { %2626 = vmatpush.msrb.mxu2 %v7321_v20  ;;  %2733 = vmatpush.msrb.mxu1 %v7321_v20  ;;  %v4071_v20 = vld [vmem:[%s6951_s3 + $0x1b8] sm:$0xff] }
 0x3ed   : > { %2627 = vmatpush.msrb.mxu2 %v7322_v25  ;;  %2734 = vmatpush.msrb.mxu1 %v7322_v25 }
 0x3ee   : > { %2477 = vmatmul.f32.gmra.mxu2 %v2403_v51 }
 0x3ef   : > { %2628 = vmatpush.msrb.mxu2 %v7323_v61  ;;  %2735 = vmatpush.msrb.mxu1 %v7323_v61 }
 0x3f0   : > { %2576 = vmatmul.f32.gmra.mxu1 %v4037_v30  ;;  %2538 = vmatmul.f32.gmra.mxu3 %v4038_v22  ;;  %v4073_v30 = vld [vmem:[%s6951_s3 + $0x1c8] sm:$0xff] }
 0x3f1   : > { %2629 = vmatpush.msrb.mxu2 %v7324_v3  ;;  %2736 = vmatpush.msrb.mxu1 %v7324_v3 }
 0x3f3   : > { %2630 = vmatpush.msrb.mxu2 %v7325_v1  ;;  %2737 = vmatpush.msrb.mxu1 %v7325_v1  ;;  %v4075_v1 = vld [vmem:[%s6951_s3 + $0x1d8] sm:$0xff] }
 0x3f5   : > { %2631 = vmatpush.msrb.mxu2 %v7326_v53  ;;  %2738 = vmatpush.msrb.mxu1 %v7326_v53 }
 0x3f6   : > { %2480 = vmatmul.f32.gmra.mxu2 %v2405_v46 }
 0x3f7   : > { %2632 = vmatpush.msrb.mxu2 %v7327_v56  ;;  %2739 = vmatpush.msrb.mxu1 %v7327_v56 }
 0x3f8   : > { %2579 = vmatmul.f32.gmra.mxu1 %v4039_v9  ;;  %2541 = vmatmul.f32.gmra.mxu3 %v4040_v62  ;;  %v4077_v9 = vld [vmem:[%s6951_s3 + $0x1e8] sm:$0xff] }
 0x3f9   : > { %2633 = vmatpush.msrb.mxu2 %v7328_v17  ;;  %2740 = vmatpush.msrb.mxu1 %v7328_v17 }
 0x3fb   : > { %2634 = vmatpush.msrb.mxu2 %v7329_v54  ;;  %2741 = vmatpush.msrb.mxu1 %v7329_v54 }
 0x3fd   : > { %2635 = vmatpush.msrb.mxu2 %v7330_v28  ;;  %2742 = vmatpush.msrb.mxu1 %v7330_v28 }
 0x3fe   : > { %2483 = vmatmul.f32.gmra.mxu2 %v2407_v48  ;;  %v4079_v48 = vld [vmem:[%s6951_s3 + $0x1f8] sm:$0xff] }
 0x3ff   : > { %2768 = vmatpush.msra.mxu2 %v6124_v42  ;;  %v4042_v42 = vld [vmem:[%s6951_s3 + $0xd0] sm:$0xff] }
 0x400   : > { %2582 = vmatmul.f32.gmra.mxu1 %v4041_v13  ;;  %2544 = vmatmul.f32.gmra.mxu3 %v4042_v42 }
 0x401   : > { %2769 = vmatpush.msra.mxu2 %v6132_v60  ;;  %v4043_v60 = vld [vmem:[%s6951_s3 + $0xd8] sm:$0xff] }
 0x403   : > { %2770 = vmatpush.msra.mxu2 %v6143_v41  ;;  %v2411_v41 = vld [vmem:[%s6951_s3 + $0x68] sm:$0xff] }
 0x405   : > { %2771 = vmatpush.msra.mxu2 %v6157_v4  ;;  %v4044_v4 = vld [vmem:[%s6951_s3 + $0xe0] sm:$0xff] }
 0x406   : > { %2486 = vmatmul.f32.gmra.mxu2 %v2409_v38 }
 0x407   : > { %2772 = vmatpush.msra.mxu2 %v6169_v50  ;;  %v4045_v50 = vld [vmem:[%s6951_s3 + $0xe8] sm:$0xff] }
 0x408   : > { %2585 = vmatmul.f32.gmra.mxu1 %v4043_v60  ;;  %2547 = vmatmul.f32.gmra.mxu3 %v4044_v4 }
 0x409   : > { %2773 = vmatpush.msra.mxu2 %v6182_v43  ;;  %v2413_v43 = vld [vmem:[%s6951_s3 + $0x78] sm:$0xff] }
 0x40b   : > { %2774 = vmatpush.msra.mxu2 %v6194_v34  ;;  %v4046_v34 = vld [vmem:[%s6951_s3 + $0xf0] sm:$0xff] }
 0x40d   : > { %2775 = vmatpush.msra.mxu2 %v6204_v52  ;;  %v4047_v52 = vld [vmem:[%s6951_s3 + $0xf8] sm:$0xff] }
 0x40e   : > { %2489 = vmatmul.f32.gmra.mxu2 %v2411_v41 }
 0x40f   : > { %2776 = vmatpush.msra.mxu2 %v6213_v32  ;;  %v4048_v32 = vld [vmem:[%s6951_s3 + $0x100] sm:$0xff]  ;;  %v6498_v61 = vpop.f32.mrf.mxu3 }
 0x410   : > { %2588 = vmatmul.f32.gmra.mxu1 %v4045_v50  ;;  %2550 = vmatmul.f32.gmra.mxu3 %v4046_v34 }
 0x411   : > { %2777 = vmatpush.msra.mxu2 %v6222_v40  ;;  %v6408_v40 = vpop.f32.mrf.mxu1 }
 0x413   : > { %2778 = vmatpush.msra.mxu2 %v6230_v47  ;;  %v4058_v47 = vld [vmem:[%s6951_s3 + $0x150] sm:$0xff] }
 0x415   : > { %2779 = vmatpush.msra.mxu2 %v6237_v7  ;;  %v4060_v7 = vld [vmem:[%s6951_s3 + $0x160] sm:$0xff] }
 0x416   : > { %2492 = vmatmul.f32.gmra.mxu2 %v2413_v43 }
 0x417   : > { %2780 = vmatpush.msra.mxu2 %v6243_v58  ;;  %v4068_v58 = vld [vmem:[%s6951_s3 + $0x1a0] sm:$0xff] }
 0x418   : > { %2591 = vmatmul.f32.gmra.mxu1 %v4047_v52  ;;  %2677 = vmatmul.f32.vlgmr.msra.gmra.mxu3 %v4049_v29 }
 0x419   : > { %2781 = vmatpush.msra.mxu2 %v6249_v11  ;;  %v6419_v37 = vpop.f32.mrf.mxu1  ;;  %v4062_v11 = vld [vmem:[%s6951_s3 + $0x170] sm:$0xff] }
 0x41b   : > { %2782 = vmatpush.msra.mxu2 %v6254_v27  ;;  %v4063_v27 = vld [vmem:[%s6951_s3 + $0x178] sm:$0xff] }
 0x41d   : > { %2783 = vmatpush.msra.mxu2 %v6259_v0  ;;  %v4070_v0 = vld [vmem:[%s6951_s3 + $0x1b0] sm:$0xff] }
 0x41e   : > { %2636 = vmatmul.f32.vlgmr.msrb.gmra.mxu2 %v4048_v32 }
 0x420   : > { %2680 = vmatmul.f32.gmra.mxu3 %v4051_v57  ;;  %2743 = vmatmul.f32.vlgmr.msrb.gmra.mxu1 %v4064_v49 }
 0x421   : > { %v6430_v39 = vpop.f32.mrf.mxu1 }
 0x426   : > { %2639 = vmatmul.f32.gmra.mxu2 %v4050_v63 }
 0x428   : > { %2683 = vmatmul.f32.gmra.mxu3 %v4053_v59  ;;  %2746 = vmatmul.f32.gmra.mxu1 %v4066_v23  ;;  %v4080_v59 = vld [vmem:[%s6952_s4 + $0x8] sm:$0xff] }
 0x429   : > { %v6444_v14 = vpop.f32.mrf.mxu1  ;;  %2961 = vmatpush.msrb.mxu3 %v4080_v59 }
 0x42e   : > { %2642 = vmatmul.f32.gmra.mxu2 %v4052_v10  ;;  %v7331_v10 = vmov 0.0  }
 0x42f   : > { %2822 = vst.msk [vmem:[#allocation3 + $0x20] sm:$0xff] %vm2817_vm4, %v7331_v10 }
 0x430   : > { %2686 = vmatmul.f32.gmra.mxu3 %v4055_v36  ;;  %2749 = vmatmul.f32.gmra.mxu1 %v4068_v58  ;;  %2818 = vst.msk [vmem:[#allocation3] sm:$0xff] %vm2817_vm4, %v7331_v10 }
 0x431   : > { %v6458_v26 = vpop.f32.mrf.mxu1  ;;  %2819 = vst.msk [vmem:[#allocation3 + $0x8] sm:$0xff] %vm2817_vm4, %v7331_v10 }
 0x432   : > { %2820 = vst.msk [vmem:[#allocation3 + $0x10] sm:$0xff] %vm2817_vm4, %v7331_v10 }
 0x433   : > { %2821 = vst.msk [vmem:[#allocation3 + $0x18] sm:$0xff] %vm2817_vm4, %v7331_v10 }
 0x434   : > { %2823 = vst.msk [vmem:[#allocation3 + $0x28] sm:$0xff] %vm2817_vm4, %v7331_v10 }
 0x435   : > { %2824 = vst.msk [vmem:[#allocation3 + $0x30] sm:$0xff] %vm2817_vm4, %v7331_v10 }
 0x436   : > { %2645 = vmatmul.f32.gmra.mxu2 %v4054_v33  ;;  %v2927_v33 = vld [vmem:[%s6952_s4] sm:$0xff]  ;;  %2825 = vst.msk [vmem:[#allocation3 + $0x38] sm:$0xff] %vm2817_vm4, %v7331_v10 }
 0x437   : > { %3018 = vmatpush.msra.mxu1 %v2927_v33  ;;  %2826 = vst.msk [vmem:[#allocation3 + $0x40] sm:$0xff] %vm2817_vm4, %v7331_v10 }
 0x438   : > { %2689 = vmatmul.f32.gmra.mxu3 %v4057_v6  ;;  %2752 = vmatmul.f32.gmra.mxu1 %v4070_v0  ;;  %v2857_v6 = vld [vmem:[#allocation3] sm:$0xff]  ;;  %2827 = vst.msk [vmem:[#allocation3 + $0x48] sm:$0xff] %vm2817_vm4, %v7331_v10  ;;  %v2858_v49 = vld [vmem:[#allocation3 + $0x8] sm:$0xff] }
 0x439   : > { %v6468_v35 = vpop.f32.mrf.mxu1  ;;  %2828 = vst.msk [vmem:[#allocation3 + $0x50] sm:$0xff] %vm2817_vm4, %v7331_v10  ;;  %v2859_v58 = vld [vmem:[#allocation3 + $0x10] sm:$0xff] }
 0x43a   : > { %2829 = vst.msk [vmem:[#allocation3 + $0x58] sm:$0xff] %vm2817_vm4, %v7331_v10 }
 0x43b   : > { %2830 = vst.msk [vmem:[#allocation3 + $0x60] sm:$0xff] %vm2817_vm4, %v7331_v10 }
 0x43c   : > { %2831 = vst.msk [vmem:[#allocation3 + $0x68] sm:$0xff] %vm2817_vm4, %v7331_v10 }
 0x43d   : > { %2832 = vst.msk [vmem:[#allocation3 + $0x70] sm:$0xff] %vm2817_vm4, %v7331_v10 }
 0x43e   : > { %2648 = vmatmul.f32.gmra.mxu2 %v4056_v21  ;;  %2833 = vst.msk [vmem:[#allocation3 + $0x78] sm:$0xff] %vm2817_vm4, %v7331_v10 }
 0x43f   : > { %2834 = vst.msk [vmem:[#allocation3 + $0x80] sm:$0xff] %vm2817_vm4, %v7331_v10 }
 0x440   : > { %2692 = vmatmul.f32.gmra.mxu3 %v4059_v16  ;;  %2755 = vmatmul.f32.gmra.mxu1 %v4072_v2  ;;  %v4097_v16 = vld [vmem:[%s6952_s4 + $0x10] sm:$0xff]  ;;  %2835 = vst.msk [vmem:[#allocation3 + $0x88] sm:$0xff] %vm2817_vm4, %v7331_v10 }
 0x441   : > { %v6478_v12 = vpop.f32.mrf.mxu1  ;;  %3109 = vmatpush.msrb.mxu2 %v4097_v16  ;;  %2836 = vst.msk [vmem:[#allocation3 + $0x90] sm:$0xff] %vm2817_vm4, %v7331_v10 }
 0x442   : > { %2837 = vst.msk [vmem:[#allocation3 + $0x98] sm:$0xff] %vm2817_vm4, %v7331_v10 }
 0x443   : > { %2838 = vst.msk [vmem:[#allocation3 + $0xa0] sm:$0xff] %vm2817_vm4, %v7331_v10 }
 0x444   : > { %2839 = vst.msk [vmem:[#allocation3 + $0xa8] sm:$0xff] %vm2817_vm4, %v7331_v10 }
 0x445   : > { %2840 = vst.msk [vmem:[#allocation3 + $0xb0] sm:$0xff] %vm2817_vm4, %v7331_v10 }
 0x446   : > { %2651 = vmatmul.f32.gmra.mxu2 %v4058_v47  ;;  %v2903_v47 = vrot.slane %v2857_v6, 7  ;;  %2841 = vst.msk [vmem:[#allocation3 + $0xb8] sm:$0xff] %vm2817_vm4, %v7331_v10 }
 0x447   : > { %2842 = vst.msk [vmem:[#allocation3 + $0xc0] sm:$0xff] %vm2817_vm4, %v7331_v10 }
 0x448   : > { %2695 = vmatmul.f32.gmra.mxu3 %v4061_v18  ;;  %2758 = vmatmul.f32.gmra.mxu1 %v4074_v8  ;;  %v3052_v18 = vrot.slane %v2858_v49, 1  ;;  %2843 = vst.msk [vmem:[#allocation3 + $0xc8] sm:$0xff] %vm2817_vm4, %v7331_v10 }
 0x449   : > { %v6490_v25 = vpop.f32.mrf.mxu1  ;;  %2844 = vst.msk [vmem:[#allocation3 + $0xd0] sm:$0xff] %vm2817_vm4, %v7331_v10 }
 0x44a   : > { %2845 = vst.msk [vmem:[#allocation3 + $0xd8] sm:$0xff] %vm2817_vm4, %v7331_v10 }
 0x44b   : > { %2846 = vst.msk [vmem:[#allocation3 + $0xe0] sm:$0xff] %vm2817_vm4, %v7331_v10 }
 0x44c   : > { %2847 = vst.msk [vmem:[#allocation3 + $0xe8] sm:$0xff] %vm2817_vm4, %v7331_v10  ;;  %v2862_v10 = vld [vmem:[#allocation3 + $0x28] sm:$0xff] }
 0x44e   : > { %2654 = vmatmul.f32.gmra.mxu2 %v4060_v7  ;;  %v2904_v7 = vrot.slane %v2858_v49, 7 }
 0x450   : > { %2698 = vmatmul.f32.gmra.mxu3 %v4063_v27  ;;  %2761 = vmatmul.f32.gmra.mxu1 %v4076_v24  ;;  %v4115_v27 = vld [vmem:[%s6952_s4 + $0x20] sm:$0xff]  ;;  %v2905_v0 = vsel %vm622_vm3, %v2903_v47, %v2904_v7  ;;  %v2860_v47 = vld [vmem:[#allocation3 + $0x18] sm:$0xff] }
 0x451   : > { %3220 = vmatpush.msrb.mxu0 %v4115_v27 }
 0x456   : > { %2657 = vmatmul.f32.gmra.mxu2 %v4062_v11  ;;  %v3053_v11 = vrot.slane %v2859_v58, 1 }
 0x458   : > { %2764 = vmatmul.f32.gmra.mxu1 %v4078_v45  ;;  %4081 = vmatmul.msk.f32.vlgmr.msrb.gmra.mxu3 %vm2817_vm4, %v2858_v49 }
 0x45d   : > { %v6505_v46 = vpop.f32.mrf.mxu1 }
 0x45e   : > { %2784 = vmatmul.f32.vlgmr.msra.gmra.mxu2 %v4065_v19  ;;  %v3054_v19 = vsel %vm1083_vm2, %v3052_v18, %v3053_v11  ;;  %v2572_v45 = vadd.f32 %v6505_v46, %v6498_v61 }
 0x460   : > { %4089 = vmatmul.msk.f32.vlgmr.msra.gmra.mxu1 %vm2817_vm4, %v2905_v0 }
 0x461   : > { %v6460_v44 = vpop.f32.mrf.mxu2 }
 0x463   : > { %v6507_v53 = vpop.f32.mrf.mxu3 }
 0x465   : > { %v6514_v56 = vpop.f32.mrf.mxu1 }
 0x466   : > { %2787 = vmatmul.f32.gmra.mxu2 %v4067_v15 }
 0x469   : > { %v6470_v31 = vpop.f32.mrf.mxu2 }
 0x46b   : > { %v6518_v54 = vpop.f32.mrf.mxu3 }
 0x46d   : > { %v6523_v28 = vpop.f32.mrf.mxu1 }
 0x46e   : > { %2790 = vmatmul.f32.gmra.mxu2 %v4069_v5 }
 0x471   : > { %v6480_v55 = vpop.f32.mrf.mxu2 }
 0x472   : > { %v2479_v7 = vadd.f32 %v6480_v55, %v6430_v39 }
 0x473   : > { %v6527_v13 = vpop.f32.mrf.mxu3 }
 0x475   : > { %v6531_v42 = vpop.f32.mrf.mxu1 }
 0x476   : > { %2793 = vmatmul.f32.gmra.mxu2 %v4071_v20  ;;  %v2473_v20 = vadd.f32 %v6460_v44, %v6408_v40 }
 0x479   : > { %v6488_v51 = vpop.f32.mrf.mxu2 }
 0x47b   : > { %v6533_v60 = vpop.f32.mrf.mxu3 }
 0x47d   : > { %v6537_v4 = vpop.f32.mrf.mxu1 }
 0x47e   : > { %2796 = vmatmul.f32.gmra.mxu2 %v4073_v30 }
 0x481   : > { %v6500_v3 = vpop.f32.mrf.mxu2 }
 0x483   : > { %v6539_v50 = vpop.f32.mrf.mxu3 }
 0x485   : > { %v6543_v34 = vpop.f32.mrf.mxu1 }
 0x486   : > { %2799 = vmatmul.f32.gmra.mxu2 %v4075_v1  ;;  %v2595_v1 = vmax.f32 %v2473_v20, %v2572_v45  ;;  %v2581_v20 = vadd.f32 %v6531_v42, %v6527_v13 }
 0x489   : > { %v6509_v22 = vpop.f32.mrf.mxu2 }
 0x48b   : > { %v6547_v32 = vpop.f32.mrf.mxu3 }
 0x48d   : > { %v6549_v29 = vpop.f32.mrf.mxu1 }
 0x48e   : > { %2802 = vmatmul.f32.gmra.mxu2 %v4077_v9  ;;  %v2476_v9 = vadd.f32 %v6470_v31, %v6419_v37  ;;  %v2578_v37 = vadd.f32 %v6523_v28, %v6518_v54 }
 0x490   : > { %v2597_v39 = vmax.f32 %v2479_v7, %v2578_v37 }
 0x491   : > { %v6516_v17 = vpop.f32.mrf.mxu2 }
 0x493   : > { %v6553_v57 = vpop.f32.mrf.mxu3 }
 0x495   : > { %v6575_v21 = vpop.f32.mrf.mxu1 }
 0x496   : > { %2805 = vmatmul.f32.gmra.mxu2 %v4079_v48  ;;  %v2575_v48 = vadd.f32 %v6514_v56, %v6507_v53  ;;  %v2906_v53 = vrot.slane %v2860_v47, 7  ;;  %v3056_v56 = vrot.slane %v2862_v10, 1 }
 0x498   : > { %v2596_v6 = vmax.f32 %v2476_v9, %v2575_v48 }
 0x499   : > { %v6525_v62 = vpop.f32.mrf.mxu2 }
 0x49b   : > { %v2678_v23 = vpop.f32.mrf.mxu3 }
 0x49d   : > { %v2744_v15 = vpop.f32.mrf.mxu1 }
 0x49e   : > { %4098 = vmatmul.msk.f32.vlgmr.msrb.gmra.mxu2 %vm2817_vm4, %v3054_v19  ;;  %v2863_v19 = vld [vmem:[#allocation3 + $0x30] sm:$0xff] }
 0x4a1   : > { %v6529_v38 = vpop.f32.mrf.mxu2 }
 0x4a2   : > { %v2679_v30 = vadd.f32 %v2678_v23, %v6529_v38 }
 0x4a3   : > { %v2681_v8 = vpop.f32.mrf.mxu3 }
 0x4a4   : > { %v2702_v61 = vmax.f32 %v2595_v1, %v2679_v30  ;;  %v2909_v30 = vrot.slane %v2863_v19, 7 }
 0x4a5   : > { %v2747_v24 = vpop.f32.mrf.mxu1 }
 0x4a9   : > { %v6535_v41 = vpop.f32.mrf.mxu2 }
 0x4aa   : > { %v2682_v33 = vadd.f32 %v2681_v8, %v6535_v41 }
 0x4ab   : > { %v2684_v44 = vpop.f32.mrf.mxu3 }
 0x4ac   : > { %v2703_v16 = vmax.f32 %v2596_v6, %v2682_v33  ;;  %v2485_v6 = vadd.f32 %v6500_v3, %v6458_v26 }
 0x4ad   : > { %v2750_v59 = vpop.f32.mrf.mxu1 }
 0x4b1   : > { %v6541_v43 = vpop.f32.mrf.mxu2 }
 0x4b2   : > { %v2685_v27 = vadd.f32 %v2684_v44, %v6541_v43  ;;  %v2482_v43 = vadd.f32 %v6488_v51, %v6444_v14 }
 0x4b3   : > { %v2687_v18 = vpop.f32.mrf.mxu3 }
 0x4b4   : > { %v2704_v8 = vmax.f32 %v2597_v39, %v2685_v27  ;;  %v2598_v13 = vmax.f32 %v2482_v43, %v2581_v20  ;;  %v2872_v20 = vld [vmem:[#allocation3 + $0x78] sm:$0xff] }
 0x4b5   : > { %v2753_v0 = vpop.f32.mrf.mxu1 }
 0x4b9   : > { %v6545_v52 = vpop.f32.mrf.mxu2 }
 0x4bb   : > { %v2690_v44 = vpop.f32.mrf.mxu3 }
 0x4bd   : > { %v2756_v48 = vpop.f32.mrf.mxu1 }
 0x4c1   : > { %v6551_v63 = vpop.f32.mrf.mxu2 }
 0x4c2   : > { %v2691_v7 = vadd.f32 %v2690_v44, %v6551_v63  ;;  %v2869_v63 = vld [vmem:[#allocation3 + $0x60] sm:$0xff] }
 0x4c3   : > { %v4151_v44 = vld [vmem:[%s6952_s4 + $0x40] sm:$0xff] }
 0x4c4   : > { %3445 = vmatpush.msra.mxu0 %v4151_v44 }
 0x4c5   : > { %v2759_v27 = vpop.f32.mrf.mxu1 }
 0x4c9   : > { %v6573_v36 = vpop.f32.mrf.mxu2 }
 0x4d1   : > { %v6603_v2 = vpop.f32.mrf.mxu2 }
 0x4d9   : > { %v6622_v5 = vpop.f32.mrf.mxu2 }
 0x4e1   : > { %v2785_v40 = vpop.f32.mrf.mxu2 }
 0x4e2   : > { %v2786_v46 = vadd.f32 %v2785_v40, %v2744_v15  ;;  %v2865_v15 = vld [vmem:[#allocation3 + $0x40] sm:$0xff] }
 0x4e3   : > { %v3059_v1 = vrot.slane %v2865_v15, 1 }
 0x4e4   : > { %v2809_v38 = vmax.f32 %v2702_v61, %v2786_v46  ;;  %v2688_v61 = vadd.f32 %v2687_v18, %v6545_v52  ;;  %v2866_v52 = vld [vmem:[#allocation3 + $0x48] sm:$0xff] }
 0x4e5   : > { %v2912_v10 = vrot.slane %v2866_v52, 7 }
 0x4e6   : > { %2849 = vst.msk [vmem:[#allocation3 + $0x20] sm:$0xff] %vm2817_vm4, %v2809_v38  ;;  %v2868_v38 = vld [vmem:[#allocation3 + $0x58] sm:$0xff] }
 0x4e9   : > { %v2788_v49 = vpop.f32.mrf.mxu2 }
 0x4ea   : > { %v2789_v23 = vadd.f32 %v2788_v49, %v2747_v24  ;;  %v2584_v49 = vadd.f32 %v6537_v4, %v6533_v60  ;;  %v2693_v60 = vpop.f32.mrf.mxu3 }
 0x4ec   : > { %v2810_v31 = vmax.f32 %v2703_v16, %v2789_v23  ;;  %v3062_v16 = vrot.slane %v2868_v38, 1  ;;  %v2599_v4 = vmax.f32 %v2485_v6, %v2584_v49 }
 0x4ed   : > { %v2861_v58 = vld [vmem:[#allocation3 + $0x20] sm:$0xff] }
 0x4ee   : > { %2850 = vst.msk [vmem:[#allocation3 + $0x38] sm:$0xff] %vm2817_vm4, %v2810_v31  ;;  %v2907_v41 = vrot.slane %v2861_v58, 7  ;;  %4082 = vmatmul.msk.f32.gmra.mxu3 %vm2817_vm4, %v2861_v58  ;;  %v3055_v11 = vrot.slane %v2861_v58, 1  ;;  %4116 = vmatmul.msk.f32.vlgmr.msrb.gmra.mxu0 %vm2817_vm4, %v2861_v58  ;;  %v2706_v58 = vmax.f32 %v2599_v4, %v2691_v7  ;;  %v2494_v7 = vadd.f32 %v6525_v62, %v6490_v25 }
 0x4f0   : > { %v6660_v55 = vsel %vm622_vm3, %v2906_v53, %v2907_v41  ;;  %v6663_v54 = vsel %vm1083_vm2, %v3055_v11, %v3056_v56  ;;  %v2871_v53 = vld [vmem:[#allocation3 + $0x70] sm:$0xff]  ;;  %v4106_v56 = vld [vmem:[%s6952_s4 + $0x18] sm:$0xff]  ;;  %v2488_v11 = vadd.f32 %v6509_v22, %v6468_v35 }
 0x4f1   : > { %v2791_v28 = vpop.f32.mrf.mxu2  ;;  %4090 = vmatmul.msk.f32.gmra.mxu1 %vm2817_vm4, %v6660_v55  ;;  %4099 = vmatmul.msk.f32.gmra.mxu2 %vm2817_vm4, %v6663_v54  ;;  %v3065_v19 = vrot.slane %v2871_v53, 1 }
 0x4f2   : > { %v2792_v24 = vadd.f32 %v2791_v28, %v2750_v59  ;;  %v2705_v59 = vmax.f32 %v2598_v13, %v2688_v61  ;;  %3167 = vmatpush.msra.mxu3 %v4106_v56  ;;  %v2915_v28 = vrot.slane %v2869_v63, 7  ;;  %v2590_v13 = vadd.f32 %v6549_v29, %v6547_v32 }
 0x4f4   : > { %v2811_v45 = vmax.f32 %v2704_v8, %v2792_v24  ;;  %v2694_v8 = vadd.f32 %v2693_v60, %v6573_v36  ;;  %v2696_v36 = vpop.f32.mrf.mxu3 }
 0x4f5   : > { %v6673_v40 = vld [vmem:[#allocation3 + $0x38] sm:$0xff] }
 0x4f6   : > { %2851 = vst.msk [vmem:[#allocation3 + $0x50] sm:$0xff] %vm2817_vm4, %v2811_v45  ;;  %4083 = vmatmul.msk.f32.gmra.mxu3 %vm2817_vm4, %v6673_v40  ;;  %4117 = vmatmul.msk.f32.gmra.mxu0 %vm2817_vm4, %v6673_v40  ;;  %v2910_v14 = vrot.slane %v6673_v40, 7  ;;  %v3058_v51 = vrot.slane %v6673_v40, 1 }
 0x4f8   : > { %v6684_v42 = vsel %vm622_vm3, %v2909_v30, %v2910_v14  ;;  %v6687_v46 = vsel %vm1083_vm2, %v3058_v51, %v3059_v1  ;;  %v2874_v30 = vld [vmem:[#allocation3 + $0x88] sm:$0xff]  ;;  %v4133_v1 = vld [vmem:[%s6952_s4 + $0x30] sm:$0xff]  ;;  %v2491_v51 = vadd.f32 %v6516_v17, %v6478_v12 }
 0x4f9   : > { %v2794_v9 = vpop.f32.mrf.mxu2  ;;  %4091 = vmatmul.msk.f32.gmra.mxu1 %vm2817_vm4, %v6684_v42  ;;  %4100 = vmatmul.msk.f32.gmra.mxu2 %vm2817_vm4, %v6687_v46  ;;  %v3068_v52 = vrot.slane %v2874_v30, 1  ;;  %v2884_v30 = vld [vmem:[#allocation3 + $0xd8] sm:$0xff] }
 0x4fa   : > { %v2795_v33 = vadd.f32 %v2794_v9, %v2753_v0  ;;  %v2587_v0 = vadd.f32 %v6543_v34, %v6539_v50  ;;  %v4124_v50 = vld [vmem:[%s6952_s4 + $0x28] sm:$0xff]  ;;  %3335 = vmatpush.msra.mxu2 %v4133_v1  ;;  %v2601_v32 = vmax.f32 %v2491_v51, %v2590_v13  ;;  %v2885_v1 = vld [vmem:[#allocation3 + $0xe0] sm:$0xff]  ;;  %v3313_v51 = vrot.slane %v2884_v30, 7 }
 0x4fb   : > { %3277 = vmatpush.msrb.mxu1 %v4124_v50  ;;  %v3314_v13 = vrot.slane %v2885_v1, 7 }
 0x4fc   : > { %v2812_v47 = vmax.f32 %v2705_v59, %v2795_v33  ;;  %v2600_v34 = vmax.f32 %v2488_v11, %v2587_v0  ;;  %v2762_v59 = vpop.f32.mrf.mxu1  ;;  %v2697_v33 = vadd.f32 %v2696_v36, %v6603_v2  ;;  %v2877_v2 = vld [vmem:[#allocation3 + $0xa0] sm:$0xff]  ;;  %v2878_v11 = vld [vmem:[#allocation3 + $0xa8] sm:$0xff]  ;;  %v2883_v36 = vld [vmem:[#allocation3 + $0xd0] sm:$0xff] }
 0x4fd   : > { %v6697_v23 = vld [vmem:[#allocation3 + $0x50] sm:$0xff] }
 0x4fe   : > { %2852 = vst.msk [vmem:[#allocation3 + $0x68] sm:$0xff] %vm2817_vm4, %v2812_v47  ;;  %4084 = vmatmul.msk.f32.gmra.mxu3 %vm2817_vm4, %v6697_v23  ;;  %4118 = vmatmul.msk.f32.gmra.mxu0 %vm2817_vm4, %v6697_v23  ;;  %v2913_v26 = vrot.slane %v6697_v23, 7  ;;  %v3061_v3 = vrot.slane %v6697_v23, 1  ;;  %v2707_v61 = vmax.f32 %v2600_v34, %v2694_v8  ;;  %v2875_v47 = vld [vmem:[#allocation3 + $0x90] sm:$0xff] }
 0x4ff   : > { %v2921_v4 = vrot.slane %v2875_v47, 7 }
 0x500   : > { %v6708_v18 = vsel %vm622_vm3, %v2912_v10, %v2913_v26  ;;  %v6711_v37 = vsel %vm1083_vm2, %v3061_v3, %v3062_v16  ;;  %v2708_v10 = vmax.f32 %v2601_v32, %v2697_v33  ;;  %v2699_v26 = vpop.f32.mrf.mxu3  ;;  %v2593_v3 = vadd.f32 %v6575_v21, %v6553_v57 }
 0x501   : > { %v2797_v31 = vpop.f32.mrf.mxu2  ;;  %4092 = vmatmul.msk.f32.gmra.mxu1 %vm2817_vm4, %v6708_v18  ;;  %4101 = vmatmul.msk.f32.gmra.mxu2 %vm2817_vm4, %v6711_v37  ;;  %v2700_v53 = vadd.f32 %v2699_v26, %v6622_v5  ;;  %v2886_v26 = vld [vmem:[#allocation3 + $0xe8] sm:$0xff] }
 0x502   : > { %v2798_v41 = vadd.f32 %v2797_v31, %v2756_v48  ;;  %v2918_v48 = vrot.slane %v2872_v20, 7  ;;  %v3071_v31 = vrot.slane %v2877_v2, 1  ;;  %v2602_v21 = vmax.f32 %v2494_v7, %v2593_v3 }
 0x503   : > { %v3423_v3 = vrot.slane %v2885_v1, 1 }
 0x504   : > { %v2813_v39 = vmax.f32 %v2706_v58, %v2798_v41  ;;  %v2765_v57 = vpop.f32.mrf.mxu1  ;;  %v2709_v0 = vmax.f32 %v2602_v21, %v2700_v53 }
 0x505   : > { %v6724_v15 = vld [vmem:[#allocation3 + $0x68] sm:$0xff] }
 0x506   : > { %2853 = vst.msk [vmem:[#allocation3 + $0x80] sm:$0xff] %vm2817_vm4, %v2813_v39  ;;  %4085 = vmatmul.msk.f32.gmra.mxu3 %vm2817_vm4, %v6724_v15  ;;  %4119 = vmatmul.msk.f32.gmra.mxu0 %vm2817_vm4, %v6724_v15  ;;  %v2916_v35 = vrot.slane %v6724_v15, 7  ;;  %v3064_v22 = vrot.slane %v6724_v15, 1 }
 0x508   : > { %v6738_v24 = vsel %vm622_vm3, %v2915_v28, %v2916_v35  ;;  %v6741_v43 = vsel %vm1083_vm2, %v3064_v22, %v3065_v19  ;;  %v2924_v28 = vrot.slane %v2878_v11, 7 }
 0x509   : > { %v2800_v45 = vpop.f32.mrf.mxu2  ;;  %4093 = vmatmul.msk.f32.gmra.mxu1 %vm2817_vm4, %v6738_v24  ;;  %4102 = vmatmul.msk.f32.gmra.mxu2 %vm2817_vm4, %v6741_v43 }
 0x50a   : > { %v2801_v14 = vadd.f32 %v2800_v45, %v2759_v27  ;;  %v2880_v27 = vld [vmem:[#allocation3 + $0xb8] sm:$0xff] }
 0x50b   : > { %v3074_v19 = vrot.slane %v2880_v27, 1 }
 0x50c   : > { %v2814_v9 = vmax.f32 %v2707_v61, %v2801_v14  ;;  %v3256_v14 = vrot.slane %v2883_v36, 1 }
 0x50d   : > { %v6757_v38 = vld [vmem:[#allocation3 + $0x80] sm:$0xff] }
 0x50e   : > { %2854 = vst.msk [vmem:[#allocation3 + $0x98] sm:$0xff] %vm2817_vm4, %v2814_v9  ;;  %4086 = vmatmul.msk.f32.gmra.mxu3 %vm2817_vm4, %v6757_v38  ;;  %4120 = vmatmul.msk.f32.gmra.mxu0 %vm2817_vm4, %v6757_v38  ;;  %v2919_v12 = vrot.slane %v6757_v38, 7  ;;  %v3067_v17 = vrot.slane %v6757_v38, 1 }
 0x510   : > { %v6768_v29 = vsel %vm622_vm3, %v2918_v48, %v2919_v12  ;;  %v6771_v6 = vsel %vm1083_vm2, %v3067_v17, %v3068_v52  ;;  %v3315_v48 = vsel %vm622_vm3, %v3313_v51, %v3314_v13 }
 0x511   : > { %v2803_v49 = vpop.f32.mrf.mxu2  ;;  %4094 = vmatmul.msk.f32.gmra.mxu1 %vm2817_vm4, %v6768_v29  ;;  %4103 = vmatmul.msk.f32.gmra.mxu2 %vm2817_vm4, %v6771_v6 }
 0x512   : > { %v2804_v16 = vadd.f32 %v2803_v49, %v2762_v59 }
 0x514   : > { %v2815_v60 = vmax.f32 %v2708_v10, %v2804_v16 }
 0x515   : > { %v6781_v63 = vld [vmem:[#allocation3 + $0x98] sm:$0xff] }
 0x516   : > { %2855 = vst.msk [vmem:[#allocation3 + $0xb0] sm:$0xff] %vm2817_vm4, %v2815_v60  ;;  %4087 = vmatmul.msk.f32.gmra.mxu3 %vm2817_vm4, %v6781_v63  ;;  %4121 = vmatmul.msk.f32.gmra.mxu0 %vm2817_vm4, %v6781_v63  ;;  %v2922_v25 = vrot.slane %v6781_v63, 7  ;;  %v3070_v62 = vrot.slane %v6781_v63, 1  ;;  %v3424_v60 = vrot.slane %v2886_v26, 1 }
 0x518   : > { %v2923_v56 = vsel %vm622_vm3, %v2921_v4, %v2922_v25  ;;  %v3072_v58 = vsel %vm1083_vm2, %v3070_v62, %v3071_v31  ;;  %v3425_v4 = vsel %vm1083_vm2, %v3423_v3, %v3424_v60 }
 0x519   : > { %v2806_v41 = vpop.f32.mrf.mxu2  ;;  %4095 = vmatmul.msk.f32.gmra.mxu1 %vm2817_vm4, %v2923_v56  ;;  %4104 = vmatmul.msk.f32.gmra.mxu2 %vm2817_vm4, %v3072_v58 }
 0x51a   : > { %v2807_v39 = vadd.f32 %v2806_v41, %v2765_v57 }
 0x51c   : > { %v2816_v5 = vmax.f32 %v2709_v0, %v2807_v39 }
 0x51d   : > { %v6795_v8 = vld [vmem:[#allocation3 + $0xb0] sm:$0xff] }
 0x51e   : > { %2856 = vst.msk [vmem:[#allocation3 + $0xc8] sm:$0xff] %vm2817_vm4, %v2816_v5  ;;  %4088 = vmatmul.msk.f32.gmra.mxu3 %vm2817_vm4, %v6795_v8  ;;  %4122 = vmatmul.msk.f32.gmra.mxu0 %vm2817_vm4, %v6795_v8  ;;  %v2925_v35 = vrot.slane %v6795_v8, 7  ;;  %v3073_v22 = vrot.slane %v6795_v8, 1 }
 0x520   : > { %v2926_v50 = vsel %vm622_vm3, %v2924_v28, %v2925_v35  ;;  %v3075_v34 = vsel %vm1083_vm2, %v3073_v22, %v3074_v19 }
 0x521   : > { %4096 = vmatmul.msk.f32.gmra.mxu1 %vm2817_vm4, %v2926_v50  ;;  %4105 = vmatmul.msk.f32.gmra.mxu2 %vm2817_vm4, %v3075_v34 }
 0x525   : > { %v6808_v20 = vld [vmem:[#allocation3 + $0xc8] sm:$0xff] }
 0x526   : > { %4107 = vmatmul.msk.f32.vlgmr.msra.gmra.mxu3 %vm2817_vm4, %v6660_v55  ;;  %4123 = vmatmul.msk.f32.gmra.mxu0 %vm2817_vm4, %v6808_v20  ;;  %v4142_v55 = vld [vmem:[%s6952_s4 + $0x38] sm:$0xff]  ;;  %v3255_v61 = vrot.slane %v6808_v20, 1 }
 0x527   : > { %3388 = vmatpush.msrb.mxu3 %v4142_v55 }
 0x528   : > { %v3257_v9 = vsel %vm1083_vm2, %v3255_v61, %v3256_v14 }
 0x529   : > { %4125 = vmatmul.msk.f32.vlgmr.msrb.gmra.mxu1 %vm2817_vm4, %v6663_v54  ;;  %4134 = vmatmul.msk.f32.vlgmr.msra.gmra.mxu2 %vm2817_vm4, %v6684_v42  ;;  %v3020_v54 = vpop.f32.mrf.mxu1 }
 0x52e   : > { %4108 = vmatmul.msk.f32.gmra.mxu3 %vm2817_vm4, %v6684_v42  ;;  %4152 = vmatmul.msk.f32.vlgmr.msra.gmra.mxu0 %vm2817_vm4, %v6687_v46  ;;  %v2963_v42 = vpop.f32.mrf.mxu3 }
 0x531   : > { %4126 = vmatmul.msk.f32.gmra.mxu1 %vm2817_vm4, %v6687_v46  ;;  %4135 = vmatmul.msk.f32.gmra.mxu2 %vm2817_vm4, %v6708_v18  ;;  %v2881_v46 = vld [vmem:[#allocation3 + $0xc0] sm:$0xff] }
 0x536   : > { %4109 = vmatmul.msk.f32.gmra.mxu3 %vm2817_vm4, %v6708_v18  ;;  %4153 = vmatmul.msk.f32.gmra.mxu0 %vm2817_vm4, %v6711_v37  ;;  %v3021_v18 = vadd.f32 %v3020_v54, %v2963_v42 }
 0x539   : > { %4127 = vmatmul.msk.f32.gmra.mxu1 %vm2817_vm4, %v6711_v37  ;;  %4136 = vmatmul.msk.f32.gmra.mxu2 %vm2817_vm4, %v6738_v24  ;;  %v3146_v37 = vrot.slane %v6808_v20, 7 }
 0x53e   : > { %4110 = vmatmul.msk.f32.gmra.mxu3 %vm2817_vm4, %v6738_v24  ;;  %4154 = vmatmul.msk.f32.gmra.mxu0 %vm2817_vm4, %v6741_v43  ;;  %v3145_v24 = vrot.slane %v2881_v46, 7 }
 0x540   : > { %v3147_v44 = vsel %vm622_vm3, %v3145_v24, %v3146_v37 }
 0x541   : > { %4128 = vmatmul.msk.f32.gmra.mxu1 %vm2817_vm4, %v6741_v43  ;;  %4137 = vmatmul.msk.f32.gmra.mxu2 %vm2817_vm4, %v6768_v29  ;;  %v3111_v43 = vpop.f32.mrf.mxu2 }
 0x542   : > { %v6857_v45 = vadd.f32 %v3111_v43, %v3021_v18 }
 0x546   : > { %4111 = vmatmul.msk.f32.gmra.mxu3 %vm2817_vm4, %v6768_v29  ;;  %4155 = vmatmul.msk.f32.gmra.mxu0 %vm2817_vm4, %v6771_v6 }
 0x549   : > { %4129 = vmatmul.msk.f32.gmra.mxu1 %vm2817_vm4, %v6771_v6  ;;  %4138 = vmatmul.msk.f32.gmra.mxu2 %vm2817_vm4, %v2923_v56 }
 0x54e   : > { %4112 = vmatmul.msk.f32.gmra.mxu3 %vm2817_vm4, %v2923_v56  ;;  %4156 = vmatmul.msk.f32.gmra.mxu0 %vm2817_vm4, %v3072_v58 }
 0x551   : > { %4130 = vmatmul.msk.f32.gmra.mxu1 %vm2817_vm4, %v3072_v58  ;;  %4139 = vmatmul.msk.f32.gmra.mxu2 %vm2817_vm4, %v2926_v50 }
 0x556   : > { %4113 = vmatmul.msk.f32.gmra.mxu3 %vm2817_vm4, %v2926_v50  ;;  %4157 = vmatmul.msk.f32.gmra.mxu0 %vm2817_vm4, %v3075_v34 }
 0x559   : > { %4131 = vmatmul.msk.f32.gmra.mxu1 %vm2817_vm4, %v3075_v34  ;;  %4140 = vmatmul.msk.f32.gmra.mxu2 %vm2817_vm4, %v3147_v44 }
 0x55e   : > { %4114 = vmatmul.msk.f32.gmra.mxu3 %vm2817_vm4, %v3147_v44  ;;  %4158 = vmatmul.msk.f32.gmra.mxu0 %vm2817_vm4, %v3257_v9 }
 0x561   : > { %4132 = vmatmul.msk.f32.gmra.mxu1 %vm2817_vm4, %v3257_v9  ;;  %4141 = vmatmul.msk.f32.gmra.mxu2 %vm2817_vm4, %v3315_v48 }
 0x566   : > { %4143 = vmatmul.msk.f32.vlgmr.msrb.gmra.mxu3 %vm2817_vm4, %v6673_v40  ;;  %4159 = vmatmul.msk.f32.gmra.mxu0 %vm2817_vm4, %v3425_v4 }
 0x56b   : > { %v3222_v25 = vpop.f32.mrf.mxu0 }
 0x56e   : > { %v3023_v52 = vpop.f32.mrf.mxu1  ;;  %4144 = vmatmul.msk.f32.gmra.mxu3 %vm2817_vm4, %v6697_v23 }
 0x571   : > { %v2966_v59 = vpop.f32.mrf.mxu3 }
 0x572   : > { %v3024_v33 = vadd.f32 %v3023_v52, %v2966_v59 }
 0x573   : > { %v3225_v58 = vpop.f32.mrf.mxu0 }
 0x574   : > { %v3114_v12 = vpop.f32.mrf.mxu2 }
 0x575   : > { %v3136_v17 = vadd.f32 %v3114_v12, %v3024_v33 }
 0x576   : > { %v3026_v32 = vpop.f32.mrf.mxu1  ;;  %4145 = vmatmul.msk.f32.gmra.mxu3 %vm2817_vm4, %v6724_v15 }
 0x579   : > { %v2969_v29 = vpop.f32.mrf.mxu3 }
 0x57a   : > { %v3027_v6 = vadd.f32 %v3026_v32, %v2969_v29 }
 0x57b   : > { %v3228_v5 = vpop.f32.mrf.mxu0 }
 0x57c   : > { %v3117_v49 = vpop.f32.mrf.mxu2 }
 0x57d   : > { %v3137_v47 = vadd.f32 %v3117_v49, %v3027_v6 }
 0x57e   : > { %v3029_v2 = vpop.f32.mrf.mxu1  ;;  %4146 = vmatmul.msk.f32.gmra.mxu3 %vm2817_vm4, %v6757_v38 }
 0x581   : > { %v2972_v40 = vpop.f32.mrf.mxu3 }
 0x582   : > { %v3030_v10 = vadd.f32 %v3029_v2, %v2972_v40 }
 0x583   : > { %v3231_v50 = vpop.f32.mrf.mxu0 }
 0x584   : > { %v3120_v16 = vpop.f32.mrf.mxu2 }
 0x585   : > { %v3138_v23 = vadd.f32 %v3120_v16, %v3030_v10 }
 0x586   : > { %v3032_v7 = vpop.f32.mrf.mxu1  ;;  %4147 = vmatmul.msk.f32.gmra.mxu3 %vm2817_vm4, %v6781_v63 }
 0x589   : > { %v2975_v15 = vpop.f32.mrf.mxu3 }
 0x58a   : > { %v3033_v31 = vadd.f32 %v3032_v7, %v2975_v15 }
 0x58b   : > { %v3234_v24 = vpop.f32.mrf.mxu0 }
 0x58c   : > { %v3123_v53 = vpop.f32.mrf.mxu2 }
 0x58d   : > { %v3139_v38 = vadd.f32 %v3123_v53, %v3033_v31 }
 0x58e   : > { %4148 = vmatmul.msk.f32.gmra.mxu3 %vm2817_vm4, %v6795_v8  ;;  %v3035_v62 = vpop.f32.mrf.mxu1 }
 0x591   : > { %v2978_v57 = vpop.f32.mrf.mxu3 }
 0x592   : > { %v3036_v21 = vadd.f32 %v3035_v62, %v2978_v57 }
 0x594   : > { %v3126_v56 = vpop.f32.mrf.mxu2 }
 0x595   : > { %v3140_v63 = vadd.f32 %v3126_v56, %v3036_v21 }
 0x596   : > { %4149 = vmatmul.msk.f32.gmra.mxu3 %vm2817_vm4, %v6808_v20  ;;  %v3038_v41 = vpop.f32.mrf.mxu1 }
 0x599   : > { %v2981_v11 = vpop.f32.mrf.mxu3 }
 0x59a   : > { %v3039_v27 = vadd.f32 %v3038_v41, %v2981_v11 }
 0x59c   : > { %v3129_v0 = vpop.f32.mrf.mxu2 }
 0x59d   : > { %v3141_v39 = vadd.f32 %v3129_v0, %v3039_v27 }
 0x59e   : > { %4150 = vmatmul.msk.f32.gmra.mxu3 %vm2817_vm4, %v2885_v1  ;;  %v3041_v19 = vpop.f32.mrf.mxu1  ;;  %v3237_v1 = vpop.f32.mrf.mxu0 }
 0x5a1   : > { %v2984_v28 = vpop.f32.mrf.mxu3 }
 0x5a4   : > { %v3132_v8 = vpop.f32.mrf.mxu2 }
 0x5a6   : > { %v3279_v55 = vpop.f32.mrf.mxu1 }
 0x5a9   : > { %v3169_v35 = vpop.f32.mrf.mxu3 }
 0x5aa   : > { %v3193_v22 = vadd.f32 %v3169_v35, %v6857_v45  ;;  %v3240_v45 = vpop.f32.mrf.mxu0 }
 0x5ac   : > { %v3246_v34 = vadd.f32 %v3222_v25, %v3193_v22  ;;  %v3337_v20 = vpop.f32.mrf.mxu2 }
 0x5ae   : > { %v3303_v54 = vadd.f32 %v3279_v55, %v3246_v34  ;;  %v3282_v6 = vpop.f32.mrf.mxu1  ;;  %v3526_v34 = vld [vmem:[#allocation7 + $0x8] sm:$0xff]  ;;  %v3554_v55 = vld [vmem:[#allocation7 + $0x18] sm:$0xff] }
 0x5af   : > { %3545 = vmatpush.msrb.mxu2 %v3526_v34  ;;  %3572 = vmatpush.msra.mxu3 %v3554_v55 }
 0x5b0   : > { %v3361_v42 = vadd.f32 %v3337_v20, %v3303_v54  ;;  %v3525_v54 = vld [vmem:[#allocation7] sm:$0xff] }
 0x5b1   : > { %v3172_v46 = vpop.f32.mrf.mxu3  ;;  %3546 = vmatpush.msrb.mxu2 %v3525_v54 }
 0x5b2   : > { %v3194_v18 = vadd.f32 %v3172_v46, %v3136_v17  ;;  %v3243_v59 = vpop.f32.mrf.mxu0 }
 0x5b4   : > { %v6889_v37 = vadd.f32 %v3225_v58, %v3194_v18 }
 0x5b6   : > { %v3285_v40 = vpop.f32.mrf.mxu1 }
 0x5b9   : > { %v3175_v43 = vpop.f32.mrf.mxu3 }
 0x5ba   : > { %v3195_v36 = vadd.f32 %v3175_v43, %v3137_v47  ;;  %v3447_v29 = vpop.f32.mrf.mxu0  ;;  %v6893_v47 = vpop.f32.mrf.mxu2 }
 0x5bc   : > { %v6891_v30 = vadd.f32 %v3228_v5, %v3195_v36 }
 0x5be   : > { %v3288_v60 = vpop.f32.mrf.mxu1 }
 0x5c1   : > { %v3178_v44 = vpop.f32.mrf.mxu3 }
 0x5c2   : > { %v3196_v61 = vadd.f32 %v3178_v44, %v3138_v23  ;;  %v6895_v2 = vpop.f32.mrf.mxu0  ;;  %v3343_v7 = vpop.f32.mrf.mxu2 }
 0x5c4   : > { %v3249_v14 = vadd.f32 %v3231_v50, %v3196_v61 }
 0x5c6   : > { %v3291_v53 = vpop.f32.mrf.mxu1 }
 0x5c9   : > { %v3181_v51 = vpop.f32.mrf.mxu3 }
 0x5ca   : > { %v3197_v13 = vadd.f32 %v3181_v51, %v3139_v38  ;;  %v6899_v26 = vpop.f32.mrf.mxu0  ;;  %v3346_v15 = vpop.f32.mrf.mxu2  ;;  %v3304_v51 = vadd.f32 %v3282_v6, %v6889_v37 }
 0x5cc   : > { %v3250_v9 = vadd.f32 %v3234_v24, %v3197_v13  ;;  %v3306_v24 = vadd.f32 %v3288_v60, %v3249_v14  ;;  %v4236_v14 = vld [vmem:[%s6953_s5] ss:$0 sm:$0xff] }
 0x5ce   : > { %v3294_v57 = vpop.f32.mrf.mxu1  ;;  %v3307_v18 = vadd.f32 %v3291_v53, %v3250_v9 }
 0x5d1   : > { %v3184_v48 = vpop.f32.mrf.mxu3 }
 0x5d2   : > { %v3198_v52 = vadd.f32 %v3184_v48, %v3140_v63  ;;  %v3456_v31 = vpop.f32.mrf.mxu0  ;;  %v3349_v25 = vpop.f32.mrf.mxu2  ;;  %v3042_v63 = vadd.f32 %v3041_v19, %v2984_v28 }
 0x5d3   : > { %v3365_v44 = vadd.f32 %v3349_v25, %v3307_v18 }
 0x5d4   : > { %v3251_v33 = vadd.f32 %v3237_v1, %v3198_v52  ;;  %v3142_v27 = vadd.f32 %v3132_v8, %v3042_v63  ;;  %v3305_v1 = vadd.f32 %v3285_v40, %v6891_v30  ;;  %v3364_v52 = vadd.f32 %v3346_v15, %v3306_v24 }
 0x5d5   : > { %v3362_v30 = vadd.f32 %v6893_v47, %v3304_v51 }
 0x5d6   : > { %v3297_v41 = vpop.f32.mrf.mxu1  ;;  %v3308_v20 = vadd.f32 %v3294_v57, %v3251_v33 }
 0x5d9   : > { %v3187_v12 = vpop.f32.mrf.mxu3 }
 0x5da   : > { %v3199_v17 = vadd.f32 %v3187_v12, %v3141_v39  ;;  %v3459_v62 = vpop.f32.mrf.mxu0  ;;  %v3352_v56 = vpop.f32.mrf.mxu2  ;;  %v3363_v12 = vadd.f32 %v3343_v7, %v3305_v1 }
 0x5db   : > { %v3366_v43 = vadd.f32 %v3352_v56, %v3308_v20 }
 0x5dc   : > { %v3252_v32 = vadd.f32 %v3240_v45, %v3199_v17 }
 0x5de   : > { %v3309_v5 = vadd.f32 %v3297_v41, %v3252_v32  ;;  %v3300_v46 = vpop.f32.mrf.mxu1  ;;  %v3607_v41 = vld [vmem:[#allocation7 + $0x30] sm:$0xff] }
 0x5e1   : > { %v3190_v49 = vpop.f32.mrf.mxu3 }
 0x5e2   : > { %v3462_v58 = vpop.f32.mrf.mxu0  ;;  %v3200_v0 = vadd.f32 %v3190_v49, %v3142_v27  ;;  %v3355_v39 = vpop.f32.mrf.mxu2  ;;  %v3580_v27 = vld [vmem:[#allocation7 + $0x20] sm:$0xff] }
 0x5e3   : > { %v3367_v28 = vadd.f32 %v3355_v39, %v3309_v5 }
 0x5e4   : > { %v3253_v35 = vadd.f32 %v3243_v59, %v3200_v0 }
 0x5e6   : > { %v3310_v19 = vadd.f32 %v3300_v46, %v3253_v35  ;;  %v3524_v35 = vld [vmem:[%s6956_s8] sm:$0x1] }
 0x5e9   : > { %v3390_v10 = vpop.f32.mrf.mxu3 }
 0x5ea   : > { %v3414_v16 = vadd.f32 %v3390_v10, %v3361_v42  ;;  %v3465_v22 = vpop.f32.mrf.mxu0  ;;  %v3553_v42 = vld [vmem:[#allocation7 + $0x10] sm:$0xff]  ;;  %v3358_v8 = vpop.f32.mrf.mxu2 }
 0x5eb   : > { %3573 = vmatpush.msra.mxu3 %v3553_v42  ;;  %v3368_v61 = vadd.f32 %v3358_v8, %v3310_v19 }
 0x5ec   : > { %v6897_v23 = vadd.f32 %v3447_v29, %v3414_v16 }
 0x5f1   : > { %v3393_v3 = vpop.f32.mrf.mxu3 }
 0x5f2   : > { %v3468_v48 = vpop.f32.mrf.mxu0  ;;  %v3415_v6 = vadd.f32 %v3393_v3, %v3362_v30 }
 0x5f9   : > { %v3396_v4 = vpop.f32.mrf.mxu3 }
 0x5fa   : > { %v3416_v49 = vadd.f32 %v3396_v4, %v3363_v12 }
 0x5fc   : > { %v3473_v53 = vadd.f32 %v6899_v26, %v3416_v49 }
 0x5fe   : > { %v3485_v4 = vadd.f32 %v4236_v14, %v3473_v53 }
 0x600   : > { %v3493_v3 = vmax.f32 %v3485_v4, 0.0 }
 0x601   : > { %v3399_v38 = vpop.f32.mrf.mxu3 }
 0x602   : > { %v3417_v17 = vadd.f32 %v3399_v38, %v3364_v52  ;;  %v3472_v38 = vadd.f32 %v6895_v2, %v3415_v6  ;;  %v3499_v2 = vld [vmem:[%s6954_s6] sm:$0xf] }
 0x604   : > { %v3474_v16 = vadd.f32 %v3456_v31, %v3417_v17  ;;  %v3484_v56 = vadd.f32 %v4236_v14, %v3472_v38  ;;  %v3483_v31 = vadd.f32 %v4236_v14, %v6897_v23 }
 0x606   : > { %v3492_v26 = vmax.f32 %v3484_v56, 0.0  ;;  %v3491_v63 = vmax.f32 %v3483_v31, 0.0 }
 0x609   : > { %v3402_v21 = vpop.f32.mrf.mxu3 }
 0x60a   : > { %v3418_v59 = vadd.f32 %v3402_v21, %v3365_v44  ;;  %v3486_v21 = vadd.f32 %v4236_v14, %v3474_v16 }
 0x60c   : > { %v3475_v40 = vadd.f32 %v3459_v62, %v3418_v59  ;;  %v3494_v62 = vmax.f32 %v3486_v21, 0.0 }
 0x60e   : > { %v3487_v25 = vadd.f32 %v4236_v14, %v3475_v40 }
 0x610   : > { %v3495_v47 = vmax.f32 %v3487_v25, 0.0 }
 0x611   : > { %v3405_v11 = vpop.f32.mrf.mxu3 }
 0x612   : > { %v3419_v45 = vadd.f32 %v3405_v11, %v3366_v43  ;;  %v3581_v11 = vld [vmem:[#allocation7 + $0x28] sm:$0xff] }
 0x614   : > { %v3476_v32 = vadd.f32 %v3462_v58, %v3419_v45  ;;  %v3608_v58 = vld [vmem:[#allocation7 + $0x38] sm:$0xff] }
 0x615   : > { %3626 = vmatpush.msra.mxu2 %v3608_v58 }
 0x616   : > { %v3488_v15 = vadd.f32 %v4236_v14, %v3476_v32 }
 0x617   : > { %3627 = vmatpush.msra.mxu2 %v3607_v41 }
 0x618   : > { %v3496_v57 = vmax.f32 %v3488_v15, 0.0 }
 0x619   : > { %v3408_v50 = vpop.f32.mrf.mxu3 }
 0x61a   : > { %v3420_v36 = vadd.f32 %v3408_v50, %v3367_v28 }
 0x61c   : > { %v3477_v9 = vadd.f32 %v3465_v22, %v3420_v36 }
 0x61e   : > { %v3489_v37 = vadd.f32 %v4236_v14, %v3477_v9 }
 0x620   : > { %v3497_v7 = vmax.f32 %v3489_v37, 0.0 }
 0x621   : > { %v3411_v13 = vpop.f32.mrf.mxu3 }
 0x622   : > { %v3421_v33 = vadd.f32 %v3411_v13, %v3368_v61 }
 0x624   : > { %v3478_v29 = vadd.f32 %v3468_v48, %v3421_v33 }
 0x626   : > { %v3490_v10 = vadd.f32 %v4236_v14, %v3478_v29 }
 0x628   : > { %v3498_v60 = vmax.f32 %v3490_v10, 0.0 }
 0x62a   : > { %3512 = vmatpush.msra.mxu1 %v3498_v60 }
 0x62c   : > { %3513 = vmatpush.msra.mxu1 %v3497_v7 }
 0x62e   : > { %3514 = vmatpush.msra.mxu1 %v3496_v57 }
 0x630   : > { %3515 = vmatpush.msra.mxu1 %v3495_v47 }
 0x632   : > { %3516 = vmatpush.msra.mxu1 %v3494_v62 }
 0x634   : > { %3517 = vmatpush.msra.mxu1 %v3493_v3 }
 0x636   : > { %3518 = vmatpush.msra.mxu1 %v3492_v26 }
 0x638   : > { %3519 = vmatpush.msra.mxu1 %v3491_v63 }
 0x639   : > { %4160 = vmatmul.msk.f32.vlgmr.msra.gmra.mxu1 %vm3500_vm5, %v3499_v2 }
 0x63a   : > { %3599 = vmatpush.msrb.mxu1 %v3581_v11 }
 0x63c   : > { %3600 = vmatpush.msrb.mxu1 %v3580_v27 }
 0x6b6   : > { %v3521_v23 = vpop.f32.mrf.mxu1 }
 0x6b7   : > { %v3555_v0 = vrot.slane %v3521_v23, 1  ;;  %v3582_v39 = vrot.slane %v3521_v23, 2  ;;  %4161 = vmatmul.msk.f32.vlgmr.msrb.gmra.mxu2 %vm3527_vm6, %v3521_v23  ;;  %v3609_v5 = vrot.slane %v3521_v23, 3 }
 0x6b9   : > { %4162 = vmatmul.msk.f32.vlgmr.msra.gmra.mxu3 %vm3527_vm6, %v3555_v0  ;;  %4163 = vmatmul.msk.f32.vlgmr.msrb.gmra.mxu1 %vm3527_vm6, %v3582_v39 }
 0x6bf   : > { %4164 = vmatmul.msk.f32.vlgmr.msra.gmra.mxu2 %vm3527_vm6, %v3609_v5 }
 0x736   : > { %v3602_v54 = vpop.f32.mrf.mxu1 }
 0x73a   : > { %v3548_v22 = vpop.f32.mrf.mxu2 }
 0x73b   : > { %v3551_v50 = vadd.f32 %v3548_v22, %v3524_v35 }
 0x73c   : > { %v3575_v34 = vpop.f32.mrf.mxu3 }
 0x73d   : > { %v3578_v55 = vadd.f32 %v3575_v34, %v3551_v50 }
 0x73f   : > { %v3605_v20 = vadd.f32 %v3602_v54, %v3578_v55 }
 0x742   : > { %v3629_v42 = vpop.f32.mrf.mxu2 }
 0x743   : > { %v3632_v46 = vadd.f32 %v3629_v42, %v3605_v20 }
 0x745   : > { %3634 = vst.msk [vmem:[%s358_s29] sm:$0x1] %vm3633_vm7, %v3632_v46 }
 0x746   : > { %4336 = shalt.err (!%p4333_p8)
}
 0x747   : > { %4178 = dma.vmem_to_hbm [thread:$0]  (%p4476_p5), %s3647_s14, 16, %s3649_s16, %s3636_s17  }
 0x748 PF: > { %p4195_p9 = scmp.ge.s32.totalorder %s4379_s12, 2  ;;  %s3660_s25 = sand.u32 1, %s4367_s30  }
 0x749   : > { %s3661_s27 = scalar_lea.sflag [#allocation6], %s3660_s25 }
 0x74a   : > { %p4188_p10 = pnand %p4195_p9, %p4480_p6 }
 0x74c   : > { %p4189_p11 = pneg %p4188_p10 }
 0x74e   : > { %4362 = dma.done.wait (%p4189_p11), %s3661_s27, 16  }
 0x74f   : > { %4364 = vsyncadd (%p4189_p11), %s3661_s27, 4294967280  ;;  %p21_p12 = scmp.ge.s32.totalorder %s4463_s15, 4   ;;  %s7332_s30 = smov %s4371_s10 }
 0x750   : > { %s7333_s10 = smov %s4375_s11  ;;  %s7334_s11 = smov %s4474_s18 }
 0x751   : > { %s7335_s12 = smov %s4463_s15  ;;  %23 = sbr.rel (!%p21_p12) target bundleno = 7 (0x7), region = 124 }
 0x756   :  { %3666 = vsyncpa [#allocation5], 1 }
 0x757   :  { %3668 = vsyncpa [#allocation5 + $0x1], 1 }
 0x758   :  { %3669 = vsyncpa [#allocation8], 1 }
 0x759   :  { %3670 = vsyncpa [#allocation6], 1 }
 0x75a   :  { %3672 = vsyncpa [#allocation6 + $0x1], 1 }

</bundles_post_ra>
